<compile_context>
chip_gen: v6e
topology: v6e:2x2x1
jax: 0.10.0
libtpu: 0.0.40
codegen_flags: <defaults>
</compile_context>

<pallas_src>
import functools
import math

import jax
import jax.numpy as jnp
from jax import lax
from jax.experimental import pallas as pl
from jax.experimental.pallas import tpu as pltpu

EPS = 1e-6


def _layernorm_torch(x, gamma, beta, d):
    # torch: mean over last dim, std unbiased (N-1), eps added to the std.
    # Exact reciprocal (one value per row -> negligible cost, tight numerics).
    mean = jnp.mean(x, axis=-1, keepdims=True)
    diff = x - mean
    var = jnp.sum(diff * diff, axis=-1, keepdims=True) * (1.0 / (d - 1))
    inv = 1.0 / (jnp.sqrt(var) + EPS)
    return gamma * (diff * inv) + beta


def encoder_layer_kernel(xq_ref, xfull_ref,
                         g0_ref, b0_ref,
                         wq_ref, bq_ref, wkv_ref, bkv_ref,
                         wo_ref, bo_ref,
                         g1_ref, b1_ref,
                         w1_ref, fb1_ref, w2_ref, fb2_ref,
                         o_ref,
                         kv_scr, q_scr, heads_scr,
                         *, d_model, n_heads, d_ff, ff_chunk):
    d_k = d_model // n_heads
    qi = pl.program_id(1)

    # ---- K/V of the FULL sequence: computed once per batch element (qi == 0),
    #      kept in VMEM scratch across all query tiles (seq axis is "arbitrary"). ----
    @pl.when(qi == 0)
    def _():
        xn_full = _layernorm_torch(xfull_ref[0], g0_ref[...], b0_ref[...], d_model)
        kv = jnp.dot(xn_full.astype(jnp.bfloat16), wkv_ref[...],
                     preferred_element_type=jnp.float32) + bkv_ref[...]   # (S, 2D) f32
        kv_scr[...] = kv.astype(jnp.bfloat16)

    x = xq_ref[0]                                              # (TQ, D) f32

    # -------- sublayer 0: x + MultiHeadAttention(LN0(x)) --------
    xn = _layernorm_torch(x, g0_ref[...], b0_ref[...], d_model)
    q = jnp.dot(xn.astype(jnp.bfloat16), wq_ref[...],
                preferred_element_type=jnp.float32) + bq_ref[...]         # (TQ, D) f32
    q = q * (1.0 / math.sqrt(d_k))          # scale Q (TQ,D), not scores (TQ,S)
    q_scr[...] = q.astype(jnp.bfloat16)

    # Static head loop with *ref* slices at static lane offsets; each head's
    # output goes straight into the heads scratch (bounded live ranges).
    for h in range(n_heads):
        lo = h * d_k
        q_h = q_scr[:, lo:lo + d_k]                            # (TQ, d_k) bf16
        k_h = kv_scr[:, lo:lo + d_k]                           # (S,  d_k) bf16
        v_h = kv_scr[:, d_model + lo:d_model + lo + d_k]       # (S,  d_k) bf16
        # contract last dims directly (no explicit transpose -> no XLU vxpose)
        scores = lax.dot_general(q_h, k_h, (((1,), (1,)), ((), ())),
                                 preferred_element_type=jnp.float32)      # (TQ, S)
        scores = scores - jnp.max(scores, axis=-1, keepdims=True)
        p = jnp.exp(scores)
        p = p * (1.0 / jnp.sum(p, axis=-1, keepdims=True))     # exact softmax denom
        heads_scr[:, lo:lo + d_k] = jnp.dot(
            p.astype(jnp.bfloat16), v_h, preferred_element_type=jnp.float32)

    # ONE (TQ, D) @ (D, D) output projection -> full-K MXU fill.
    attn = jnp.dot(heads_scr[...].astype(jnp.bfloat16), wo_ref[...],
                   preferred_element_type=jnp.float32) + bo_ref[...]
    x1 = x + attn                                              # residual (dropout == id)

    # -------- sublayer 1: x1 + PositionwiseFeedForward(LN1(x1)) --------
    xn1 = _layernorm_torch(x1, g1_ref[...], b1_ref[...], d_model)
    xn1_bf = xn1.astype(jnp.bfloat16)
    ff = jnp.zeros_like(x)                                     # (TQ, D) f32 accumulator
    for c in range(d_ff // ff_chunk):                          # bound (TQ, chunk) slab
        lo = c * ff_chunk
        hcol = jnp.dot(xn1_bf, w1_ref[:, lo:lo + ff_chunk],
                       preferred_element_type=jnp.float32) + fb1_ref[:, lo:lo + ff_chunk]
        hcol = jnp.maximum(hcol, 0.0)                          # ReLU
        ff = ff + jnp.dot(hcol.astype(jnp.bfloat16), w2_ref[lo:lo + ff_chunk, :],
                          preferred_element_type=jnp.float32)
    o_ref[0] = (x1 + ff + fb2_ref[...]).astype(o_ref.dtype)    # residual (dropout == id)


def _pick_seq_tile(S, cap=512):
    """Largest multiple-of-8 divisor of S that is <= cap (else S itself)."""
    if S <= cap:
        return S
    for t in range(cap, 7, -1):
        if S % t == 0 and t % 8 == 0:
            return t
    return S


def _pick_ff_chunk(d_ff, cap=1024):
    """Largest divisor of d_ff <= cap (prefer lane-aligned multiples of 128)."""
    if d_ff <= cap:
        return d_ff
    for c in range(cap, 0, -1):
        if d_ff % c == 0 and c % 128 == 0:
            return c
    for c in range(cap, 0, -1):
        if d_ff % c == 0:
            return c
    return d_ff


def _vmem_limit_bytes():
    # Generation-aware: ~85% of physical VMEM (v5e/v6e: 128 MiB, v7x: 64 MiB),
    # leaving headroom for compiler-internal scratch and double buffers.
    try:
        cap = pltpu.get_tpu_info().vmem_capacity_bytes
    except Exception:
        cap = 128 * 1024 * 1024
    return int(cap * 0.85)


def encoder_layer(x, params, *, n_heads):
    B, S, D = x.shape
    d_ff = params["w1"].shape[1]
    assert D % n_heads == 0, "d_model must be divisible by n_heads"

    cdt = jnp.bfloat16   # MXU operand dtype; accumulation stays f32 inside the kernel
    wq = params["wq"].astype(cdt)
    wkv = jnp.concatenate([params["wk"], params["wv"]], axis=1).astype(cdt)
    bkv = jnp.concatenate([params["bk"], params["bv"]], axis=1)
    wo = params["wo"].astype(cdt)
    w1 = params["w1"].astype(cdt)
    w2 = params["w2"].astype(cdt)

    TQ = _pick_seq_tile(S)
    n_q = S // TQ
    ff_chunk = _pick_ff_chunk(d_ff)

    kernel = functools.partial(encoder_layer_kernel, d_model=D, n_heads=n_heads,
                               d_ff=d_ff, ff_chunk=ff_chunk)

    # Advisory cost so XLA schedules surrounding ops around the fused call.
    cost = pl.CostEstimate(
        flops=2 * B * S * D * (4 * D + 2 * S + 2 * d_ff),
        transcendentals=B * n_heads * S * S,                    # softmax exp
        bytes_accessed=(2 * B * S * D * 4                       # x in + out (f32)
                        + (4 * D * D + 2 * D * d_ff) * 2        # bf16 weights
                        + (8 * D + 2 * d_ff) * 4),              # f32 biases / LN params
    )

    args = (x, x,
            params["ln0_g"], params["ln0_b"],
            wq, params["bq"], wkv, bkv, wo, params["bo"],
            params["ln1_g"], params["ln1_b"],
            w1, params["b1"], w2, params["b2"])

    def build_call(weight_mode):
        def wspec(shape):
            # Grid-invariant operands: block index is always (0, 0).
            if weight_mode is None:
                return pl.BlockSpec(shape, lambda b, qi: (0, 0))
            return pl.BlockSpec(shape, lambda b, qi: (0, 0), pipeline_mode=weight_mode)

        return pl.pallas_call(
            kernel,
            out_shape=jax.ShapeDtypeStruct((B, S, D), x.dtype),
            grid=(B, n_q),
            in_specs=[
                pl.BlockSpec((1, TQ, D), lambda b, qi: (b, qi, 0)),  # x (query tile)
                pl.BlockSpec((1, S, D), lambda b, qi: (b, 0, 0)),    # x (full seq -> K/V)
                wspec((1, D)), wspec((1, D)),                        # ln0 gamma, beta
                wspec((D, D)), wspec((1, D)),                        # Wq (bf16), bq
                wspec((D, 2 * D)), wspec((1, 2 * D)),                # Wkv (bf16), bkv
                wspec((D, D)), wspec((1, D)),                        # Wo (bf16), bo
                wspec((1, D)), wspec((1, D)),                        # ln1 gamma, beta
                wspec((D, d_ff)), wspec((1, d_ff)),                  # W1 (bf16), b1
                wspec((d_ff, D)), wspec((1, D)),                     # W2 (bf16), b2
            ],
            out_specs=pl.BlockSpec((1, TQ, D), lambda b, qi: (b, qi, 0)),
            scratch_shapes=[
                pltpu.VMEM((S, 2 * D), jnp.bfloat16),   # K|V of the full sequence
                pltpu.VMEM((TQ, D), jnp.bfloat16),      # Q of the current tile
                pltpu.VMEM((TQ, D), jnp.float32),       # concatenated head outputs
            ],
            compiler_params=pltpu.CompilerParams(
                dimension_semantics=("parallel", "arbitrary"),
                vmem_limit_bytes=_vmem_limit_bytes(),
            ),
            cost_estimate=cost,
        )

    # Weights are invariant across the grid -> single resident buffer is enough.
    # Fall back to default double-buffering if Buffered(1) is rejected.
    err = None
    for single_buffer_weights in (True, False):
        try:
            mode = pl.Buffered(1) if single_buffer_weights else None
            out = build_call(mode)(*args)
            jax.block_until_ready(out)
            return out
        except Exception as e:   # pragma: no cover - Buffered(1) unsupported fallback
            err = e
    raise err


def init_params(key, d_model, d_ff):
    ks = jax.random.split(key, 8)
    scale = 1.0 / math.sqrt(d_model)
    return {
        "ln0_g": jnp.ones((1, d_model), jnp.float32),
        "ln0_b": jnp.zeros((1, d_model), jnp.float32),
        "ln1_g": jnp.ones((1, d_model), jnp.float32),
        "ln1_b": jnp.zeros((1, d_model), jnp.float32),
        "wq": jax.random.normal(ks[0], (d_model, d_model), jnp.float32) * scale,
        "wk": jax.random.normal(ks[1], (d_model, d_model), jnp.float32) * scale,
        "wv": jax.random.normal(ks[2], (d_model, d_model), jnp.float32) * scale,
        "wo": jax.random.normal(ks[3], (d_model, d_model), jnp.float32) * scale,
        "bq": jnp.zeros((1, d_model), jnp.float32),
        "bk": jnp.zeros((1, d_model), jnp.float32),
        "bv": jnp.zeros((1, d_model), jnp.float32),
        "bo": jnp.zeros((1, d_model), jnp.float32),
        "w1": jax.random.normal(ks[4], (d_model, d_ff), jnp.float32) * scale,
        "b1": jnp.zeros((1, d_ff), jnp.float32),
        "w2": jax.random.normal(ks[5], (d_ff, d_model), jnp.float32) * (1.0 / math.sqrt(d_ff)),
        "b2": jnp.zeros((1, d_model), jnp.float32),
    }


if __name__ == "__main__":
    B, S, D, H = 2, 8, 32, 4          # batch, seq, model dim (size), heads
    D_FF = 4 * D

    key = jax.random.PRNGKey(0)
    kx, kp = jax.random.split(key)
    x = jax.random.normal(kx, (B, S, D), jnp.float32)
    params = init_params(kp, D, D_FF)

    out = encoder_layer(x, params, n_heads=H)
    jax.block_until_ready(out)
    assert out.shape == (B, S, D) and out.dtype == jnp.float32
    print("KERNEL_OK")
</pallas_src>

<mosaic_0001>
module attributes {stable_mosaic.version = 11 : i64} {
  func.func @encoder_layer_kernel(%arg0: i32, %arg1: i32, %arg2: memref<1x8x32xf32, #tpu.memory_space<vmem>>, %arg3: memref<1x8x32xf32, #tpu.memory_space<vmem>>, %arg4: memref<1x32xf32, #tpu.memory_space<vmem>>, %arg5: memref<1x32xf32, #tpu.memory_space<vmem>>, %arg6: memref<32x32xbf16, #tpu.memory_space<vmem>>, %arg7: memref<1x32xf32, #tpu.memory_space<vmem>>, %arg8: memref<32x64xbf16, #tpu.memory_space<vmem>>, %arg9: memref<1x64xf32, #tpu.memory_space<vmem>>, %arg10: memref<32x32xbf16, #tpu.memory_space<vmem>>, %arg11: memref<1x32xf32, #tpu.memory_space<vmem>>, %arg12: memref<1x32xf32, #tpu.memory_space<vmem>>, %arg13: memref<1x32xf32, #tpu.memory_space<vmem>>, %arg14: memref<32x128xbf16, #tpu.memory_space<vmem>>, %arg15: memref<1x128xf32, #tpu.memory_space<vmem>>, %arg16: memref<128x32xbf16, #tpu.memory_space<vmem>>, %arg17: memref<1x32xf32, #tpu.memory_space<vmem>>, %arg18: memref<1x8x32xf32, #tpu.memory_space<vmem>>, %arg19: memref<8x64xbf16, #tpu.memory_space<vmem>>, %arg20: memref<8x32xbf16, #tpu.memory_space<vmem>>, %arg21: memref<8x32xf32, #tpu.memory_space<vmem>>) attributes {dimension_semantics = [#tpu.dimension_semantics<parallel>, #tpu.dimension_semantics<arbitrary>], iteration_bounds = array<i64: 2, 1>, scalar_prefetch = 0 : i64, scratch_operands = 3 : i64, tpu.core_type = #tpu.core_type<tc>, window_params = [{transform_indices = @transform_0, window_bounds = array<i64: 1, 8, 32>}, {transform_indices = @transform_1, window_bounds = array<i64: 1, 8, 32>}, {pipeline_mode = #tpu.pipeline_mode<synchronous>, transform_indices = @transform_2, window_bounds = array<i64: 1, 32>}, {pipeline_mode = #tpu.pipeline_mode<synchronous>, transform_indices = @transform_3, window_bounds = array<i64: 1, 32>}, {pipeline_mode = #tpu.pipeline_mode<synchronous>, transform_indices = @transform_4, window_bounds = array<i64: 32, 32>}, {pipeline_mode = #tpu.pipeline_mode<synchronous>, transform_indices = @transform_5, window_bounds = array<i64: 1, 32>}, {pipeline_mode = #tpu.pipeline_mode<synchronous>, transform_indices = @transform_6, window_bounds = array<i64: 32, 64>}, {pipeline_mode = #tpu.pipeline_mode<synchronous>, transform_indices = @transform_7, window_bounds = array<i64: 1, 64>}, {pipeline_mode = #tpu.pipeline_mode<synchronous>, transform_indices = @transform_8, window_bounds = array<i64: 32, 32>}, {pipeline_mode = #tpu.pipeline_mode<synchronous>, transform_indices = @transform_9, window_bounds = array<i64: 1, 32>}, {pipeline_mode = #tpu.pipeline_mode<synchronous>, transform_indices = @transform_10, window_bounds = array<i64: 1, 32>}, {pipeline_mode = #tpu.pipeline_mode<synchronous>, transform_indices = @transform_11, window_bounds = array<i64: 1, 32>}, {pipeline_mode = #tpu.pipeline_mode<synchronous>, transform_indices = @transform_12, window_bounds = array<i64: 32, 128>}, {pipeline_mode = #tpu.pipeline_mode<synchronous>, transform_indices = @transform_13, window_bounds = array<i64: 1, 128>}, {pipeline_mode = #tpu.pipeline_mode<synchronous>, transform_indices = @transform_14, window_bounds = array<i64: 128, 32>}, {pipeline_mode = #tpu.pipeline_mode<synchronous>, transform_indices = @transform_15, window_bounds = array<i64: 1, 32>}, {transform_indices = @transform_16, window_bounds = array<i64: 1, 8, 32>}]} {
    %c0_i32 = arith.constant 0 : i32
    %0 = arith.cmpi eq, %arg1, %c0_i32 : i32
    %1 = arith.extui %0 : i1 to i32
    %c0_i32_0 = arith.constant 0 : i32
    %2 = arith.cmpi ne, %1, %c0_i32_0 : i32
    scf.if %2 {
      %c0_97 = arith.constant 0 : index
      %c0_98 = arith.constant 0 : index
      %c0_99 = arith.constant 0 : index
      %163 = vector.load %arg3[%c0_97, %c0_98, %c0_99] : memref<1x8x32xf32, #tpu.memory_space<vmem>>, vector<1x8x32xf32>
      %164 = vector.shape_cast %163 : vector<1x8x32xf32> to vector<8x32xf32>
      %c0_100 = arith.constant 0 : index
      %c0_101 = arith.constant 0 : index
      %165 = vector.load %arg4[%c0_100, %c0_101] : memref<1x32xf32, #tpu.memory_space<vmem>>, vector<1x32xf32>
      %c0_102 = arith.constant 0 : index
      %c0_103 = arith.constant 0 : index
      %166 = vector.load %arg5[%c0_102, %c0_103] : memref<1x32xf32, #tpu.memory_space<vmem>>, vector<1x32xf32>
      %cst_104 = arith.constant dense<0.000000e+00> : vector<8xf32>
      %167 = vector.multi_reduction <add>, %164, %cst_104 [1] : vector<8x32xf32> to vector<8xf32>
      %168 = vector.shape_cast %167 : vector<8xf32> to vector<8x1xf32>
      %cst_105 = arith.constant 3.200000e+01 : f32
      %169 = vector.broadcast %cst_105 : f32 to vector<8x1xf32>
      %170 = arith.divf %168, %169 : vector<8x1xf32>
      %171 = vector.broadcast %170 : vector<8x1xf32> to vector<8x32xf32>
      %172 = arith.subf %164, %171 : vector<8x32xf32>
      %173 = arith.mulf %172, %172 : vector<8x32xf32>
      %cst_106 = arith.constant dense<0.000000e+00> : vector<8xf32>
      %174 = vector.multi_reduction <add>, %173, %cst_106 [1] : vector<8x32xf32> to vector<8xf32>
      %175 = vector.shape_cast %174 : vector<8xf32> to vector<8x1xf32>
      %cst_107 = arith.constant 0.0322580636 : f32
      %176 = vector.broadcast %cst_107 : f32 to vector<8x1xf32>
      %177 = arith.mulf %175, %176 : vector<8x1xf32>
      %178 = math.sqrt %177 : vector<8x1xf32>
      %cst_108 = arith.constant 9.99999997E-7 : f32
      %179 = vector.broadcast %cst_108 : f32 to vector<8x1xf32>
      %180 = arith.addf %178, %179 : vector<8x1xf32>
      %cst_109 = arith.constant 1.000000e+00 : f32
      %181 = vector.broadcast %cst_109 : f32 to vector<8x1xf32>
      %182 = arith.divf %181, %180 : vector<8x1xf32>
      %183 = vector.broadcast %182 : vector<8x1xf32> to vector<8x32xf32>
      %184 = arith.mulf %172, %183 : vector<8x32xf32>
      %185 = vector.broadcast %165 : vector<1x32xf32> to vector<8x32xf32>
      %186 = arith.mulf %185, %184 : vector<8x32xf32>
      %187 = vector.broadcast %166 : vector<1x32xf32> to vector<8x32xf32>
      %188 = arith.addf %186, %187 : vector<8x32xf32>
      %189 = arith.truncf %188 : vector<8x32xf32> to vector<8x32xbf16>
      %c0_110 = arith.constant 0 : index
      %c0_111 = arith.constant 0 : index
      %190 = vector.load %arg8[%c0_110, %c0_111] : memref<32x64xbf16, #tpu.memory_space<vmem>>, vector<32x64xbf16>
      %cst_112 = arith.constant dense<0.000000e+00> : vector<8x64xf32>
      %191 = tpu.matmul %189, %190, %cst_112 {dimension_numbers = #tpu.dot_dimension_numbers<[1], [0], [0], [1], [0, 0, 1, 1], [], []>} : vector<8x32xbf16>, vector<32x64xbf16>, vector<8x64xf32> -> vector<8x64xf32>
      %c0_113 = arith.constant 0 : index
      %c0_114 = arith.constant 0 : index
      %192 = vector.load %arg9[%c0_113, %c0_114] : memref<1x64xf32, #tpu.memory_space<vmem>>, vector<1x64xf32>
      %193 = vector.broadcast %192 : vector<1x64xf32> to vector<8x64xf32>
      %194 = arith.addf %191, %193 : vector<8x64xf32>
      %195 = arith.truncf %194 : vector<8x64xf32> to vector<8x64xbf16>
      %c0_115 = arith.constant 0 : index
      %c0_116 = arith.constant 0 : index
      %196 = vector.load %arg19[%c0_115, %c0_116] : memref<8x64xbf16, #tpu.memory_space<vmem>>, vector<8x64xbf16>
      tpu.vector_store %arg19[%c0_115, %c0_116], %195 {strides = array<i32>} : memref<8x64xbf16, #tpu.memory_space<vmem>>, vector<8x64xbf16>,
    } else {
    }
    %c0 = arith.constant 0 : index
    %c0_1 = arith.constant 0 : index
    %c0_2 = arith.constant 0 : index
    %3 = vector.load %arg2[%c0, %c0_1, %c0_2] : memref<1x8x32xf32, #tpu.memory_space<vmem>>, vector<1x8x32xf32>
    %4 = vector.shape_cast %3 : vector<1x8x32xf32> to vector<8x32xf32>
    %c0_3 = arith.constant 0 : index
    %c0_4 = arith.constant 0 : index
    %5 = vector.load %arg4[%c0_3, %c0_4] : memref<1x32xf32, #tpu.memory_space<vmem>>, vector<1x32xf32>
    %c0_5 = arith.constant 0 : index
    %c0_6 = arith.constant 0 : index
    %6 = vector.load %arg5[%c0_5, %c0_6] : memref<1x32xf32, #tpu.memory_space<vmem>>, vector<1x32xf32>
    %cst = arith.constant dense<0.000000e+00> : vector<8xf32>
    %7 = vector.multi_reduction <add>, %4, %cst [1] : vector<8x32xf32> to vector<8xf32>
    %8 = vector.shape_cast %7 : vector<8xf32> to vector<8x1xf32>
    %cst_7 = arith.constant 3.200000e+01 : f32
    %9 = vector.broadcast %cst_7 : f32 to vector<8x1xf32>
    %10 = arith.divf %8, %9 : vector<8x1xf32>
    %11 = vector.broadcast %10 : vector<8x1xf32> to vector<8x32xf32>
    %12 = arith.subf %4, %11 : vector<8x32xf32>
    %13 = arith.mulf %12, %12 : vector<8x32xf32>
    %cst_8 = arith.constant dense<0.000000e+00> : vector<8xf32>
    %14 = vector.multi_reduction <add>, %13, %cst_8 [1] : vector<8x32xf32> to vector<8xf32>
    %15 = vector.shape_cast %14 : vector<8xf32> to vector<8x1xf32>
    %cst_9 = arith.constant 0.0322580636 : f32
    %16 = vector.broadcast %cst_9 : f32 to vector<8x1xf32>
    %17 = arith.mulf %15, %16 : vector<8x1xf32>
    %18 = math.sqrt %17 : vector<8x1xf32>
    %cst_10 = arith.constant 9.99999997E-7 : f32
    %19 = vector.broadcast %cst_10 : f32 to vector<8x1xf32>
    %20 = arith.addf %18, %19 : vector<8x1xf32>
    %cst_11 = arith.constant 1.000000e+00 : f32
    %21 = vector.broadcast %cst_11 : f32 to vector<8x1xf32>
    %22 = arith.divf %21, %20 : vector<8x1xf32>
    %23 = vector.broadcast %22 : vector<8x1xf32> to vector<8x32xf32>
    %24 = arith.mulf %12, %23 : vector<8x32xf32>
    %25 = vector.broadcast %5 : vector<1x32xf32> to vector<8x32xf32>
    %26 = arith.mulf %25, %24 : vector<8x32xf32>
    %27 = vector.broadcast %6 : vector<1x32xf32> to vector<8x32xf32>
    %28 = arith.addf %26, %27 : vector<8x32xf32>
    %29 = arith.truncf %28 : vector<8x32xf32> to vector<8x32xbf16>
    %c0_12 = arith.constant 0 : index
    %c0_13 = arith.constant 0 : index
    %30 = vector.load %arg6[%c0_12, %c0_13] : memref<32x32xbf16, #tpu.memory_space<vmem>>, vector<32x32xbf16>
    %cst_14 = arith.constant dense<0.000000e+00> : vector<8x32xf32>
    %31 = tpu.matmul %29, %30, %cst_14 {dimension_numbers = #tpu.dot_dimension_numbers<[1], [0], [0], [1], [0, 0, 1, 1], [], []>} : vector<8x32xbf16>, vector<32x32xbf16>, vector<8x32xf32> -> vector<8x32xf32>
    %c0_15 = arith.constant 0 : index
    %c0_16 = arith.constant 0 : index
    %32 = vector.load %arg7[%c0_15, %c0_16] : memref<1x32xf32, #tpu.memory_space<vmem>>, vector<1x32xf32>
    %33 = vector.broadcast %32 : vector<1x32xf32> to vector<8x32xf32>
    %34 = arith.addf %31, %33 : vector<8x32xf32>
    %cst_17 = arith.constant 0.353553385 : f32
    %35 = vector.broadcast %cst_17 : f32 to vector<8x32xf32>
    %36 = arith.mulf %34, %35 : vector<8x32xf32>
    %37 = arith.truncf %36 : vector<8x32xf32> to vector<8x32xbf16>
    %c0_18 = arith.constant 0 : index
    %c0_19 = arith.constant 0 : index
    %38 = vector.load %arg20[%c0_18, %c0_19] : memref<8x32xbf16, #tpu.memory_space<vmem>>, vector<8x32xbf16>
    tpu.vector_store %arg20[%c0_18, %c0_19], %37 {strides = array<i32>} : memref<8x32xbf16, #tpu.memory_space<vmem>>, vector<8x32xbf16>,
    %c0_20 = arith.constant 0 : index
    %c0_21 = arith.constant 0 : index
    %39 = vector.load %arg20[%c0_20, %c0_21] : memref<8x32xbf16, #tpu.memory_space<vmem>>, vector<8x8xbf16>
    %c0_22 = arith.constant 0 : index
    %c0_23 = arith.constant 0 : index
    %40 = vector.load %arg19[%c0_22, %c0_23] : memref<8x64xbf16, #tpu.memory_space<vmem>>, vector<8x8xbf16>
    %c0_24 = arith.constant 0 : index
    %c32 = arith.constant 32 : index
    %41 = vector.load %arg19[%c0_24, %c32] : memref<8x64xbf16, #tpu.memory_space<vmem>>, vector<8x8xbf16>
    %cst_25 = arith.constant dense<0.000000e+00> : vector<8x8xf32>
    %42 = tpu.matmul %39, %40, %cst_25 {dimension_numbers = #tpu.dot_dimension_numbers<[1], [1], [0], [0], [0, 0, 1, 0], [], []>} : vector<8x8xbf16>, vector<8x8xbf16>, vector<8x8xf32> -> vector<8x8xf32>
    %cst_26 = arith.constant dense<0xFF800000> : vector<8xf32>
    %43 = vector.multi_reduction <maximumf>, %42, %cst_26 [1] : vector<8x8xf32> to vector<8xf32>
    %44 = vector.shape_cast %43 : vector<8xf32> to vector<8x1xf32>
    %45 = vector.broadcast %44 : vector<8x1xf32> to vector<8x8xf32>
    %46 = arith.subf %42, %45 : vector<8x8xf32>
    %47 = math.exp %46 : vector<8x8xf32>
    %cst_27 = arith.constant dense<0.000000e+00> : vector<8xf32>
    %48 = vector.multi_reduction <add>, %47, %cst_27 [1] : vector<8x8xf32> to vector<8xf32>
    %49 = vector.shape_cast %48 : vector<8xf32> to vector<8x1xf32>
    %cst_28 = arith.constant 1.000000e+00 : f32
    %50 = vector.broadcast %cst_28 : f32 to vector<8x1xf32>
    %51 = arith.divf %50, %49 : vector<8x1xf32>
    %52 = vector.broadcast %51 : vector<8x1xf32> to vector<8x8xf32>
    %53 = arith.mulf %47, %52 : vector<8x8xf32>
    %54 = arith.truncf %53 : vector<8x8xf32> to vector<8x8xbf16>
    %cst_29 = arith.constant dense<0.000000e+00> : vector<8x8xf32>
    %55 = tpu.matmul %54, %41, %cst_29 {dimension_numbers = #tpu.dot_dimension_numbers<[1], [0], [0], [1], [0, 0, 1, 1], [], []>} : vector<8x8xbf16>, vector<8x8xbf16>, vector<8x8xf32> -> vector<8x8xf32>
    %c0_30 = arith.constant 0 : index
    %c0_31 = arith.constant 0 : index
    %56 = vector.load %arg21[%c0_30, %c0_31] : memref<8x32xf32, #tpu.memory_space<vmem>>, vector<8x8xf32>
    tpu.vector_store %arg21[%c0_30, %c0_31], %55 {strides = array<i32>} : memref<8x32xf32, #tpu.memory_space<vmem>>, vector<8x8xf32>,
    %c0_32 = arith.constant 0 : index
    %c8 = arith.constant 8 : index
    %57 = vector.load %arg20[%c0_32, %c8] : memref<8x32xbf16, #tpu.memory_space<vmem>>, vector<8x8xbf16>
    %c0_33 = arith.constant 0 : index
    %c8_34 = arith.constant 8 : index
    %58 = vector.load %arg19[%c0_33, %c8_34] : memref<8x64xbf16, #tpu.memory_space<vmem>>, vector<8x8xbf16>
    %c0_35 = arith.constant 0 : index
    %c40 = arith.constant 40 : index
    %59 = vector.load %arg19[%c0_35, %c40] : memref<8x64xbf16, #tpu.memory_space<vmem>>, vector<8x8xbf16>
    %cst_36 = arith.constant dense<0.000000e+00> : vector<8x8xf32>
    %60 = tpu.matmul %57, %58, %cst_36 {dimension_numbers = #tpu.dot_dimension_numbers<[1], [1], [0], [0], [0, 0, 1, 0], [], []>} : vector<8x8xbf16>, vector<8x8xbf16>, vector<8x8xf32> -> vector<8x8xf32>
    %cst_37 = arith.constant dense<0xFF800000> : vector<8xf32>
    %61 = vector.multi_reduction <maximumf>, %60, %cst_37 [1] : vector<8x8xf32> to vector<8xf32>
    %62 = vector.shape_cast %61 : vector<8xf32> to vector<8x1xf32>
    %63 = vector.broadcast %62 : vector<8x1xf32> to vector<8x8xf32>
    %64 = arith.subf %60, %63 : vector<8x8xf32>
    %65 = math.exp %64 : vector<8x8xf32>
    %cst_38 = arith.constant dense<0.000000e+00> : vector<8xf32>
    %66 = vector.multi_reduction <add>, %65, %cst_38 [1] : vector<8x8xf32> to vector<8xf32>
    %67 = vector.shape_cast %66 : vector<8xf32> to vector<8x1xf32>
    %cst_39 = arith.constant 1.000000e+00 : f32
    %68 = vector.broadcast %cst_39 : f32 to vector<8x1xf32>
    %69 = arith.divf %68, %67 : vector<8x1xf32>
    %70 = vector.broadcast %69 : vector<8x1xf32> to vector<8x8xf32>
    %71 = arith.mulf %65, %70 : vector<8x8xf32>
    %72 = arith.truncf %71 : vector<8x8xf32> to vector<8x8xbf16>
    %cst_40 = arith.constant dense<0.000000e+00> : vector<8x8xf32>
    %73 = tpu.matmul %72, %59, %cst_40 {dimension_numbers = #tpu.dot_dimension_numbers<[1], [0], [0], [1], [0, 0, 1, 1], [], []>} : vector<8x8xbf16>, vector<8x8xbf16>, vector<8x8xf32> -> vector<8x8xf32>
    %c0_41 = arith.constant 0 : index
    %c8_42 = arith.constant 8 : index
    %74 = vector.load %arg21[%c0_41, %c8_42] : memref<8x32xf32, #tpu.memory_space<vmem>>, vector<8x8xf32>
    tpu.vector_store %arg21[%c0_41, %c8_42], %73 {strides = array<i32>} : memref<8x32xf32, #tpu.memory_space<vmem>>, vector<8x8xf32>,
    %c0_43 = arith.constant 0 : index
    %c16 = arith.constant 16 : index
    %75 = vector.load %arg20[%c0_43, %c16] : memref<8x32xbf16, #tpu.memory_space<vmem>>, vector<8x8xbf16>
    %c0_44 = arith.constant 0 : index
    %c16_45 = arith.constant 16 : index
    %76 = vector.load %arg19[%c0_44, %c16_45] : memref<8x64xbf16, #tpu.memory_space<vmem>>, vector<8x8xbf16>
    %c0_46 = arith.constant 0 : index
    %c48 = arith.constant 48 : index
    %77 = vector.load %arg19[%c0_46, %c48] : memref<8x64xbf16, #tpu.memory_space<vmem>>, vector<8x8xbf16>
    %cst_47 = arith.constant dense<0.000000e+00> : vector<8x8xf32>
    %78 = tpu.matmul %75, %76, %cst_47 {dimension_numbers = #tpu.dot_dimension_numbers<[1], [1], [0], [0], [0, 0, 1, 0], [], []>} : vector<8x8xbf16>, vector<8x8xbf16>, vector<8x8xf32> -> vector<8x8xf32>
    %cst_48 = arith.constant dense<0xFF800000> : vector<8xf32>
    %79 = vector.multi_reduction <maximumf>, %78, %cst_48 [1] : vector<8x8xf32> to vector<8xf32>
    %80 = vector.shape_cast %79 : vector<8xf32> to vector<8x1xf32>
    %81 = vector.broadcast %80 : vector<8x1xf32> to vector<8x8xf32>
    %82 = arith.subf %78, %81 : vector<8x8xf32>
    %83 = math.exp %82 : vector<8x8xf32>
    %cst_49 = arith.constant dense<0.000000e+00> : vector<8xf32>
    %84 = vector.multi_reduction <add>, %83, %cst_49 [1] : vector<8x8xf32> to vector<8xf32>
    %85 = vector.shape_cast %84 : vector<8xf32> to vector<8x1xf32>
    %cst_50 = arith.constant 1.000000e+00 : f32
    %86 = vector.broadcast %cst_50 : f32 to vector<8x1xf32>
    %87 = arith.divf %86, %85 : vector<8x1xf32>
    %88 = vector.broadcast %87 : vector<8x1xf32> to vector<8x8xf32>
    %89 = arith.mulf %83, %88 : vector<8x8xf32>
    %90 = arith.truncf %89 : vector<8x8xf32> to vector<8x8xbf16>
    %cst_51 = arith.constant dense<0.000000e+00> : vector<8x8xf32>
    %91 = tpu.matmul %90, %77, %cst_51 {dimension_numbers = #tpu.dot_dimension_numbers<[1], [0], [0], [1], [0, 0, 1, 1], [], []>} : vector<8x8xbf16>, vector<8x8xbf16>, vector<8x8xf32> -> vector<8x8xf32>
    %c0_52 = arith.constant 0 : index
    %c16_53 = arith.constant 16 : index
    %92 = vector.load %arg21[%c0_52, %c16_53] : memref<8x32xf32, #tpu.memory_space<vmem>>, vector<8x8xf32>
    tpu.vector_store %arg21[%c0_52, %c16_53], %91 {strides = array<i32>} : memref<8x32xf32, #tpu.memory_space<vmem>>, vector<8x8xf32>,
    %c0_54 = arith.constant 0 : index
    %c24 = arith.constant 24 : index
    %93 = vector.load %arg20[%c0_54, %c24] : memref<8x32xbf16, #tpu.memory_space<vmem>>, vector<8x8xbf16>
    %c0_55 = arith.constant 0 : index
    %c24_56 = arith.constant 24 : index
    %94 = vector.load %arg19[%c0_55, %c24_56] : memref<8x64xbf16, #tpu.memory_space<vmem>>, vector<8x8xbf16>
    %c0_57 = arith.constant 0 : index
    %c56 = arith.constant 56 : index
    %95 = vector.load %arg19[%c0_57, %c56] : memref<8x64xbf16, #tpu.memory_space<vmem>>, vector<8x8xbf16>
    %cst_58 = arith.constant dense<0.000000e+00> : vector<8x8xf32>
    %96 = tpu.matmul %93, %94, %cst_58 {dimension_numbers = #tpu.dot_dimension_numbers<[1], [1], [0], [0], [0, 0, 1, 0], [], []>} : vector<8x8xbf16>, vector<8x8xbf16>, vector<8x8xf32> -> vector<8x8xf32>
    %cst_59 = arith.constant dense<0xFF800000> : vector<8xf32>
    %97 = vector.multi_reduction <maximumf>, %96, %cst_59 [1] : vector<8x8xf32> to vector<8xf32>
    %98 = vector.shape_cast %97 : vector<8xf32> to vector<8x1xf32>
    %99 = vector.broadcast %98 : vector<8x1xf32> to vector<8x8xf32>
    %100 = arith.subf %96, %99 : vector<8x8xf32>
    %101 = math.exp %100 : vector<8x8xf32>
    %cst_60 = arith.constant dense<0.000000e+00> : vector<8xf32>
    %102 = vector.multi_reduction <add>, %101, %cst_60 [1] : vector<8x8xf32> to vector<8xf32>
    %103 = vector.shape_cast %102 : vector<8xf32> to vector<8x1xf32>
    %cst_61 = arith.constant 1.000000e+00 : f32
    %104 = vector.broadcast %cst_61 : f32 to vector<8x1xf32>
    %105 = arith.divf %104, %103 : vector<8x1xf32>
    %106 = vector.broadcast %105 : vector<8x1xf32> to vector<8x8xf32>
    %107 = arith.mulf %101, %106 : vector<8x8xf32>
    %108 = arith.truncf %107 : vector<8x8xf32> to vector<8x8xbf16>
    %cst_62 = arith.constant dense<0.000000e+00> : vector<8x8xf32>
    %109 = tpu.matmul %108, %95, %cst_62 {dimension_numbers = #tpu.dot_dimension_numbers<[1], [0], [0], [1], [0, 0, 1, 1], [], []>} : vector<8x8xbf16>, vector<8x8xbf16>, vector<8x8xf32> -> vector<8x8xf32>
    %c0_63 = arith.constant 0 : index
    %c24_64 = arith.constant 24 : index
    %110 = vector.load %arg21[%c0_63, %c24_64] : memref<8x32xf32, #tpu.memory_space<vmem>>, vector<8x8xf32>
    tpu.vector_store %arg21[%c0_63, %c24_64], %109 {strides = array<i32>} : memref<8x32xf32, #tpu.memory_space<vmem>>, vector<8x8xf32>,
    %c0_65 = arith.constant 0 : index
    %c0_66 = arith.constant 0 : index
    %111 = vector.load %arg21[%c0_65, %c0_66] : memref<8x32xf32, #tpu.memory_space<vmem>>, vector<8x32xf32>
    %112 = arith.truncf %111 : vector<8x32xf32> to vector<8x32xbf16>
    %c0_67 = arith.constant 0 : index
    %c0_68 = arith.constant 0 : index
    %113 = vector.load %arg10[%c0_67, %c0_68] : memref<32x32xbf16, #tpu.memory_space<vmem>>, vector<32x32xbf16>
    %cst_69 = arith.constant dense<0.000000e+00> : vector<8x32xf32>
    %114 = tpu.matmul %112, %113, %cst_69 {dimension_numbers = #tpu.dot_dimension_numbers<[1], [0], [0], [1], [0, 0, 1, 1], [], []>} : vector<8x32xbf16>, vector<32x32xbf16>, vector<8x32xf32> -> vector<8x32xf32>
    %c0_70 = arith.constant 0 : index
    %c0_71 = arith.constant 0 : index
    %115 = vector.load %arg11[%c0_70, %c0_71] : memref<1x32xf32, #tpu.memory_space<vmem>>, vector<1x32xf32>
    %116 = vector.broadcast %115 : vector<1x32xf32> to vector<8x32xf32>
    %117 = arith.addf %114, %116 : vector<8x32xf32>
    %118 = arith.addf %4, %117 : vector<8x32xf32>
    %c0_72 = arith.constant 0 : index
    %c0_73 = arith.constant 0 : index
    %119 = vector.load %arg12[%c0_72, %c0_73] : memref<1x32xf32, #tpu.memory_space<vmem>>, vector<1x32xf32>
    %c0_74 = arith.constant 0 : index
    %c0_75 = arith.constant 0 : index
    %120 = vector.load %arg13[%c0_74, %c0_75] : memref<1x32xf32, #tpu.memory_space<vmem>>, vector<1x32xf32>
    %cst_76 = arith.constant dense<0.000000e+00> : vector<8xf32>
    %121 = vector.multi_reduction <add>, %118, %cst_76 [1] : vector<8x32xf32> to vector<8xf32>
    %122 = vector.shape_cast %121 : vector<8xf32> to vector<8x1xf32>
    %cst_77 = arith.constant 3.200000e+01 : f32
    %123 = vector.broadcast %cst_77 : f32 to vector<8x1xf32>
    %124 = arith.divf %122, %123 : vector<8x1xf32>
    %125 = vector.broadcast %124 : vector<8x1xf32> to vector<8x32xf32>
    %126 = arith.subf %118, %125 : vector<8x32xf32>
    %127 = arith.mulf %126, %126 : vector<8x32xf32>
    %cst_78 = arith.constant dense<0.000000e+00> : vector<8xf32>
    %128 = vector.multi_reduction <add>, %127, %cst_78 [1] : vector<8x32xf32> to vector<8xf32>
    %129 = vector.shape_cast %128 : vector<8xf32> to vector<8x1xf32>
    %cst_79 = arith.constant 0.0322580636 : f32
    %130 = vector.broadcast %cst_79 : f32 to vector<8x1xf32>
    %131 = arith.mulf %129, %130 : vector<8x1xf32>
    %132 = math.sqrt %131 : vector<8x1xf32>
    %cst_80 = arith.constant 9.99999997E-7 : f32
    %133 = vector.broadcast %cst_80 : f32 to vector<8x1xf32>
    %134 = arith.addf %132, %133 : vector<8x1xf32>
    %cst_81 = arith.constant 1.000000e+00 : f32
    %135 = vector.broadcast %cst_81 : f32 to vector<8x1xf32>
    %136 = arith.divf %135, %134 : vector<8x1xf32>
    %137 = vector.broadcast %136 : vector<8x1xf32> to vector<8x32xf32>
    %138 = arith.mulf %126, %137 : vector<8x32xf32>
    %139 = vector.broadcast %119 : vector<1x32xf32> to vector<8x32xf32>
    %140 = arith.mulf %139, %138 : vector<8x32xf32>
    %141 = vector.broadcast %120 : vector<1x32xf32> to vector<8x32xf32>
    %142 = arith.addf %140, %141 : vector<8x32xf32>
    %143 = arith.truncf %142 : vector<8x32xf32> to vector<8x32xbf16>
    %cst_82 = arith.constant 0.000000e+00 : f32
    %144 = vector.broadcast %cst_82 : f32 to vector<8x32xf32>
    %c0_83 = arith.constant 0 : index
    %c0_84 = arith.constant 0 : index
    %145 = vector.load %arg14[%c0_83, %c0_84] : memref<32x128xbf16, #tpu.memory_space<vmem>>, vector<32x128xbf16>
    %cst_85 = arith.constant dense<0.000000e+00> : vector<8x128xf32>
    %146 = tpu.matmul %143, %145, %cst_85 {dimension_numbers = #tpu.dot_dimension_numbers<[1], [0], [0], [1], [0, 0, 1, 1], [], []>} : vector<8x32xbf16>, vector<32x128xbf16>, vector<8x128xf32> -> vector<8x128xf32>
    %c0_86 = arith.constant 0 : index
    %c0_87 = arith.constant 0 : index
    %147 = vector.load %arg15[%c0_86, %c0_87] : memref<1x128xf32, #tpu.memory_space<vmem>>, vector<1x128xf32>
    %148 = vector.broadcast %147 : vector<1x128xf32> to vector<8x128xf32>
    %149 = arith.addf %146, %148 : vector<8x128xf32>
    %cst_88 = arith.constant 0.000000e+00 : f32
    %150 = vector.broadcast %cst_88 : f32 to vector<8x128xf32>
    %151 = arith.maximumf %149, %150 : vector<8x128xf32>
    %152 = arith.truncf %151 : vector<8x128xf32> to vector<8x128xbf16>
    %c0_89 = arith.constant 0 : index
    %c0_90 = arith.constant 0 : index
    %153 = vector.load %arg16[%c0_89, %c0_90] : memref<128x32xbf16, #tpu.memory_space<vmem>>, vector<128x32xbf16>
    %cst_91 = arith.constant dense<0.000000e+00> : vector<8x32xf32>
    %154 = tpu.matmul %152, %153, %cst_91 {dimension_numbers = #tpu.dot_dimension_numbers<[1], [0], [0], [1], [0, 0, 1, 1], [], []>} : vector<8x128xbf16>, vector<128x32xbf16>, vector<8x32xf32> -> vector<8x32xf32>
    %155 = arith.addf %144, %154 : vector<8x32xf32>
    %156 = arith.addf %118, %155 : vector<8x32xf32>
    %c0_92 = arith.constant 0 : index
    %c0_93 = arith.constant 0 : index
    %157 = vector.load %arg17[%c0_92, %c0_93] : memref<1x32xf32, #tpu.memory_space<vmem>>, vector<1x32xf32>
    %158 = vector.broadcast %157 : vector<1x32xf32> to vector<8x32xf32>
    %159 = arith.addf %156, %158 : vector<8x32xf32>
    %c0_94 = arith.constant 0 : index
    %c0_95 = arith.constant 0 : index
    %c0_96 = arith.constant 0 : index
    %160 = vector.load %arg18[%c0_94, %c0_95, %c0_96] : memref<1x8x32xf32, #tpu.memory_space<vmem>>, vector<1x8x32xf32>
    %161 = vector.shape_cast %160 : vector<1x8x32xf32> to vector<8x32xf32>
    %162 = vector.shape_cast %159 : vector<8x32xf32> to vector<1x8x32xf32>
    tpu.vector_store %arg18[%c0_94, %c0_95, %c0_96], %162 {strides = array<i32>} : memref<1x8x32xf32, #tpu.memory_space<vmem>>, vector<1x8x32xf32>,
    return
  }
  func.func @transform_0(%arg0: i32, %arg1: i32) -> (i32, i32, i32) {
    %c0_i32 = arith.constant 0 : i32
    %c0_i32_0 = arith.constant 0 : i32
    return %arg0, %arg1, %c0_i32 : i32, i32, i32
  }
  func.func @transform_1(%arg0: i32, %arg1: i32) -> (i32, i32, i32) {
    %c0_i32 = arith.constant 0 : i32
    %c0_i32_0 = arith.constant 0 : i32
    %c0_i32_1 = arith.constant 0 : i32
    return %arg0, %c0_i32, %c0_i32_0 : i32, i32, i32
  }
  func.func @transform_2(%arg0: i32, %arg1: i32) -> (i32, i32) {
    %c0_i32 = arith.constant 0 : i32
    %c0_i32_0 = arith.constant 0 : i32
    %c0_i32_1 = arith.constant 0 : i32
    return %c0_i32, %c0_i32_0 : i32, i32
  }
  func.func @transform_3(%arg0: i32, %arg1: i32) -> (i32, i32) {
    %c0_i32 = arith.constant 0 : i32
    %c0_i32_0 = arith.constant 0 : i32
    %c0_i32_1 = arith.constant 0 : i32
    return %c0_i32, %c0_i32_0 : i32, i32
  }
  func.func @transform_4(%arg0: i32, %arg1: i32) -> (i32, i32) {
    %c0_i32 = arith.constant 0 : i32
    %c0_i32_0 = arith.constant 0 : i32
    %c0_i32_1 = arith.constant 0 : i32
    return %c0_i32, %c0_i32_0 : i32, i32
  }
  func.func @transform_5(%arg0: i32, %arg1: i32) -> (i32, i32) {
    %c0_i32 = arith.constant 0 : i32
    %c0_i32_0 = arith.constant 0 : i32
    %c0_i32_1 = arith.constant 0 : i32
    return %c0_i32, %c0_i32_0 : i32, i32
  }
  func.func @transform_6(%arg0: i32, %arg1: i32) -> (i32, i32) {
    %c0_i32 = arith.constant 0 : i32
    %c0_i32_0 = arith.constant 0 : i32
    %c0_i32_1 = arith.constant 0 : i32
    return %c0_i32, %c0_i32_0 : i32, i32
  }
  func.func @transform_7(%arg0: i32, %arg1: i32) -> (i32, i32) {
    %c0_i32 = arith.constant 0 : i32
    %c0_i32_0 = arith.constant 0 : i32
    %c0_i32_1 = arith.constant 0 : i32
    return %c0_i32, %c0_i32_0 : i32, i32
  }
  func.func @transform_8(%arg0: i32, %arg1: i32) -> (i32, i32) {
    %c0_i32 = arith.constant 0 : i32
    %c0_i32_0 = arith.constant 0 : i32
    %c0_i32_1 = arith.constant 0 : i32
    return %c0_i32, %c0_i32_0 : i32, i32
  }
  func.func @transform_9(%arg0: i32, %arg1: i32) -> (i32, i32) {
    %c0_i32 = arith.constant 0 : i32
    %c0_i32_0 = arith.constant 0 : i32
    %c0_i32_1 = arith.constant 0 : i32
    return %c0_i32, %c0_i32_0 : i32, i32
  }
  func.func @transform_10(%arg0: i32, %arg1: i32) -> (i32, i32) {
    %c0_i32 = arith.constant 0 : i32
    %c0_i32_0 = arith.constant 0 : i32
    %c0_i32_1 = arith.constant 0 : i32
    return %c0_i32, %c0_i32_0 : i32, i32
  }
  func.func @transform_11(%arg0: i32, %arg1: i32) -> (i32, i32) {
    %c0_i32 = arith.constant 0 : i32
    %c0_i32_0 = arith.constant 0 : i32
    %c0_i32_1 = arith.constant 0 : i32
    return %c0_i32, %c0_i32_0 : i32, i32
  }
  func.func @transform_12(%arg0: i32, %arg1: i32) -> (i32, i32) {
    %c0_i32 = arith.constant 0 : i32
    %c0_i32_0 = arith.constant 0 : i32
    %c0_i32_1 = arith.constant 0 : i32
    return %c0_i32, %c0_i32_0 : i32, i32
  }
  func.func @transform_13(%arg0: i32, %arg1: i32) -> (i32, i32) {
    %c0_i32 = arith.constant 0 : i32
    %c0_i32_0 = arith.constant 0 : i32
    %c0_i32_1 = arith.constant 0 : i32
    return %c0_i32, %c0_i32_0 : i32, i32
  }
  func.func @transform_14(%arg0: i32, %arg1: i32) -> (i32, i32) {
    %c0_i32 = arith.constant 0 : i32
    %c0_i32_0 = arith.constant 0 : i32
    %c0_i32_1 = arith.constant 0 : i32
    return %c0_i32, %c0_i32_0 : i32, i32
  }
  func.func @transform_15(%arg0: i32, %arg1: i32) -> (i32, i32) {
    %c0_i32 = arith.constant 0 : i32
    %c0_i32_0 = arith.constant 0 : i32
    %c0_i32_1 = arith.constant 0 : i32
    return %c0_i32, %c0_i32_0 : i32, i32
  }
  func.func @transform_16(%arg0: i32, %arg1: i32) -> (i32, i32, i32) {
    %c0_i32 = arith.constant 0 : i32
    %c0_i32_0 = arith.constant 0 : i32
    return %arg0, %arg1, %c0_i32 : i32, i32, i32
  }
}

module attributes {stable_mosaic.version = 11 : i64} {
  func.func @encoder_layer_kernel(%arg0: i32, %arg1: i32, %arg2: memref<1x8x32xf32, #tpu.memory_space<vmem>>, %arg3: memref<1x8x32xf32, #tpu.memory_space<vmem>>, %arg4: memref<1x32xf32, #tpu.memory_space<vmem>>, %arg5: memref<1x32xf32, #tpu.memory_space<vmem>>, %arg6: memref<32x32xbf16, #tpu.memory_space<vmem>>, %arg7: memref<1x32xf32, #tpu.memory_space<vmem>>, %arg8: memref<32x64xbf16, #tpu.memory_space<vmem>>, %arg9: memref<1x64xf32, #tpu.memory_space<vmem>>, %arg10: memref<32x32xbf16, #tpu.memory_space<vmem>>, %arg11: memref<1x32xf32, #tpu.memory_space<vmem>>, %arg12: memref<1x32xf32, #tpu.memory_space<vmem>>, %arg13: memref<1x32xf32, #tpu.memory_space<vmem>>, %arg14: memref<32x128xbf16, #tpu.memory_space<vmem>>, %arg15: memref<1x128xf32, #tpu.memory_space<vmem>>, %arg16: memref<128x32xbf16, #tpu.memory_space<vmem>>, %arg17: memref<1x32xf32, #tpu.memory_space<vmem>>, %arg18: memref<1x8x32xf32, #tpu.memory_space<vmem>>, %arg19: memref<8x64xbf16, #tpu.memory_space<vmem>>, %arg20: memref<8x32xbf16, #tpu.memory_space<vmem>>, %arg21: memref<8x32xf32, #tpu.memory_space<vmem>>) attributes {dimension_semantics = [#tpu.dimension_semantics<parallel>, #tpu.dimension_semantics<arbitrary>], iteration_bounds = array<i64: 2, 1>, scalar_prefetch = 0 : i64, scratch_operands = 3 : i64, tpu.core_type = #tpu.core_type<tc>, window_params = [{transform_indices = @transform_0, window_bounds = array<i64: 1, 8, 32>}, {transform_indices = @transform_1, window_bounds = array<i64: 1, 8, 32>}, {pipeline_mode = #tpu.pipeline_mode<synchronous>, transform_indices = @transform_2, window_bounds = array<i64: 1, 32>}, {pipeline_mode = #tpu.pipeline_mode<synchronous>, transform_indices = @transform_3, window_bounds = array<i64: 1, 32>}, {pipeline_mode = #tpu.pipeline_mode<synchronous>, transform_indices = @transform_4, window_bounds = array<i64: 32, 32>}, {pipeline_mode = #tpu.pipeline_mode<synchronous>, transform_indices = @transform_5, window_bounds = array<i64: 1, 32>}, {pipeline_mode = #tpu.pipeline_mode<synchronous>, transform_indices = @transform_6, window_bounds = array<i64: 32, 64>}, {pipeline_mode = #tpu.pipeline_mode<synchronous>, transform_indices = @transform_7, window_bounds = array<i64: 1, 64>}, {pipeline_mode = #tpu.pipeline_mode<synchronous>, transform_indices = @transform_8, window_bounds = array<i64: 32, 32>}, {pipeline_mode = #tpu.pipeline_mode<synchronous>, transform_indices = @transform_9, window_bounds = array<i64: 1, 32>}, {pipeline_mode = #tpu.pipeline_mode<synchronous>, transform_indices = @transform_10, window_bounds = array<i64: 1, 32>}, {pipeline_mode = #tpu.pipeline_mode<synchronous>, transform_indices = @transform_11, window_bounds = array<i64: 1, 32>}, {pipeline_mode = #tpu.pipeline_mode<synchronous>, transform_indices = @transform_12, window_bounds = array<i64: 32, 128>}, {pipeline_mode = #tpu.pipeline_mode<synchronous>, transform_indices = @transform_13, window_bounds = array<i64: 1, 128>}, {pipeline_mode = #tpu.pipeline_mode<synchronous>, transform_indices = @transform_14, window_bounds = array<i64: 128, 32>}, {pipeline_mode = #tpu.pipeline_mode<synchronous>, transform_indices = @transform_15, window_bounds = array<i64: 1, 32>}, {transform_indices = @transform_16, window_bounds = array<i64: 1, 8, 32>}]} {
    %c0_i32 = arith.constant 0 : i32
    %0 = arith.cmpi eq, %arg1, %c0_i32 : i32
    %1 = arith.extui %0 : i1 to i32
    %c0_i32_0 = arith.constant 0 : i32
    %2 = arith.cmpi ne, %1, %c0_i32_0 : i32
    scf.if %2 {
      %c0_97 = arith.constant 0 : index
      %c0_98 = arith.constant 0 : index
      %c0_99 = arith.constant 0 : index
      %163 = vector.load %arg3[%c0_97, %c0_98, %c0_99] : memref<1x8x32xf32, #tpu.memory_space<vmem>>, vector<1x8x32xf32>
      %164 = vector.shape_cast %163 : vector<1x8x32xf32> to vector<8x32xf32>
      %c0_100 = arith.constant 0 : index
      %c0_101 = arith.constant 0 : index
      %165 = vector.load %arg4[%c0_100, %c0_101] : memref<1x32xf32, #tpu.memory_space<vmem>>, vector<1x32xf32>
      %c0_102 = arith.constant 0 : index
      %c0_103 = arith.constant 0 : index
      %166 = vector.load %arg5[%c0_102, %c0_103] : memref<1x32xf32, #tpu.memory_space<vmem>>, vector<1x32xf32>
      %cst_104 = arith.constant dense<0.000000e+00> : vector<8xf32>
      %167 = vector.multi_reduction <add>, %164, %cst_104 [1] : vector<8x32xf32> to vector<8xf32>
      %168 = vector.shape_cast %167 : vector<8xf32> to vector<8x1xf32>
      %cst_105 = arith.constant 3.200000e+01 : f32
      %169 = vector.broadcast %cst_105 : f32 to vector<8x1xf32>
      %170 = arith.divf %168, %169 : vector<8x1xf32>
      %171 = vector.broadcast %170 : vector<8x1xf32> to vector<8x32xf32>
      %172 = arith.subf %164, %171 : vector<8x32xf32>
      %173 = arith.mulf %172, %172 : vector<8x32xf32>
      %cst_106 = arith.constant dense<0.000000e+00> : vector<8xf32>
      %174 = vector.multi_reduction <add>, %173, %cst_106 [1] : vector<8x32xf32> to vector<8xf32>
      %175 = vector.shape_cast %174 : vector<8xf32> to vector<8x1xf32>
      %cst_107 = arith.constant 0.0322580636 : f32
      %176 = vector.broadcast %cst_107 : f32 to vector<8x1xf32>
      %177 = arith.mulf %175, %176 : vector<8x1xf32>
      %178 = math.sqrt %177 : vector<8x1xf32>
      %cst_108 = arith.constant 9.99999997E-7 : f32
      %179 = vector.broadcast %cst_108 : f32 to vector<8x1xf32>
      %180 = arith.addf %178, %179 : vector<8x1xf32>
      %cst_109 = arith.constant 1.000000e+00 : f32
      %181 = vector.broadcast %cst_109 : f32 to vector<8x1xf32>
      %182 = arith.divf %181, %180 : vector<8x1xf32>
      %183 = vector.broadcast %182 : vector<8x1xf32> to vector<8x32xf32>
      %184 = arith.mulf %172, %183 : vector<8x32xf32>
      %185 = vector.broadcast %165 : vector<1x32xf32> to vector<8x32xf32>
      %186 = arith.mulf %185, %184 : vector<8x32xf32>
      %187 = vector.broadcast %166 : vector<1x32xf32> to vector<8x32xf32>
      %188 = arith.addf %186, %187 : vector<8x32xf32>
      %189 = arith.truncf %188 : vector<8x32xf32> to vector<8x32xbf16>
      %c0_110 = arith.constant 0 : index
      %c0_111 = arith.constant 0 : index
      %190 = vector.load %arg8[%c0_110, %c0_111] : memref<32x64xbf16, #tpu.memory_space<vmem>>, vector<32x64xbf16>
      %cst_112 = arith.constant dense<0.000000e+00> : vector<8x64xf32>
      %191 = tpu.matmul %189, %190, %cst_112 {dimension_numbers = #tpu.dot_dimension_numbers<[1], [0], [0], [1], [0, 0, 1, 1], [], []>} : vector<8x32xbf16>, vector<32x64xbf16>, vector<8x64xf32> -> vector<8x64xf32>
      %c0_113 = arith.constant 0 : index
      %c0_114 = arith.constant 0 : index
      %192 = vector.load %arg9[%c0_113, %c0_114] : memref<1x64xf32, #tpu.memory_space<vmem>>, vector<1x64xf32>
      %193 = vector.broadcast %192 : vector<1x64xf32> to vector<8x64xf32>
      %194 = arith.addf %191, %193 : vector<8x64xf32>
      %195 = arith.truncf %194 : vector<8x64xf32> to vector<8x64xbf16>
      %c0_115 = arith.constant 0 : index
      %c0_116 = arith.constant 0 : index
      %196 = vector.load %arg19[%c0_115, %c0_116] : memref<8x64xbf16, #tpu.memory_space<vmem>>, vector<8x64xbf16>
      tpu.vector_store %arg19[%c0_115, %c0_116], %195 {strides = array<i32>} : memref<8x64xbf16, #tpu.memory_space<vmem>>, vector<8x64xbf16>,
    } else {
    }
    %c0 = arith.constant 0 : index
    %c0_1 = arith.constant 0 : index
    %c0_2 = arith.constant 0 : index
    %3 = vector.load %arg2[%c0, %c0_1, %c0_2] : memref<1x8x32xf32, #tpu.memory_space<vmem>>, vector<1x8x32xf32>
    %4 = vector.shape_cast %3 : vector<1x8x32xf32> to vector<8x32xf32>
    %c0_3 = arith.constant 0 : index
    %c0_4 = arith.constant 0 : index
    %5 = vector.load %arg4[%c0_3, %c0_4] : memref<1x32xf32, #tpu.memory_space<vmem>>, vector<1x32xf32>
    %c0_5 = arith.constant 0 : index
    %c0_6 = arith.constant 0 : index
    %6 = vector.load %arg5[%c0_5, %c0_6] : memref<1x32xf32, #tpu.memory_space<vmem>>, vector<1x32xf32>
    %cst = arith.constant dense<0.000000e+00> : vector<8xf32>
    %7 = vector.multi_reduction <add>, %4, %cst [1] : vector<8x32xf32> to vector<8xf32>
    %8 = vector.shape_cast %7 : vector<8xf32> to vector<8x1xf32>
    %cst_7 = arith.constant 3.200000e+01 : f32
    %9 = vector.broadcast %cst_7 : f32 to vector<8x1xf32>
    %10 = arith.divf %8, %9 : vector<8x1xf32>
    %11 = vector.broadcast %10 : vector<8x1xf32> to vector<8x32xf32>
    %12 = arith.subf %4, %11 : vector<8x32xf32>
    %13 = arith.mulf %12, %12 : vector<8x32xf32>
    %cst_8 = arith.constant dense<0.000000e+00> : vector<8xf32>
    %14 = vector.multi_reduction <add>, %13, %cst_8 [1] : vector<8x32xf32> to vector<8xf32>
    %15 = vector.shape_cast %14 : vector<8xf32> to vector<8x1xf32>
    %cst_9 = arith.constant 0.0322580636 : f32
    %16 = vector.broadcast %cst_9 : f32 to vector<8x1xf32>
    %17 = arith.mulf %15, %16 : vector<8x1xf32>
    %18 = math.sqrt %17 : vector<8x1xf32>
    %cst_10 = arith.constant 9.99999997E-7 : f32
    %19 = vector.broadcast %cst_10 : f32 to vector<8x1xf32>
    %20 = arith.addf %18, %19 : vector<8x1xf32>
    %cst_11 = arith.constant 1.000000e+00 : f32
    %21 = vector.broadcast %cst_11 : f32 to vector<8x1xf32>
    %22 = arith.divf %21, %20 : vector<8x1xf32>
    %23 = vector.broadcast %22 : vector<8x1xf32> to vector<8x32xf32>
    %24 = arith.mulf %12, %23 : vector<8x32xf32>
    %25 = vector.broadcast %5 : vector<1x32xf32> to vector<8x32xf32>
    %26 = arith.mulf %25, %24 : vector<8x32xf32>
    %27 = vector.broadcast %6 : vector<1x32xf32> to vector<8x32xf32>
    %28 = arith.addf %26, %27 : vector<8x32xf32>
    %29 = arith.truncf %28 : vector<8x32xf32> to vector<8x32xbf16>
    %c0_12 = arith.constant 0 : index
    %c0_13 = arith.constant 0 : index
    %30 = vector.load %arg6[%c0_12, %c0_13] : memref<32x32xbf16, #tpu.memory_space<vmem>>, vector<32x32xbf16>
    %cst_14 = arith.constant dense<0.000000e+00> : vector<8x32xf32>
    %31 = tpu.matmul %29, %30, %cst_14 {dimension_numbers = #tpu.dot_dimension_numbers<[1], [0], [0], [1], [0, 0, 1, 1], [], []>} : vector<8x32xbf16>, vector<32x32xbf16>, vector<8x32xf32> -> vector<8x32xf32>
    %c0_15 = arith.constant 0 : index
    %c0_16 = arith.constant 0 : index
    %32 = vector.load %arg7[%c0_15, %c0_16] : memref<1x32xf32, #tpu.memory_space<vmem>>, vector<1x32xf32>
    %33 = vector.broadcast %32 : vector<1x32xf32> to vector<8x32xf32>
    %34 = arith.addf %31, %33 : vector<8x32xf32>
    %cst_17 = arith.constant 0.353553385 : f32
    %35 = vector.broadcast %cst_17 : f32 to vector<8x32xf32>
    %36 = arith.mulf %34, %35 : vector<8x32xf32>
    %37 = arith.truncf %36 : vector<8x32xf32> to vector<8x32xbf16>
    %c0_18 = arith.constant 0 : index
    %c0_19 = arith.constant 0 : index
    %38 = vector.load %arg20[%c0_18, %c0_19] : memref<8x32xbf16, #tpu.memory_space<vmem>>, vector<8x32xbf16>
    tpu.vector_store %arg20[%c0_18, %c0_19], %37 {strides = array<i32>} : memref<8x32xbf16, #tpu.memory_space<vmem>>, vector<8x32xbf16>,
    %c0_20 = arith.constant 0 : index
    %c0_21 = arith.constant 0 : index
    %39 = vector.load %arg20[%c0_20, %c0_21] : memref<8x32xbf16, #tpu.memory_space<vmem>>, vector<8x8xbf16>
    %c0_22 = arith.constant 0 : index
    %c0_23 = arith.constant 0 : index
    %40 = vector.load %arg19[%c0_22, %c0_23] : memref<8x64xbf16, #tpu.memory_space<vmem>>, vector<8x8xbf16>
    %c0_24 = arith.constant 0 : index
    %c32 = arith.constant 32 : index
    %41 = vector.load %arg19[%c0_24, %c32] : memref<8x64xbf16, #tpu.memory_space<vmem>>, vector<8x8xbf16>
    %cst_25 = arith.constant dense<0.000000e+00> : vector<8x8xf32>
    %42 = tpu.matmul %39, %40, %cst_25 {dimension_numbers = #tpu.dot_dimension_numbers<[1], [1], [0], [0], [0, 0, 1, 0], [], []>} : vector<8x8xbf16>, vector<8x8xbf16>, vector<8x8xf32> -> vector<8x8xf32>
    %cst_26 = arith.constant dense<0xFF800000> : vector<8xf32>
    %43 = vector.multi_reduction <maximumf>, %42, %cst_26 [1] : vector<8x8xf32> to vector<8xf32>
    %44 = vector.shape_cast %43 : vector<8xf32> to vector<8x1xf32>
    %45 = vector.broadcast %44 : vector<8x1xf32> to vector<8x8xf32>
    %46 = arith.subf %42, %45 : vector<8x8xf32>
    %47 = math.exp %46 : vector<8x8xf32>
    %cst_27 = arith.constant dense<0.000000e+00> : vector<8xf32>
    %48 = vector.multi_reduction <add>, %47, %cst_27 [1] : vector<8x8xf32> to vector<8xf32>
    %49 = vector.shape_cast %48 : vector<8xf32> to vector<8x1xf32>
    %cst_28 = arith.constant 1.000000e+00 : f32
    %50 = vector.broadcast %cst_28 : f32 to vector<8x1xf32>
    %51 = arith.divf %50, %49 : vector<8x1xf32>
    %52 = vector.broadcast %51 : vector<8x1xf32> to vector<8x8xf32>
    %53 = arith.mulf %47, %52 : vector<8x8xf32>
    %54 = arith.truncf %53 : vector<8x8xf32> to vector<8x8xbf16>
    %cst_29 = arith.constant dense<0.000000e+00> : vector<8x8xf32>
    %55 = tpu.matmul %54, %41, %cst_29 {dimension_numbers = #tpu.dot_dimension_numbers<[1], [0], [0], [1], [0, 0, 1, 1], [], []>} : vector<8x8xbf16>, vector<8x8xbf16>, vector<8x8xf32> -> vector<8x8xf32>
    %c0_30 = arith.constant 0 : index
    %c0_31 = arith.constant 0 : index
    %56 = vector.load %arg21[%c0_30, %c0_31] : memref<8x32xf32, #tpu.memory_space<vmem>>, vector<8x8xf32>
    tpu.vector_store %arg21[%c0_30, %c0_31], %55 {strides = array<i32>} : memref<8x32xf32, #tpu.memory_space<vmem>>, vector<8x8xf32>,
    %c0_32 = arith.constant 0 : index
    %c8 = arith.constant 8 : index
    %57 = vector.load %arg20[%c0_32, %c8] : memref<8x32xbf16, #tpu.memory_space<vmem>>, vector<8x8xbf16>
    %c0_33 = arith.constant 0 : index
    %c8_34 = arith.constant 8 : index
    %58 = vector.load %arg19[%c0_33, %c8_34] : memref<8x64xbf16, #tpu.memory_space<vmem>>, vector<8x8xbf16>
    %c0_35 = arith.constant 0 : index
    %c40 = arith.constant 40 : index
    %59 = vector.load %arg19[%c0_35, %c40] : memref<8x64xbf16, #tpu.memory_space<vmem>>, vector<8x8xbf16>
    %cst_36 = arith.constant dense<0.000000e+00> : vector<8x8xf32>
    %60 = tpu.matmul %57, %58, %cst_36 {dimension_numbers = #tpu.dot_dimension_numbers<[1], [1], [0], [0], [0, 0, 1, 0], [], []>} : vector<8x8xbf16>, vector<8x8xbf16>, vector<8x8xf32> -> vector<8x8xf32>
    %cst_37 = arith.constant dense<0xFF800000> : vector<8xf32>
    %61 = vector.multi_reduction <maximumf>, %60, %cst_37 [1] : vector<8x8xf32> to vector<8xf32>
    %62 = vector.shape_cast %61 : vector<8xf32> to vector<8x1xf32>
    %63 = vector.broadcast %62 : vector<8x1xf32> to vector<8x8xf32>
    %64 = arith.subf %60, %63 : vector<8x8xf32>
    %65 = math.exp %64 : vector<8x8xf32>
    %cst_38 = arith.constant dense<0.000000e+00> : vector<8xf32>
    %66 = vector.multi_reduction <add>, %65, %cst_38 [1] : vector<8x8xf32> to vector<8xf32>
    %67 = vector.shape_cast %66 : vector<8xf32> to vector<8x1xf32>
    %cst_39 = arith.constant 1.000000e+00 : f32
    %68 = vector.broadcast %cst_39 : f32 to vector<8x1xf32>
    %69 = arith.divf %68, %67 : vector<8x1xf32>
    %70 = vector.broadcast %69 : vector<8x1xf32> to vector<8x8xf32>
    %71 = arith.mulf %65, %70 : vector<8x8xf32>
    %72 = arith.truncf %71 : vector<8x8xf32> to vector<8x8xbf16>
    %cst_40 = arith.constant dense<0.000000e+00> : vector<8x8xf32>
    %73 = tpu.matmul %72, %59, %cst_40 {dimension_numbers = #tpu.dot_dimension_numbers<[1], [0], [0], [1], [0, 0, 1, 1], [], []>} : vector<8x8xbf16>, vector<8x8xbf16>, vector<8x8xf32> -> vector<8x8xf32>
    %c0_41 = arith.constant 0 : index
    %c8_42 = arith.constant 8 : index
    %74 = vector.load %arg21[%c0_41, %c8_42] : memref<8x32xf32, #tpu.memory_space<vmem>>, vector<8x8xf32>
    tpu.vector_store %arg21[%c0_41, %c8_42], %73 {strides = array<i32>} : memref<8x32xf32, #tpu.memory_space<vmem>>, vector<8x8xf32>,
    %c0_43 = arith.constant 0 : index
    %c16 = arith.constant 16 : index
    %75 = vector.load %arg20[%c0_43, %c16] : memref<8x32xbf16, #tpu.memory_space<vmem>>, vector<8x8xbf16>
    %c0_44 = arith.constant 0 : index
    %c16_45 = arith.constant 16 : index
    %76 = vector.load %arg19[%c0_44, %c16_45] : memref<8x64xbf16, #tpu.memory_space<vmem>>, vector<8x8xbf16>
    %c0_46 = arith.constant 0 : index
    %c48 = arith.constant 48 : index
    %77 = vector.load %arg19[%c0_46, %c48] : memref<8x64xbf16, #tpu.memory_space<vmem>>, vector<8x8xbf16>
    %cst_47 = arith.constant dense<0.000000e+00> : vector<8x8xf32>
    %78 = tpu.matmul %75, %76, %cst_47 {dimension_numbers = #tpu.dot_dimension_numbers<[1], [1], [0], [0], [0, 0, 1, 0], [], []>} : vector<8x8xbf16>, vector<8x8xbf16>, vector<8x8xf32> -> vector<8x8xf32>
    %cst_48 = arith.constant dense<0xFF800000> : vector<8xf32>
    %79 = vector.multi_reduction <maximumf>, %78, %cst_48 [1] : vector<8x8xf32> to vector<8xf32>
    %80 = vector.shape_cast %79 : vector<8xf32> to vector<8x1xf32>
    %81 = vector.broadcast %80 : vector<8x1xf32> to vector<8x8xf32>
    %82 = arith.subf %78, %81 : vector<8x8xf32>
    %83 = math.exp %82 : vector<8x8xf32>
    %cst_49 = arith.constant dense<0.000000e+00> : vector<8xf32>
    %84 = vector.multi_reduction <add>, %83, %cst_49 [1] : vector<8x8xf32> to vector<8xf32>
    %85 = vector.shape_cast %84 : vector<8xf32> to vector<8x1xf32>
    %cst_50 = arith.constant 1.000000e+00 : f32
    %86 = vector.broadcast %cst_50 : f32 to vector<8x1xf32>
    %87 = arith.divf %86, %85 : vector<8x1xf32>
    %88 = vector.broadcast %87 : vector<8x1xf32> to vector<8x8xf32>
    %89 = arith.mulf %83, %88 : vector<8x8xf32>
    %90 = arith.truncf %89 : vector<8x8xf32> to vector<8x8xbf16>
    %cst_51 = arith.constant dense<0.000000e+00> : vector<8x8xf32>
    %91 = tpu.matmul %90, %77, %cst_51 {dimension_numbers = #tpu.dot_dimension_numbers<[1], [0], [0], [1], [0, 0, 1, 1], [], []>} : vector<8x8xbf16>, vector<8x8xbf16>, vector<8x8xf32> -> vector<8x8xf32>
    %c0_52 = arith.constant 0 : index
    %c16_53 = arith.constant 16 : index
    %92 = vector.load %arg21[%c0_52, %c16_53] : memref<8x32xf32, #tpu.memory_space<vmem>>, vector<8x8xf32>
    tpu.vector_store %arg21[%c0_52, %c16_53], %91 {strides = array<i32>} : memref<8x32xf32, #tpu.memory_space<vmem>>, vector<8x8xf32>,
    %c0_54 = arith.constant 0 : index
    %c24 = arith.constant 24 : index
    %93 = vector.load %arg20[%c0_54, %c24] : memref<8x32xbf16, #tpu.memory_space<vmem>>, vector<8x8xbf16>
    %c0_55 = arith.constant 0 : index
    %c24_56 = arith.constant 24 : index
    %94 = vector.load %arg19[%c0_55, %c24_56] : memref<8x64xbf16, #tpu.memory_space<vmem>>, vector<8x8xbf16>
    %c0_57 = arith.constant 0 : index
    %c56 = arith.constant 56 : index
    %95 = vector.load %arg19[%c0_57, %c56] : memref<8x64xbf16, #tpu.memory_space<vmem>>, vector<8x8xbf16>
    %cst_58 = arith.constant dense<0.000000e+00> : vector<8x8xf32>
    %96 = tpu.matmul %93, %94, %cst_58 {dimension_numbers = #tpu.dot_dimension_numbers<[1], [1], [0], [0], [0, 0, 1, 0], [], []>} : vector<8x8xbf16>, vector<8x8xbf16>, vector<8x8xf32> -> vector<8x8xf32>
    %cst_59 = arith.constant dense<0xFF800000> : vector<8xf32>
    %97 = vector.multi_reduction <maximumf>, %96, %cst_59 [1] : vector<8x8xf32> to vector<8xf32>
    %98 = vector.shape_cast %97 : vector<8xf32> to vector<8x1xf32>
    %99 = vector.broadcast %98 : vector<8x1xf32> to vector<8x8xf32>
    %100 = arith.subf %96, %99 : vector<8x8xf32>
    %101 = math.exp %100 : vector<8x8xf32>
    %cst_60 = arith.constant dense<0.000000e+00> : vector<8xf32>
    %102 = vector.multi_reduction <add>, %101, %cst_60 [1] : vector<8x8xf32> to vector<8xf32>
    %103 = vector.shape_cast %102 : vector<8xf32> to vector<8x1xf32>
    %cst_61 = arith.constant 1.000000e+00 : f32
    %104 = vector.broadcast %cst_61 : f32 to vector<8x1xf32>
    %105 = arith.divf %104, %103 : vector<8x1xf32>
    %106 = vector.broadcast %105 : vector<8x1xf32> to vector<8x8xf32>
    %107 = arith.mulf %101, %106 : vector<8x8xf32>
    %108 = arith.truncf %107 : vector<8x8xf32> to vector<8x8xbf16>
    %cst_62 = arith.constant dense<0.000000e+00> : vector<8x8xf32>
    %109 = tpu.matmul %108, %95, %cst_62 {dimension_numbers = #tpu.dot_dimension_numbers<[1], [0], [0], [1], [0, 0, 1, 1], [], []>} : vector<8x8xbf16>, vector<8x8xbf16>, vector<8x8xf32> -> vector<8x8xf32>
    %c0_63 = arith.constant 0 : index
    %c24_64 = arith.constant 24 : index
    %110 = vector.load %arg21[%c0_63, %c24_64] : memref<8x32xf32, #tpu.memory_space<vmem>>, vector<8x8xf32>
    tpu.vector_store %arg21[%c0_63, %c24_64], %109 {strides = array<i32>} : memref<8x32xf32, #tpu.memory_space<vmem>>, vector<8x8xf32>,
    %c0_65 = arith.constant 0 : index
    %c0_66 = arith.constant 0 : index
    %111 = vector.load %arg21[%c0_65, %c0_66] : memref<8x32xf32, #tpu.memory_space<vmem>>, vector<8x32xf32>
    %112 = arith.truncf %111 : vector<8x32xf32> to vector<8x32xbf16>
    %c0_67 = arith.constant 0 : index
    %c0_68 = arith.constant 0 : index
    %113 = vector.load %arg10[%c0_67, %c0_68] : memref<32x32xbf16, #tpu.memory_space<vmem>>, vector<32x32xbf16>
    %cst_69 = arith.constant dense<0.000000e+00> : vector<8x32xf32>
    %114 = tpu.matmul %112, %113, %cst_69 {dimension_numbers = #tpu.dot_dimension_numbers<[1], [0], [0], [1], [0, 0, 1, 1], [], []>} : vector<8x32xbf16>, vector<32x32xbf16>, vector<8x32xf32> -> vector<8x32xf32>
    %c0_70 = arith.constant 0 : index
    %c0_71 = arith.constant 0 : index
    %115 = vector.load %arg11[%c0_70, %c0_71] : memref<1x32xf32, #tpu.memory_space<vmem>>, vector<1x32xf32>
    %116 = vector.broadcast %115 : vector<1x32xf32> to vector<8x32xf32>
    %117 = arith.addf %114, %116 : vector<8x32xf32>
    %118 = arith.addf %4, %117 : vector<8x32xf32>
    %c0_72 = arith.constant 0 : index
    %c0_73 = arith.constant 0 : index
    %119 = vector.load %arg12[%c0_72, %c0_73] : memref<1x32xf32, #tpu.memory_space<vmem>>, vector<1x32xf32>
    %c0_74 = arith.constant 0 : index
    %c0_75 = arith.constant 0 : index
    %120 = vector.load %arg13[%c0_74, %c0_75] : memref<1x32xf32, #tpu.memory_space<vmem>>, vector<1x32xf32>
    %cst_76 = arith.constant dense<0.000000e+00> : vector<8xf32>
    %121 = vector.multi_reduction <add>, %118, %cst_76 [1] : vector<8x32xf32> to vector<8xf32>
    %122 = vector.shape_cast %121 : vector<8xf32> to vector<8x1xf32>
    %cst_77 = arith.constant 3.200000e+01 : f32
    %123 = vector.broadcast %cst_77 : f32 to vector<8x1xf32>
    %124 = arith.divf %122, %123 : vector<8x1xf32>
    %125 = vector.broadcast %124 : vector<8x1xf32> to vector<8x32xf32>
    %126 = arith.subf %118, %125 : vector<8x32xf32>
    %127 = arith.mulf %126, %126 : vector<8x32xf32>
    %cst_78 = arith.constant dense<0.000000e+00> : vector<8xf32>
    %128 = vector.multi_reduction <add>, %127, %cst_78 [1] : vector<8x32xf32> to vector<8xf32>
    %129 = vector.shape_cast %128 : vector<8xf32> to vector<8x1xf32>
    %cst_79 = arith.constant 0.0322580636 : f32
    %130 = vector.broadcast %cst_79 : f32 to vector<8x1xf32>
    %131 = arith.mulf %129, %130 : vector<8x1xf32>
    %132 = math.sqrt %131 : vector<8x1xf32>
    %cst_80 = arith.constant 9.99999997E-7 : f32
    %133 = vector.broadcast %cst_80 : f32 to vector<8x1xf32>
    %134 = arith.addf %132, %133 : vector<8x1xf32>
    %cst_81 = arith.constant 1.000000e+00 : f32
    %135 = vector.broadcast %cst_81 : f32 to vector<8x1xf32>
    %136 = arith.divf %135, %134 : vector<8x1xf32>
    %137 = vector.broadcast %136 : vector<8x1xf32> to vector<8x32xf32>
    %138 = arith.mulf %126, %137 : vector<8x32xf32>
    %139 = vector.broadcast %119 : vector<1x32xf32> to vector<8x32xf32>
    %140 = arith.mulf %139, %138 : vector<8x32xf32>
    %141 = vector.broadcast %120 : vector<1x32xf32> to vector<8x32xf32>
    %142 = arith.addf %140, %141 : vector<8x32xf32>
    %143 = arith.truncf %142 : vector<8x32xf32> to vector<8x32xbf16>
    %cst_82 = arith.constant 0.000000e+00 : f32
    %144 = vector.broadcast %cst_82 : f32 to vector<8x32xf32>
    %c0_83 = arith.constant 0 : index
    %c0_84 = arith.constant 0 : index
    %145 = vector.load %arg14[%c0_83, %c0_84] : memref<32x128xbf16, #tpu.memory_space<vmem>>, vector<32x128xbf16>
    %cst_85 = arith.constant dense<0.000000e+00> : vector<8x128xf32>
    %146 = tpu.matmul %143, %145, %cst_85 {dimension_numbers = #tpu.dot_dimension_numbers<[1], [0], [0], [1], [0, 0, 1, 1], [], []>} : vector<8x32xbf16>, vector<32x128xbf16>, vector<8x128xf32> -> vector<8x128xf32>
    %c0_86 = arith.constant 0 : index
    %c0_87 = arith.constant 0 : index
    %147 = vector.load %arg15[%c0_86, %c0_87] : memref<1x128xf32, #tpu.memory_space<vmem>>, vector<1x128xf32>
    %148 = vector.broadcast %147 : vector<1x128xf32> to vector<8x128xf32>
    %149 = arith.addf %146, %148 : vector<8x128xf32>
    %cst_88 = arith.constant 0.000000e+00 : f32
    %150 = vector.broadcast %cst_88 : f32 to vector<8x128xf32>
    %151 = arith.maximumf %149, %150 : vector<8x128xf32>
    %152 = arith.truncf %151 : vector<8x128xf32> to vector<8x128xbf16>
    %c0_89 = arith.constant 0 : index
    %c0_90 = arith.constant 0 : index
    %153 = vector.load %arg16[%c0_89, %c0_90] : memref<128x32xbf16, #tpu.memory_space<vmem>>, vector<128x32xbf16>
    %cst_91 = arith.constant dense<0.000000e+00> : vector<8x32xf32>
    %154 = tpu.matmul %152, %153, %cst_91 {dimension_numbers = #tpu.dot_dimension_numbers<[1], [0], [0], [1], [0, 0, 1, 1], [], []>} : vector<8x128xbf16>, vector<128x32xbf16>, vector<8x32xf32> -> vector<8x32xf32>
    %155 = arith.addf %144, %154 : vector<8x32xf32>
    %156 = arith.addf %118, %155 : vector<8x32xf32>
    %c0_92 = arith.constant 0 : index
    %c0_93 = arith.constant 0 : index
    %157 = vector.load %arg17[%c0_92, %c0_93] : memref<1x32xf32, #tpu.memory_space<vmem>>, vector<1x32xf32>
    %158 = vector.broadcast %157 : vector<1x32xf32> to vector<8x32xf32>
    %159 = arith.addf %156, %158 : vector<8x32xf32>
    %c0_94 = arith.constant 0 : index
    %c0_95 = arith.constant 0 : index
    %c0_96 = arith.constant 0 : index
    %160 = vector.load %arg18[%c0_94, %c0_95, %c0_96] : memref<1x8x32xf32, #tpu.memory_space<vmem>>, vector<1x8x32xf32>
    %161 = vector.shape_cast %160 : vector<1x8x32xf32> to vector<8x32xf32>
    %162 = vector.shape_cast %159 : vector<8x32xf32> to vector<1x8x32xf32>
    tpu.vector_store %arg18[%c0_94, %c0_95, %c0_96], %162 {strides = array<i32>} : memref<1x8x32xf32, #tpu.memory_space<vmem>>, vector<1x8x32xf32>,
    return
  }
  func.func @transform_0(%arg0: i32, %arg1: i32) -> (i32, i32, i32) {
    %c0_i32 = arith.constant 0 : i32
    %c0_i32_0 = arith.constant 0 : i32
    return %arg0, %arg1, %c0_i32 : i32, i32, i32
  }
  func.func @transform_1(%arg0: i32, %arg1: i32) -> (i32, i32, i32) {
    %c0_i32 = arith.constant 0 : i32
    %c0_i32_0 = arith.constant 0 : i32
    %c0_i32_1 = arith.constant 0 : i32
    return %arg0, %c0_i32, %c0_i32_0 : i32, i32, i32
  }
  func.func @transform_2(%arg0: i32, %arg1: i32) -> (i32, i32) {
    %c0_i32 = arith.constant 0 : i32
    %c0_i32_0 = arith.constant 0 : i32
    %c0_i32_1 = arith.constant 0 : i32
    return %c0_i32, %c0_i32_0 : i32, i32
  }
  func.func @transform_3(%arg0: i32, %arg1: i32) -> (i32, i32) {
    %c0_i32 = arith.constant 0 : i32
    %c0_i32_0 = arith.constant 0 : i32
    %c0_i32_1 = arith.constant 0 : i32
    return %c0_i32, %c0_i32_0 : i32, i32
  }
  func.func @transform_4(%arg0: i32, %arg1: i32) -> (i32, i32) {
    %c0_i32 = arith.constant 0 : i32
    %c0_i32_0 = arith.constant 0 : i32
    %c0_i32_1 = arith.constant 0 : i32
    return %c0_i32, %c0_i32_0 : i32, i32
  }
  func.func @transform_5(%arg0: i32, %arg1: i32) -> (i32, i32) {
    %c0_i32 = arith.constant 0 : i32
    %c0_i32_0 = arith.constant 0 : i32
    %c0_i32_1 = arith.constant 0 : i32
    return %c0_i32, %c0_i32_0 : i32, i32
  }
  func.func @transform_6(%arg0: i32, %arg1: i32) -> (i32, i32) {
    %c0_i32 = arith.constant 0 : i32
    %c0_i32_0 = arith.constant 0 : i32
    %c0_i32_1 = arith.constant 0 : i32
    return %c0_i32, %c0_i32_0 : i32, i32
  }
  func.func @transform_7(%arg0: i32, %arg1: i32) -> (i32, i32) {
    %c0_i32 = arith.constant 0 : i32
    %c0_i32_0 = arith.constant 0 : i32
    %c0_i32_1 = arith.constant 0 : i32
    return %c0_i32, %c0_i32_0 : i32, i32
  }
  func.func @transform_8(%arg0: i32, %arg1: i32) -> (i32, i32) {
    %c0_i32 = arith.constant 0 : i32
    %c0_i32_0 = arith.constant 0 : i32
    %c0_i32_1 = arith.constant 0 : i32
    return %c0_i32, %c0_i32_0 : i32, i32
  }
  func.func @transform_9(%arg0: i32, %arg1: i32) -> (i32, i32) {
    %c0_i32 = arith.constant 0 : i32
    %c0_i32_0 = arith.constant 0 : i32
    %c0_i32_1 = arith.constant 0 : i32
    return %c0_i32, %c0_i32_0 : i32, i32
  }
  func.func @transform_10(%arg0: i32, %arg1: i32) -> (i32, i32) {
    %c0_i32 = arith.constant 0 : i32
    %c0_i32_0 = arith.constant 0 : i32
    %c0_i32_1 = arith.constant 0 : i32
    return %c0_i32, %c0_i32_0 : i32, i32
  }
  func.func @transform_11(%arg0: i32, %arg1: i32) -> (i32, i32) {
    %c0_i32 = arith.constant 0 : i32
    %c0_i32_0 = arith.constant 0 : i32
    %c0_i32_1 = arith.constant 0 : i32
    return %c0_i32, %c0_i32_0 : i32, i32
  }
  func.func @transform_12(%arg0: i32, %arg1: i32) -> (i32, i32) {
    %c0_i32 = arith.constant 0 : i32
    %c0_i32_0 = arith.constant 0 : i32
    %c0_i32_1 = arith.constant 0 : i32
    return %c0_i32, %c0_i32_0 : i32, i32
  }
  func.func @transform_13(%arg0: i32, %arg1: i32) -> (i32, i32) {
    %c0_i32 = arith.constant 0 : i32
    %c0_i32_0 = arith.constant 0 : i32
    %c0_i32_1 = arith.constant 0 : i32
    return %c0_i32, %c0_i32_0 : i32, i32
  }
  func.func @transform_14(%arg0: i32, %arg1: i32) -> (i32, i32) {
    %c0_i32 = arith.constant 0 : i32
    %c0_i32_0 = arith.constant 0 : i32
    %c0_i32_1 = arith.constant 0 : i32
    return %c0_i32, %c0_i32_0 : i32, i32
  }
  func.func @transform_15(%arg0: i32, %arg1: i32) -> (i32, i32) {
    %c0_i32 = arith.constant 0 : i32
    %c0_i32_0 = arith.constant 0 : i32
    %c0_i32_1 = arith.constant 0 : i32
    return %c0_i32, %c0_i32_0 : i32, i32
  }
  func.func @transform_16(%arg0: i32, %arg1: i32) -> (i32, i32, i32) {
    %c0_i32 = arith.constant 0 : i32
    %c0_i32_0 = arith.constant 0 : i32
    return %arg0, %arg1, %c0_i32 : i32, i32, i32
  }
}

</mosaic_0001>

<bundles_post_ra>
// kernel: tpu_custom_call.1
= control target key start
LH: loop header
LB: loop body
LE: loop exit
PB: predicated region body
PF: predicated region fallthrough
CT: control target
= control target key end

     0   :  { %s2830_s0 = inlined_call_operand.vmem [shape: f32[2,8,32], index: 0, kind: input, shape index: {}]   ;;  %s2831_s1 = inlined_call_operand.vmem [shape: f32[2,8,32], index: 1, kind: input, shape index: {}]   ;;  %s2832_s2 = inlined_call_operand.hbm [shape: f32[1,32], index: 2, kind: input, shape index: {}]   ;;  %s2833_s3 = inlined_call_operand.hbm [shape: f32[1,32], index: 3, kind: input, shape index: {}]   ;;  %s2834_s4 = inlined_call_operand.vmem [shape: bf16[32,32], index: 4, kind: input, shape index: {}]   ;;  %s2835_s5 = inlined_call_operand.hbm [shape: f32[1,32], index: 5, kind: input, shape index: {}]   ;;  %s2836_s6 = inlined_call_operand.vmem [shape: bf16[32,64], index: 6, kind: input, shape index: {}]   ;;  %s2837_s7 = inlined_call_operand.hbm [shape: f32[1,64], index: 7, kind: input, shape index: {}]   ;;  %s2838_s8 = inlined_call_operand.vmem [shape: bf16[32,32], index: 8, kind: input, shape index: {}]   ;;  %s2839_s9 = inlined_call_operand.hbm [shape: f32[1,32], index: 9, kind: input, shape index: {}]   ;;  %s2840_s10 = inlined_call_operand.vmem [shape: f32[1,32], index: 10, kind: input, shape index: {}]   ;;  %s2841_s11 = inlined_call_operand.vmem [shape: f32[1,32], index: 11, kind: input, shape index: {}]   ;;  %s2842_s12 = inlined_call_operand.vmem [shape: bf16[32,128], index: 12, kind: input, shape index: {}]   ;;  %s2843_s13 = inlined_call_operand.vmem [shape: f32[1,128], index: 13, kind: input, shape index: {}]   ;;  %s2844_s14 = inlined_call_operand.vmem [shape: bf16[128,32], index: 14, kind: input, shape index: {}]   ;;  %s2845_s15 = inlined_call_operand.vmem [shape: f32[1,32], index: 15, kind: input, shape index: {}]   ;;  %s2846_s16 = inlined_call_operand.hbm [shape: f32[2,8,32], index: 16, kind: output, shape index: {}]  }
   0x1   :  { %2859 = sst [smem:[#allocation26_spill]] %s2830_s0 }
   0x2   :  { %2860 = sst [smem:[#allocation27_spill]] %s2833_s3 }
   0x3   :  { %2861 = sst [smem:[#allocation28_spill]] %s2846_s16 }
   0x4   :  { %21 = vsyncpa [#allocation6], 0 }
   0x5   :  { %22 = vsyncpa [#allocation9], 0 }
   0x6   :  { %23 = vsyncpa [#allocation12], 0 }
   0x7   :  { %24 = vsyncpa [#allocation7], 0 }
   0x8   :  { %26 = vsyncpa [#allocation7 + $0x1], 0  ;;  %s2472_s21 = smov 0   ;;  %s2474_s22 = smov 0  }
   0x9   :  { %s2476_s23 = smov 0   ;;  %s2478_s24 = smov 0  }
   0xa   :  { %s2480_s25 = smov 0   ;;  %s2482_s26 = smov 0  }
   0xb LB: > { %2862 = sst [smem:[#allocation19_spill]] %s2347_s21  ;;  %s1775_s27 = sadd.s32 4294967295, %s2367_s26   ;;  %s2367_s26 = sphi %s2482_s26, %s32_s26   ;;  %s2363_s25 = sphi %s2480_s25, %s2889_s25   ;;  %s2359_s24 = sphi %s2478_s24, %s2888_s24   ;;  %s2355_s23 = sphi %s2476_s23, %s2887_s23   ;;  %s2351_s22 = sphi %s2474_s22, %s2891_s22   ;;  %s2347_s21 = sphi %s2472_s21, %s2890_s21  }
   0xc   : > { %2863 = sst [smem:[#allocation20_spill]] %s2355_s23  ;;  %s1776_s28 = sadd.s32 4294967294, %s2367_s26  }
   0xd   : > { %2864 = sst [smem:[#allocation21_spill]] %s2363_s25  ;;  %s44_s29 = sadd.s32 1, %s2363_s25 }
   0xe   : > { %2865 = sst [smem:[#allocation22_spill]] %s2367_s26  ;;  %s401_s30 = sadd.s32 1, %s2355_s23 }
   0xf   : > { %p46_p0 = scmp.ge.s32.totalorder %s44_s29, 2  ;;  %p411_p1 = scmp.ne.s32.totalorder %s2355_s23, %s2351_s22 }
  0x10   : > { %p412_p2 = scmp.eq.s32.totalorder %s1775_s27, 1  ;;  %p417_p3 = scmp.ne.s32.totalorder %s2351_s22, %s2347_s21 }
  0x11   : > { %s2893_s29 = smov (%p46_p0, %s44_s29), 0  ;;  %p418_p5 = scmp.eq.s32.totalorder %s1776_s28, 1 }
  0x12   : > { %2866 = sst [smem:[#allocation23_spill]] %s2893_s29  ;;  %p2512_p4 = por %p412_p2, %p411_p1 }
  0x13   : > { %s396_s17 = ssub.s32 %s2363_s25, %s2893_s29  ;;  %p1777_p6 = scmp.ge.s32.totalorder %s2367_s26, 1 }
  0x14   : > { %s2867_s0 = scalar_select %p2512_p4, 1, 0 }
  0x15   : > { %p399_p7 = scmp.eq.s32.totalorder %s396_s17, 0  ;;  %p2519_p8 = por %p418_p5, %p417_p3 }
  0x16   : > { %p425_p9 = scmp.lt.s32.totalorder %s2367_s26, 3  ;;  %p2531_p11 = scmp.eq.s32.totalorder %s1775_s27, 0 }
  0x17   : > { %s2868_s18 = scalar_select %p2519_p8, 1, 0 }
  0x18   : > { %s2525_s19 = scalar_select %p399_p7, %s2355_s23, %s401_s30  }
  0x19   : > { %2869 = sst [smem:[#allocation24_spill]] %s2868_s18  ;;  %p2527_p10 = pnand %p1777_p6, %p425_p9 }
  0x1a   : > { %2870 = sst [smem:[#allocation25_spill]] %s2525_s19  ;;  %s2369_s28 = smov [#allocation8]  }
  0x1b   : > { %s2871_s20 = scalar_select %p2527_p10, 1, 0 }
  0x1c   : > { %s2872_s21 = scalar_select %p2531_p11, 1, 0 }
  0x1d   : > { %p2002_p12 = pneg %p2527_p10  ;;  %s449_s17 = sshll.u32 %s2369_s28, 4  ;;  %s450_s17 = int_to_ptr.vmem [resolvable:$true] %s449_s17 }
  0x1e   : > { %s2370_s29 = smov [#allocation11]   ;;  %s2160_s19 = scalar_lea.vmem %s450_s17, 16 }
  0x1f   : > { %s477_s25 = sshll.u32 %s2370_s29, 4  ;;  %p2539_p13 = pnand %p2531_p11, %p2002_p12  ;;  %s478_s25 = int_to_ptr.vmem [resolvable:$true] %s477_s25 }
  0x20   : > { %p2161_p1 = scmp.ne.s32.totalorder %s450_s17, %s2160_s19  ;;  %s2167_s28 = scalar_lea.vmem %s450_s17, 32 }
  0x21   : > { %p2545_p0 = pneg %p2539_p13  ;;  %p2168_p5 = scmp.lt.s32.totalorder %s450_s17, %s450_s17 }
  0x22   : > { %p2169_p6 = scmp.lt.s32.totalorder %s2167_s28, %s2160_s19 }
  0x23   : > { %p2163_p2 = pnand %p2161_p1, %p2545_p0 }
  0x24   : > { %p2170_p7 = por %p2169_p6, %p2168_p5 }
  0x25   : > { %p2164_p3 = pneg %p2163_p2 }
  0x27   : > { %p2171_p9 = pnand %p2170_p7, %p2164_p3 }
  0x29   : > { %2174 = shalt.err (!%p2171_p9)
}
  0x2a   : > { %s2875_s3 = sld [smem:[#allocation27_spill]]  ;;  %s2186_s18 = scalar_lea.vmem %s478_s25, 16 }
  0x2b   : > { %p2187_p12 = scmp.ne.s32.totalorder %s478_s25, %s2186_s18  ;;  %s2193_s26 = scalar_lea.vmem %s478_s25, 32 }
  0x2c   : > { %p2194_p1 = scmp.lt.s32.totalorder %s478_s25, %s478_s25  ;;  %p2195_p2 = scmp.lt.s32.totalorder %s2193_s26, %s2186_s18 }
  0x2d   : > { %p2189_p8 = pnand %p2187_p12, %p2545_p0 }
  0x2e   : > { %p2196_p11 = por %p2195_p2, %p2194_p1 }
  0x2f   : > { %p2190_p4 = pneg %p2189_p8 }
  0x30   : > { %2008 = dma.hbm_to_vmem [thread:$0]  (!%p2539_p13), %s2875_s3, 16, %s450_s17, [#allocation9]  }
  0x31   : > { %p2197_p10 = pnand %p2196_p11, %p2190_p4 }
  0x33   : > { %2200 = shalt.err (!%p2197_p10)
}
  0x34   : > { %2014 = dma.hbm_to_vmem [thread:$0]  (!%p2539_p13), %s2837_s7, 16, %s478_s25, [#allocation12]  }
  0x35   : > { %s2371_s23 = smov [#allocation5]   ;;  %s2372_s29 = smov [#allocation10]  }
  0x36   : > { %s438_s17 = sshll.u32 %s2371_s23, 4  ;;  %s463_s3 = sshll.u32 %s2372_s29, 4  ;;  %s439_s17 = int_to_ptr.vmem [resolvable:$true] %s438_s17  ;;  %s464_s3 = int_to_ptr.vmem [resolvable:$true] %s463_s3 }
  0x37   : > { %s2212_s16 = scalar_lea.vmem %s439_s17, 16  ;;  %s2219_s26 = scalar_lea.vmem %s439_s17, 32 }
  0x38   : > { %p2213_p8 = scmp.ne.s32.totalorder %s439_s17, %s2212_s16  ;;  %p2220_p4 = scmp.lt.s32.totalorder %s439_s17, %s439_s17 }
  0x39   : > { %p2221_p10 = scmp.lt.s32.totalorder %s2219_s26, %s2212_s16 }
  0x3a   : > { %p2215_p3 = pnand %p2213_p8, %p2545_p0 }
  0x3b   : > { %p2222_p11 = por %p2221_p10, %p2220_p4 }
  0x3c   : > { %p2216_p5 = pneg %p2215_p3 }
  0x3e   : > { %p2223_p6 = pnand %p2222_p11, %p2216_p5 }
  0x40   : > { %2226 = shalt.err (!%p2223_p6)
}
  0x41   : > { %2005 = dma.hbm_to_vmem [thread:$0]  (!%p2539_p13), %s2832_s2, 16, %s439_s17, [#allocation6]  }
  0x42   : > { %s2238_s19 = scalar_lea.vmem %s464_s3, 16  ;;  %s2245_s28 = scalar_lea.vmem %s464_s3, 32 }
  0x43   : > { %p2239_p7 = scmp.ne.s32.totalorder %s464_s3, %s2238_s19  ;;  %p2246_p1 = scmp.lt.s32.totalorder %s464_s3, %s464_s3 }
  0x44   : > { %p2247_p2 = scmp.lt.s32.totalorder %s2245_s28, %s2238_s19 }
  0x45   : > { %p2241_p9 = pnand %p2239_p7, %p2545_p0 }
  0x46   : > { %p2248_p8 = por %p2247_p2, %p2246_p1 }
  0x47   : > { %p2242_p12 = pneg %p2241_p9 }
  0x49   : > { %p2249_p3 = pnand %p2248_p8, %p2242_p12 }
  0x4b   : > { %2252 = shalt.err (!%p2249_p3)
}
  0x4c   : > { %2011 = dma.hbm_to_vmem [thread:$0]  (!%p2539_p13), %s2835_s5, 16, %s464_s3, [#allocation9]  }
  0x4d   : > { %s2373_s17 = smov [#allocation13]  }
  0x4e   : > { %s491_s29 = sshll.u32 %s2373_s17, 4  ;;  %s492_s29 = int_to_ptr.vmem [resolvable:$true] %s491_s29 }
  0x4f   : > { %s2264_s26 = scalar_lea.vmem %s492_s29, 16  ;;  %s2271_s18 = scalar_lea.vmem %s492_s29, 32 }
  0x50   : > { %p2265_p5 = scmp.ne.s32.totalorder %s492_s29, %s2264_s26  ;;  %p2272_p11 = scmp.lt.s32.totalorder %s492_s29, %s492_s29 }
  0x51   : > { %p2273_p6 = scmp.lt.s32.totalorder %s2271_s18, %s2264_s26 }
  0x52   : > { %p2267_p4 = pnand %p2265_p5, %p2545_p0 }
  0x53   : > { %p2274_p7 = por %p2273_p6, %p2272_p11 }
  0x54   : > { %p2268_p10 = pneg %p2267_p4 }
  0x56   : > { %p2275_p9 = pnand %p2274_p7, %p2268_p10 }
  0x58   : > { %2278 = shalt.err (!%p2275_p9)
}
  0x59   : > { %2017 = dma.hbm_to_vmem [thread:$0]  (!%p2539_p13), %s2839_s9, 16, %s492_s29, [#allocation12]  }
  0x5a   : > { %p2876_p12 = scmp.ne.s32.totalorder %s2871_s20, 0 }
  0x5b   : > { %p2877_p1 = scmp.ne.s32.totalorder (!%p2876_p12), %s2872_s21, 0 }
  0x5c   : > { %539 = sbr.rel (%p2876_p12) target bundleno = 2585 (0xa19), region = 84 }
  0x61   : > { %2330 = dma.done.wait (%p2877_p1), [#allocation6], 16  }
  0x62   : > { %2332 = vsyncadd (%p2877_p1), [#allocation6], 4294967280 }
  0x63   : > { %2334 = dma.done.wait (%p2877_p1), [#allocation9], 32  }
  0x64   : > { %2336 = vsyncadd (%p2877_p1), [#allocation9], 4294967264 }
  0x65   : > { %2338 = dma.done.wait (%p2877_p1), [#allocation12], 32  }
  0x66   : > { %2340 = vsyncadd (%p2877_p1), [#allocation12], 4294967264  ;;  %p611_p13 = scmp.lt.s32.totalorder %s2359_s24, 1  ;;  %vm630_vm0 = vcmask 261120   ;;  %s2878_s17 = sld [smem:[#allocation26_spill]]  ;;  %v2098_v14 = vld [vmem:[%s2836_s6 + $0x8] sm:$0xff]  }
  0x67   : > { %v2374_v15 = vmov 0.0   ;;  %vm2375_vm1 = vmmov 0   ;;  %v2099_v16 = vld [vmem:[%s2836_s6] sm:$0xff]   ;;  %v1793_v34 = vld [vmem:[#allocation5] ss:$0 sm:$0xff]  ;;  %v2100_v41 = vld [vmem:[%s2834_s4 + $0x8] sm:$0xff]  }
  0x68   : > { %s612_s3 = scalar_select %p611_p13, %s2359_s24, 1  ;;  %1880 = vmatprep.subr.bf16.mxu1 %v2374_v15  ;;  %1884 = vmatprep.mubr.msk.bf16.mxu1 %vm2375_vm1, %v2374_v15  ;;  %v1794_v36 = vld [vmem:[#allocation8] ss:$0 sm:$0xff]  ;;  %v2101_v44 = vld [vmem:[%s2834_s4] sm:$0xff]   ;;  %v1795_v47 = vld [vmem:[#allocation11] ss:$0 sm:$0xff] }
  0x69   : > { %1881 = vmatpush3.bf16.msra.mxu1 %v2098_v14  ;;  %1908 = vmatprep.subr.bf16.mxu0 %v2374_v15  ;;  %vm735_vm6 = vcmask 519168   ;;  %v1801_v54 = vld [vmem:[#allocation10] ss:$0 sm:$0xff]  ;;  %vm850_vm7 = vcmask 64512   ;;  %vm846_vm8 = vcmask 257024   ;;  %s2376_s27 = smov 120  }
  0x6a   : > { %s1791_s20 = sshll.u32 %s612_s3, 3  ;;  %1882 = vmatprep.subr.bf16.mxu1 %v2374_v15  ;;  %1910 = vmatprep.mubr.msk.bf16.mxu0 %vm2375_vm1, %v2374_v15  ;;  %s2378_s16 = smov 112   ;;  %vm918_vm9 = vcmask 1043456   ;;  %vm1086_vm10 = vcmask 130112   ;;  %vm1211_vm11 = vcmask 195712   ;;  %vm1336_vm12 = vcmask 261312  }
  0x6b   : > { %s621_s28 = scalar_lea.vmem %s2831_s1, %s1791_s20  ;;  %s2379_s23 = smov 88  }
  0x6c   : > { %s617_s29 = scalar_lea.vmem %s2878_s17, %s1791_s20  ;;  %v627_v0 = vld [vmem:[%s621_s28] sm:$0xff]  ;;  %s2377_s28 = smov 104  }
  0x6d   : > { %v2606_v1 = vld [vmem:[%s617_s29] sm:$0xff]  ;;  %v631_v2 = vsel %vm630_vm0, %v627_v0, 0.0  ;;  %1883 = vmatpush3.bf16.msra.mxu1 %v2099_v16  ;;  %s2380_s17 = smov 80   ;;  %s2381_s29 = smov 96  }
  0x6e   : > { %v741_v3 = vsel %vm630_vm0, %v2606_v1, 0.0  ;;  %632 = vadd.xlane.f32.xlu0 %v631_v2  ;;  %1888 = vmatprep.subr.bf16.mxu1 %v2374_v15  ;;  %s2382_s21 = smov 72   ;;  %s2383_s26 = smov 8  }
  0x6f   : > { %s2384_s18 = smov 16   ;;  %s2385_s30 = smov 24  }
  0x70   : > { %s608_s20 = sand.u32 1, %s2351_s22   ;;  %p2881_p2 = scmp.ne.s32.totalorder %s2867_s0, 0 }
  0x71   : > { %s2386_s3 = smov [#allocation14]  }
  0x72   : > { %742 = vadd.xlane.f32.xlu0 %v741_v3 }
  0xf7   : > { %v633_v4 = vpop.xlane.xlu0 %632 }
  0xf8   : > { %v635_v5 = vmul.f32 0.03125, %v633_v4 }
  0xfa   : > { %v636_v6 = vsub.f32 %v627_v0, %v635_v5 }
  0xfb   : > { %v743_v7 = vpop.xlane.xlu0 %742 }
  0xfc   : > { %v745_v8 = vmul.f32 0.03125, %v743_v7  ;;  %v637_v9 = vmul.f32 %v636_v6, %v636_v6 }
  0xfe   : > { %v746_v10 = vsub.f32 %v2606_v1, %v745_v8  ;;  %v638_v11 = vsel %vm630_vm0, %v637_v9, 0.0 }
  0xff   : > { %639 = vadd.xlane.f32.xlu1 %v638_v11 }
 0x100   : > { %v747_v12 = vmul.f32 %v746_v10, %v746_v10 }
 0x102   : > { %v748_v13 = vsel %vm630_vm0, %v747_v12, 0.0 }
 0x103   : > { %749 = vadd.xlane.f32.xlu1 %v748_v13 }
 0x188   : > { %v640_v17 = vpop.xlane.xlu1 %639 }
 0x189   : > { %v641_v18 = vmul.f32 0.032258064, %v640_v17 }
 0x18b   : > { %2121 = vrsqrt.f32 %v641_v18  ;;  %vm644_vm2 = vcmp.eq.f32.partialorder %v641_v18, inf  ;;  %v647_v23 = vand.u32 2147483648, %v641_v18  ;;  %vm646_vm3 = vcmp.eq.f32.partialorder %v641_v18, 0.0 }
 0x18c   : > { %v750_v19 = vpop.xlane.xlu1 %749 }
 0x18d   : > { %v751_v20 = vmul.f32 0.032258064, %v750_v19 }
 0x18f   : > { %2123 = vrsqrt.f32 %v751_v20  ;;  %vm754_vm4 = vcmp.eq.f32.partialorder %v751_v20, inf  ;;  %v757_v29 = vand.u32 2147483648, %v751_v20  ;;  %vm756_vm5 = vcmp.eq.f32.partialorder %v751_v20, 0.0 }
 0x198   : > { %v2122_v21 = vpop.eup %2121 }
 0x199   : > { %v643_v22 = vmul.f32 %v2122_v21, %v641_v18 }
 0x19b   : > { %v645_v24 = vsel %vm644_vm2, %v641_v18, %v643_v22 }
 0x19c   : > { %v2124_v25 = vpop.eup %2123  ;;  %v648_v26 = vsel %vm646_vm3, %v647_v23, %v645_v24 }
 0x19d   : > { %v649_v27 = vadd.f32 1e-06, %v648_v26  ;;  %v753_v28 = vmul.f32 %v2124_v25, %v751_v20 }
 0x19f   : > { %2125 = vrcp.f32 %v649_v27  ;;  %v755_v30 = vsel %vm754_vm4, %v751_v20, %v753_v28 }
 0x1a0   : > { %v758_v31 = vsel %vm756_vm5, %v757_v29, %v755_v30 }
 0x1a1   : > { %v759_v32 = vadd.f32 1e-06, %v758_v31 }
 0x1a3   : > { %2127 = vrcp.f32 %v759_v32 }
 0x1ac   : > { %v2126_v33 = vpop.eup %2125 }
 0x1ad   : > { %v652_v35 = vmul.f32 %v2126_v33, %v636_v6 }
 0x1af   : > { %v659_v37 = vmul.f32 %v1793_v34, %v652_v35 }
 0x1b0   : > { %v2128_v38 = vpop.eup %2127 }
 0x1b1   : > { %v666_v39 = vadd.f32 %v1794_v36, %v659_v37  ;;  %v762_v40 = vmul.f32 %v2128_v38, %v746_v10 }
 0x1b3   : > { %v667_v42 = vpack.c.bf16 %v666_v39, %v666_v39  ;;  %v769_v43 = vmul.f32 %v1793_v34, %v762_v40 }
 0x1b5   : > { %1885 = vmatmul.mubr.msk.bf16.vlgmr.msra.gmra.mxu1 %vm630_vm0, %v667_v42  ;;  %v776_v45 = vadd.f32 %v1794_v36, %v769_v43 }
 0x1b6   : > { %1889 = vmatpush3.bf16.msra.mxu1 %v2100_v41  ;;  %1892 = vmatprep.mubr.msk.bf16.mxu1 %vm2375_vm1, %v2374_v15 }
 0x1b7   : > { %1890 = vmatprep.subr.bf16.mxu1 %v2374_v15  ;;  %v777_v46 = vpack.c.bf16 %v776_v45, %v776_v45 }
 0x1ba   : > { %1891 = vmatpush3.bf16.msra.mxu1 %v2101_v44 }
 0x1bb   : > { %1896 = vmatprep.subr.bf16.mxu1 %v2374_v15 }
 0x1bd   : > { %1893 = vmatmul.mubr.msk.bf16.vlgmr.msra.gmra.mxu1 %vm630_vm0, %v777_v46 }
 0x1be   : > { %1898 = vmatprep.mubr.msk.bf16.mxu1 %vm2375_vm1, %v2374_v15 }
 0x275   : > { %v728_v48 = vpop.f32.mrf.mxu1 }
 0x276   : > { %v729_v49 = vadd.f32 %v1795_v47, %v728_v48 }
 0x277   : > { %v1886_v50 = vpop.f32.mrf.mxu1 }
 0x278   : > { %v734_v51 = vpack.c.bf16 %v729_v49, %v729_v49 }
 0x279   : > { %v731_v52 = vpop.f32.mrf.mxu1 }
 0x27a   : > { %736 = vst.msk [vmem:[#allocation2] sm:$0xf] %vm735_vm6, %v734_v51 }
 0x27b   : > { %v1887_v53 = vpop.f32.mrf.mxu1 }
 0x27d   : > { %v838_v55 = vpop.f32.mrf.mxu1 }
 0x27e   : > { %v839_v56 = vadd.f32 %v1801_v54, %v838_v55 }
 0x27f   : > { %v1894_v57 = vpop.f32.mrf.mxu1 }
 0x280   : > { %v844_v58 = vmul.f32 0.35355338, %v839_v56 }
 0x281   : > { %v841_v59 = vpop.f32.mrf.mxu1  ;;  %v2642_v60 = vld [vmem:[#allocation2] sm:$0xf] }
 0x282   : > { %v2644_v61 = vld [vmem:[#allocation2] ss:$0 sps:$4 sm:$0xff]   ;;  %v845_v62 = vpack.c.bf16 %v844_v58, %v844_v58  ;;  %v855_v63 = vsel %vm850_vm7, %v2642_v60, 0  ;;  %v1806_v55 = vcombine.low %v2642_v60, %v2642_v60 }
 0x283   : > { %v1895_v0 = vpop.f32.mrf.mxu1  ;;  %1897 = vmatpush3.bf16.xpose.msra.mxu1 %v855_v63  ;;  %973 = vrot.lane.b32.xlu0 %v2644_v61, %s2376_s27  ;;  %v2650_v2 = vld [vmem:[#allocation2] ss:$0 sps:$4 sm:$0xff]  }
 0x284   : > { %847 = vst.msk [vmem:[#allocation3] sm:$0xf] %vm846_vm8, %v845_v62  ;;  %1902 = vmatprep.subr.bf16.mxu1 %v2374_v15  ;;  %v2656_v5 = vld [vmem:[#allocation2] ss:$0 sps:$4 sm:$0xff]  }
 0x287   : > { %1223 = vrot.lane.b32.xlu0 %v2650_v2, %s2377_s28 }
 0x28b   : > { %v848_v3 = vld [vmem:[#allocation3] sm:$0xf] }
 0x28c   : > { %v2104_v4 = vld [vmem:[#allocation3] ss:$0 sps:$4 sm:$0xff]   ;;  %1899 = vmatmul.mubr.msk.bf16.vlgmr.msra.gmra.mxu1 %vm850_vm7, %v848_v3 }
 0x28d   : > { %968 = vrot.lane.b32.xlu1 %v2104_v4, %s2376_s27  ;;  %1904 = vmatprep.mubr.msk.bf16.mxu1 %vm2375_vm1, %v2374_v15  ;;  %v2106_v6 = vld [vmem:[#allocation3] ss:$0 sps:$4 sm:$0xff]  }
 0x28e   : > { %v2107_v7 = vld [vmem:[#allocation3] ss:$0 sps:$4 sm:$0xff]  }
 0x291   : > { %1098 = vrot.lane.b32.xlu1 %v2656_v5, %s2378_s16 }
 0x295   : > { %1093 = vrot.lane.b32.xlu1 %v2106_v6, %s2378_s16  ;;  %s1840_s16 = sshll.u32 %s2359_s24, 7  ;;  %s1628_s24 = scalar_lea.sflag [#allocation7], %s608_s20 }
 0x299   : > { %1218 = vrot.lane.b32.xlu1 %v2107_v7, %s2377_s28 }
 0x2f5   : > { %v974_v8 = vpop.permute.xlu0 %973 }
 0x2f6   : > { %v979_v9 = vsel %vm850_vm7, %v974_v8, 0 }
 0x2f7   : > { %1909 = vmatpush3.bf16.xpose.msra.mxu0 %v979_v9 }
 0x2f8   : > { %1920 = vmatprep.subr.bf16.mxu0 %v2374_v15 }
 0x2f9   : > { %v1224_v13 = vpop.permute.xlu0 %1223 }
 0x2fa   : > { %v1229_v16 = vsel %vm850_vm7, %v1224_v13, 0 }
 0x2ff   : > { %v969_v10 = vpop.permute.xlu1 %968 }
 0x300   : > { %1911 = vmatmul.mubr.msk.bf16.vlgmr.msra.gmra.mxu0 %vm850_vm7, %v969_v10 }
 0x301   : > { %1922 = vmatprep.mubr.msk.bf16.mxu0 %vm2375_vm1, %v2374_v15 }
 0x303   : > { %v1099_v11 = vpop.permute.xlu1 %1098 }
 0x304   : > { %v1104_v12 = vsel %vm850_vm7, %v1099_v11, 0 }
 0x305   : > { %1921 = vmatpush3.bf16.xpose.msra.mxu0 %v1104_v12 }
 0x306   : > { %1932 = vmatprep.subr.bf16.mxu0 %v2374_v15 }
 0x307   : > { %v1094_v14 = vpop.permute.xlu1 %1093 }
 0x30b   : > { %v1219_v17 = vpop.permute.xlu1 %1218 }
 0x30c   : > { %1923 = vmatmul.mubr.msk.bf16.vlgmr.msra.gmra.mxu0 %vm850_vm7, %v1094_v14 }
 0x30d   : > { %1933 = vmatpush3.bf16.xpose.msra.mxu0 %v1229_v16  ;;  %1934 = vmatprep.mubr.msk.bf16.mxu0 %vm2375_vm1, %v2374_v15 }
 0x30e   : > { %1944 = vmatprep.subr.bf16.mxu0 %v2374_v15 }
 0x314   : > { %1935 = vmatmul.mubr.msk.bf16.vlgmr.msra.gmra.mxu0 %vm850_vm7, %v1219_v17 }
 0x315   : > { %1948 = vmatprep.mubr.msk.bf16.mxu0 %vm2375_vm1, %v2374_v15 }
 0x34c   : > { %v891_v18 = vpop.f32.mrf.mxu1 }
 0x34d   : > { %v897_v19 = vsel %vm850_vm7, %v891_v18, -inf }
 0x34e   : > { %898 = vmax.xlane.f32.xlu0 %v897_v19  ;;  %v1900_v20 = vpop.f32.mrf.mxu1 }
 0x350   : > { %v894_v21 = vpop.f32.mrf.mxu1 }
 0x352   : > { %v1901_v22 = vpop.f32.mrf.mxu1 }
 0x3c0   : > { %v1015_v23 = vpop.f32.mrf.mxu0 }
 0x3c1   : > { %v1021_v24 = vsel %vm850_vm7, %v1015_v23, -inf }
 0x3c2   : > { %1022 = vmax.xlane.f32.xlu1 %v1021_v24  ;;  %v1912_v25 = vpop.f32.mrf.mxu0 }
 0x3c4   : > { %v1018_v26 = vpop.f32.mrf.mxu0 }
 0x3c6   : > { %v1913_v27 = vpop.f32.mrf.mxu0 }
 0x3cc   : > { %v1140_v28 = vpop.f32.mrf.mxu0 }
 0x3cd   : > { %v1146_v29 = vsel %vm850_vm7, %v1140_v28, -inf }
 0x3ce   : > { %1147 = vmax.xlane.f32.xlu0 %v1146_v29  ;;  %v1924_v30 = vpop.f32.mrf.mxu0 }
 0x3d0   : > { %v1143_v31 = vpop.f32.mrf.mxu0 }
 0x3d2   : > { %v1925_v32 = vpop.f32.mrf.mxu0 }
 0x3d4   : > { %v1265_v33 = vpop.f32.mrf.mxu0 }
 0x3d5   : > { %v1271_v34 = vsel %vm850_vm7, %v1265_v33, -inf }
 0x3d6   : > { %1272 = vmax.xlane.f32.xlu0 %v1271_v34  ;;  %v1936_v35 = vpop.f32.mrf.mxu0  ;;  %v2110_v34 = vld [vmem:[%s2838_s8] sm:$0xff]  }
 0x3d7   : > { %v899_v36 = vpop.xlane.xlu0 %898 }
 0x3d8   : > { %v900_v37 = vsub.f32 %v891_v18, %v899_v36  ;;  %v1268_v38 = vpop.f32.mrf.mxu0 }
 0x3da   : > { %v901_v39 = vmul.f32 1.442695, %v900_v37  ;;  %v1937_v40 = vpop.f32.mrf.mxu0 }
 0x3dc   : > { %2129 = vpow2.f32 %v901_v39 }
 0x3e9   : > { %v2130_v41 = vpop.eup %2129 }
 0x3ea   : > { %v903_v42 = vsel %vm850_vm7, %v2130_v41, 0.0 }
 0x3eb   : > { %904 = vadd.xlane.f32.xlu0 %v903_v42 }
 0x44b   : > { %v1023_v43 = vpop.xlane.xlu1 %1022 }
 0x44c   : > { %v1024_v44 = vsub.f32 %v1015_v23, %v1023_v43 }
 0x44e   : > { %v1025_v45 = vmul.f32 1.442695, %v1024_v44  ;;  %v1820_v44 = vld [vmem:[#allocation13] ss:$0 sm:$0xff] }
 0x450   : > { %2131 = vpow2.f32 %v1025_v45 }
 0x457   : > { %v1148_v46 = vpop.xlane.xlu0 %1147 }
 0x458   : > { %v1149_v47 = vsub.f32 %v1140_v28, %v1148_v46 }
 0x45a   : > { %v1150_v48 = vmul.f32 1.442695, %v1149_v47 }
 0x45c   : > { %2133 = vpow2.f32 %v1150_v48 }
 0x45d   : > { %v2132_v49 = vpop.eup %2131 }
 0x45e   : > { %v1027_v50 = vsel %vm850_vm7, %v2132_v49, 0.0 }
 0x45f   : > { %1028 = vadd.xlane.f32.xlu1 %v1027_v50  ;;  %v1273_v53 = vpop.xlane.xlu0 %1272 }
 0x460   : > { %v1274_v54 = vsub.f32 %v1265_v33, %v1273_v53  ;;  %v2109_v33 = vld [vmem:[%s2838_s8 + $0x8] sm:$0xff]  }
 0x461   : > { %1945 = vmatpush3.bf16.msra.mxu0 %v2109_v33 }
 0x462   : > { %v1275_v56 = vmul.f32 1.442695, %v1274_v54  ;;  %1946 = vmatprep.subr.bf16.mxu0 %v2374_v15 }
 0x464   : > { %2135 = vpow2.f32 %v1275_v56 }
 0x465   : > { %1947 = vmatpush3.bf16.msra.mxu0 %v2110_v34 }
 0x466   : > { %1960 = vmatprep.subr.bf16.mxu0 %v2374_v15 }
 0x469   : > { %v2134_v51 = vpop.eup %2133 }
 0x46a   : > { %v1152_v52 = vsel %vm850_vm7, %v2134_v51, 0.0 }
 0x46b   : > { %1153 = vadd.xlane.f32.xlu0 %v1152_v52 }
 0x470   : > { %1034 = vrot.lane.b32.xlu1 %v2644_v61, %s2379_s23 }
 0x471   : > { %v2136_v57 = vpop.eup %2135 }
 0x472   : > { %v1277_v58 = vsel %vm850_vm7, %v2136_v57, 0.0 }
 0x474   : > { %1159 = vrot.lane.b32.xlu1 %v2656_v5, %s2380_s17  ;;  %v905_v59 = vpop.xlane.xlu0 %904 }
 0x475   : > { %2137 = vrcp.f32 %v905_v59  ;;  %v2114_v59 = vld [vmem:[%s2844_s14 + $0x30] sm:$0xff]  }
 0x481   : > { %913 = vrot.lane.b32.xlu0 %v1806_v55, %s2381_s29 }
 0x482   : > { %v2138_v62 = vpop.eup %2137 }
 0x483   : > { %v908_v0 = vmul.f32 %v2138_v62, %v2130_v41  ;;  %v2116_v62 = vld [vmem:[%s2844_s14 + $0x20] sm:$0xff]  }
 0x485   : > { %v909_v5 = vpack.c.bf16 %v908_v0, %v908_v0  ;;  %v2118_v0 = vld [vmem:[%s2844_s14 + $0x10] sm:$0xff]  }
 0x498   : > { %1278 = vadd.xlane.f32.xlu1 %v1277_v58  ;;  %v2113_v58 = vld [vmem:[%s2844_s14 + $0x38] sm:$0xff]  }
 0x4a9   : > { %1284 = vrot.lane.b32.xlu1 %v2650_v2, %s2382_s21 }
 0x4e8   : > { %v1029_v61 = vpop.xlane.xlu1 %1028 }
 0x4e9   : > { %2139 = vrcp.f32 %v1029_v61  ;;  %v2115_v61 = vld [vmem:[%s2844_s14 + $0x28] sm:$0xff]  }
 0x4ec   : > { %v1035_v4 = vpop.permute.xlu1 %1034 }
 0x4ed   : > { %v1040_v2 = vsel %vm918_vm9, %v1035_v4, 0 }
 0x4f0   : > { %v1160_v8 = vpop.permute.xlu1 %1159 }
 0x4f1   : > { %v1165_v11 = vsel %vm918_vm9, %v1160_v8, 0 }
 0x4f4   : > { %v1154_v63 = vpop.xlane.xlu0 %1153 }
 0x4f5   : > { %2141 = vrcp.f32 %v1154_v63  ;;  %v2117_v63 = vld [vmem:[%s2844_s14 + $0x18] sm:$0xff]  }
 0x4f6   : > { %v2140_v6 = vpop.eup %2139 }
 0x4f7   : > { %v1032_v7 = vmul.f32 %v2140_v6, %v2132_v49 }
 0x4f8   : > { %v914_v60 = vpop.permute.xlu0 %913 }
 0x4f9   : > { %v920_v3 = vsel %vm918_vm9, %v914_v60, 0  ;;  %v1033_v9 = vpack.c.bf16 %v1032_v7, %v1032_v7 }
 0x4fa   : > { %1903 = vmatpush3.bf16.msra.mxu1 %v920_v3 }
 0x4fb   : > { %1914 = vmatprep.subr.bf16.mxu1 %v2374_v15 }
 0x4fd   : > { %1905 = vmatmul.mubr.msk.bf16.vlgmr.msra.gmra.mxu1 %vm850_vm7, %v909_v5 }
 0x4fe   : > { %1915 = vmatpush3.bf16.msra.mxu1 %v1040_v2  ;;  %1916 = vmatprep.mubr.msk.bf16.mxu1 %vm2375_vm1, %v2374_v15 }
 0x4ff   : > { %1926 = vmatprep.subr.bf16.mxu1 %v2374_v15 }
 0x502   : > { %v2142_v10 = vpop.eup %2141 }
 0x503   : > { %v1157_v12 = vmul.f32 %v2142_v10, %v2134_v51  ;;  %v1824_v10 = vld [vmem:[%s2840_s10] ss:$0 sm:$0xff] }
 0x505   : > { %1917 = vmatmul.mubr.msk.bf16.vlgmr.msra.gmra.mxu1 %vm850_vm7, %v1033_v9  ;;  %v1158_v13 = vpack.c.bf16 %v1157_v12, %v1157_v12  ;;  %v1825_v12 = vld [vmem:[%s2841_s11] ss:$0 sm:$0xff] }
 0x506   : > { %1927 = vmatpush3.bf16.msra.mxu1 %v1165_v11  ;;  %1928 = vmatprep.mubr.msk.bf16.mxu1 %vm2375_vm1, %v2374_v15 }
 0x507   : > { %1938 = vmatprep.subr.bf16.mxu1 %v2374_v15 }
 0x50d   : > { %1929 = vmatmul.mubr.msk.bf16.vlgmr.msra.gmra.mxu1 %vm850_vm7, %v1158_v13 }
 0x50e   : > { %1940 = vmatprep.mubr.msk.bf16.mxu1 %vm2375_vm1, %v2374_v15 }
 0x521   : > { %v1279_v14 = vpop.xlane.xlu1 %1278 }
 0x522   : > { %2143 = vrcp.f32 %v1279_v14 }
 0x525   : > { %v1285_v16 = vpop.permute.xlu1 %1284 }
 0x526   : > { %v1290_v17 = vsel %vm918_vm9, %v1285_v16, 0 }
 0x527   : > { %1939 = vmatpush3.bf16.msra.mxu1 %v1290_v17  ;;  %v2119_v17 = vld [vmem:[%s2844_s14 + $0x8] sm:$0xff]  }
 0x528   : > { %1952 = vmatprep.subr.bf16.mxu1 %v2374_v15 }
 0x52f   : > { %v2144_v18 = vpop.eup %2143 }
 0x530   : > { %v1282_v19 = vmul.f32 %v2144_v18, %v2136_v57  ;;  %v2111_v57 = vld [vmem:[%s2842_s12 + $0x8] sm:$0xff]   ;;  %v2120_v18 = vld [vmem:[%s2844_s14] sm:$0xff]  }
 0x532   : > { %v1283_v20 = vpack.c.bf16 %v1282_v19, %v1282_v19  ;;  %v1826_v19 = vld [vmem:[%s2843_s13] ss:$0 sm:$0xff] }
 0x534   : > { %1941 = vmatmul.mubr.msk.bf16.vlgmr.msra.gmra.mxu1 %vm850_vm7, %v1283_v20 }
 0x535   : > { %1956 = vmatprep.mubr.msk.bf16.mxu1 %vm2375_vm1, %v2374_v15  ;;  %1953 = vmatpush3.bf16.msra.mxu1 %v2111_v57 }
 0x536   : > { %1954 = vmatprep.subr.bf16.mxu1 %v2374_v15 }
 0x5bd   : > { %v956_v21 = vpop.f32.mrf.mxu1 }
 0x5be   : > { %962 = vst.msk [vmem:[#allocation4] sm:$0xff] %vm850_vm7, %v956_v21 }
 0x5bf   : > { %v1906_v22 = vpop.f32.mrf.mxu1 }
 0x5c1   : > { %v959_v23 = vpop.f32.mrf.mxu1 }
 0x5c3   : > { %v1907_v24 = vpop.f32.mrf.mxu1 }
 0x5c5   : > { %v1076_v25 = vpop.f32.mrf.mxu1 }
 0x5c6   : > { %1083 = vrot.lane.b32.xlu0 %v1076_v25, %s2383_s26  ;;  %s2879_s26 = sld [smem:[#allocation28_spill]] }
 0x5c7   : > { %v1918_v26 = vpop.f32.mrf.mxu1 }
 0x5c9   : > { %v1079_v27 = vpop.f32.mrf.mxu1 }
 0x5ca   : > { %v1838_v27 = vld [vmem:[%s2845_s15] ss:$0 sm:$0xff] }
 0x5cb   : > { %v1919_v28 = vpop.f32.mrf.mxu1 }
 0x5cc   : > { %s2783_s25 = scalar_lea.hbm %s2879_s26, %s1840_s16 }
 0x5cd   : > { %v1201_v29 = vpop.f32.mrf.mxu1 }
 0x5ce   : > { %1208 = vrot.lane.b32.xlu1 %v1201_v29, %s2384_s18  ;;  %s2880_s18 = smov %s2879_s26 }
 0x5cf   : > { %v1930_v30 = vpop.f32.mrf.mxu1 }
 0x5d1   : > { %v1204_v31 = vpop.f32.mrf.mxu1 }
 0x5d3   : > { %v1931_v32 = vpop.f32.mrf.mxu1 }
 0x5f4   : > { %v1326_v35 = vpop.f32.mrf.mxu1 }
 0x5f5   : > { %1333 = vrot.lane.b32.xlu0 %v1326_v35, %s2385_s30  ;;  %s1790_s30 = sshll.u32 %s608_s20, 3 }
 0x5f6   : > { %v1942_v36 = vpop.f32.mrf.mxu1  ;;  %s610_s23 = scalar_lea.vmem [#allocation14], %s1790_s30  ;;  %s2283_s30 = sshll.u32 %s2386_s3, 4  ;;  %s2284_s30 = int_to_ptr.vmem [resolvable:$false] %s2283_s30 }
 0x5f7   : > { %s1642_s17 = sshll.u32 %s610_s23, 4  ;;  %s2285_s27 = scalar_lea.vmem %s2284_s30, 256  ;;  %s2785_s17 = int_to_ptr.vmem [resolvable:$true] %s1642_s17 }
 0x5f8   : > { %v1329_v37 = vpop.f32.mrf.mxu1  ;;  %s2279_s19 = scalar_lea.vmem %s2785_s17, 128  ;;  %p2286_p5 = scmp.lt.s32.totalorder %s2785_s17, %s2284_s30 }
 0x5f9   : > { %p2280_p0 = scmp.ne.s32.totalorder %s2785_s17, %s2279_s19  ;;  %p2287_p4 = scmp.lt.s32.totalorder %s2285_s27, %s2279_s19 }
 0x5fa   : > { %v1943_v38 = vpop.f32.mrf.mxu1 }
 0x5fb   : > { %p2281_p8 = pnand %p2280_p0, %p2881_p2  ;;  %p2288_p10 = por %p2287_p4, %p2286_p5 }
 0x5fd   : > { %p2282_p3 = pneg %p2281_p8 }
 0x5ff   : > { %p2289_p11 = pnand %p2288_p10, %p2282_p3 }
 0x638   : > { %v1084_v39 = vpop.permute.xlu0 %1083 }
 0x639   : > { %1087 = vst.msk [vmem:[#allocation4] sm:$0xff] %vm1086_vm10, %v1084_v39 }
 0x640   : > { %v1209_v40 = vpop.permute.xlu1 %1208 }
 0x641   : > { %1212 = vst.msk [vmem:[#allocation4] sm:$0xff] %vm1211_vm11, %v1209_v40 }
 0x667   : > { %v1334_v41 = vpop.permute.xlu0 %1333 }
 0x668   : > { %1337 = vst.msk [vmem:[#allocation4] sm:$0xff] %vm1336_vm12, %v1334_v41 }
 0x66f   : > { %v1338_v42 = vld [vmem:[#allocation4] sm:$0xff] }
 0x670   : > { %v1339_v43 = vpack.c.bf16 %v1338_v42, %v1338_v42 }
 0x672   : > { %1949 = vmatmul.mubr.msk.bf16.vlgmr.msra.gmra.mxu0 %vm630_vm0, %v1339_v43 }
 0x673   : > { %1976 = vmatprep.mubr.msk.bf16.mxu0 %vm2375_vm1, %v2374_v15  ;;  %1961 = vmatpush3.bf16.msra.mxu0 %v2113_v58 }
 0x674   : > { %1962 = vmatprep.subr.bf16.mxu0 %v2374_v15 }
 0x677   : > { %1963 = vmatpush3.bf16.msra.mxu0 %v2114_v59 }
 0x678   : > { %1964 = vmatprep.subr.bf16.mxu0 %v2374_v15 }
 0x67b   : > { %1965 = vmatpush3.bf16.msra.mxu0 %v2115_v61 }
 0x67c   : > { %1966 = vmatprep.subr.bf16.mxu0 %v2374_v15 }
 0x67f   : > { %1967 = vmatpush3.bf16.msra.mxu0 %v2116_v62 }
 0x680   : > { %1968 = vmatprep.subr.bf16.mxu0 %v2374_v15 }
 0x683   : > { %1969 = vmatpush3.bf16.msra.mxu0 %v2117_v63 }
 0x684   : > { %1970 = vmatprep.subr.bf16.mxu0 %v2374_v15 }
 0x687   : > { %1971 = vmatpush3.bf16.msra.mxu0 %v2118_v0 }
 0x688   : > { %1972 = vmatprep.subr.bf16.mxu0 %v2374_v15 }
 0x68b   : > { %1973 = vmatpush3.bf16.msra.mxu0 %v2119_v17 }
 0x68c   : > { %1974 = vmatprep.subr.bf16.mxu0 %v2374_v15 }
 0x68f   : > { %1975 = vmatpush3.bf16.msra.mxu0 %v2120_v18 }
 0x732   : > { %v1400_v45 = vpop.f32.mrf.mxu0 }
 0x733   : > { %v1401_v46 = vadd.f32 %v1820_v44, %v1400_v45 }
 0x734   : > { %v1950_v47 = vpop.f32.mrf.mxu0 }
 0x735   : > { %v2720_v48 = vadd.f32 %v1401_v46, %v2606_v1  ;;  %v2112_v1 = vld [vmem:[%s2842_s12] sm:$0xff]  }
 0x736   : > { %v1403_v49 = vpop.f32.mrf.mxu0  ;;  %1955 = vmatpush3.bf16.msra.mxu1 %v2112_v1 }
 0x737   : > { %v1409_v50 = vsel %vm630_vm0, %v2720_v48, 0.0 }
 0x738   : > { %1410 = vadd.xlane.f32.xlu1 %v1409_v50  ;;  %v1951_v51 = vpop.f32.mrf.mxu0 }
 0x7c1   : > { %v1411_v52 = vpop.xlane.xlu1 %1410 }
 0x7c2   : > { %v1412_v53 = vmul.f32 0.03125, %v1411_v52 }
 0x7c4   : > { %v1413_v54 = vsub.f32 %v2720_v48, %v1412_v53 }
 0x7c6   : > { %v1414_v55 = vmul.f32 %v1413_v54, %v1413_v54 }
 0x7c8   : > { %v1415_v56 = vsel %vm630_vm0, %v1414_v55, 0.0 }
 0x7c9   : > { %1416 = vadd.xlane.f32.xlu0 %v1415_v56 }
 0x852   : > { %v1417_v60 = vpop.xlane.xlu0 %1416 }
 0x853   : > { %v1418_v3 = vmul.f32 0.032258064, %v1417_v60 }
 0x855   : > { %2145 = vrsqrt.f32 %v1418_v3  ;;  %vm1421_vm13 = vcmp.eq.f32.partialorder %v1418_v3, inf  ;;  %v1424_v6 = vand.u32 2147483648, %v1418_v3  ;;  %vm1423_vm14 = vcmp.eq.f32.partialorder %v1418_v3, 0.0 }
 0x862   : > { %v2146_v4 = vpop.eup %2145 }
 0x863   : > { %v1420_v5 = vmul.f32 %v2146_v4, %v1418_v3 }
 0x865   : > { %v1422_v2 = vsel %vm1421_vm13, %v1418_v3, %v1420_v5 }
 0x866   : > { %v1425_v7 = vsel %vm1423_vm14, %v1424_v6, %v1422_v2 }
 0x867   : > { %v1426_v8 = vadd.f32 1e-06, %v1425_v7 }
 0x869   : > { %2147 = vrcp.f32 %v1426_v8 }
 0x876   : > { %v2148_v9 = vpop.eup %2147 }
 0x877   : > { %v1429_v11 = vmul.f32 %v2148_v9, %v1413_v54 }
 0x879   : > { %v1436_v13 = vmul.f32 %v1824_v10, %v1429_v11 }
 0x87b   : > { %v1443_v14 = vadd.f32 %v1825_v12, %v1436_v13 }
 0x87d   : > { %v1444_v16 = vpack.c.bf16 %v1443_v14, %v1443_v14 }
 0x87f   : > { %1957 = vmatmul.mubr.msk.bf16.vlgmr.msra.gmra.mxu1 %vm630_vm0, %v1444_v16 }
 0x93f   : > { %v1505_v20 = vpop.f32.mrf.mxu1 }
 0x940   : > { %v1506_v21 = vadd.f32 %v1826_v19, %v1505_v20 }
 0x941   : > { %v1958_v22 = vpop.f32.mrf.mxu1 }
 0x942   : > { %v1511_v23 = vmax.f32 %v1506_v21, 0.0 }
 0x943   : > { %v1508_v24 = vpop.f32.mrf.mxu1 }
 0x944   : > { %v1512_v25 = vpack.c.bf16 %v1511_v23, %v1511_v23 }
 0x945   : > { %v1959_v26 = vpop.f32.mrf.mxu1 }
 0x946   : > { %1977 = vmatmul.mubr.bf16.vlgmr.msra.gmra.mxu0 %v1512_v25 }
 0xa06   : > { %v1611_v15 = vpop.f32.mrf.mxu0 }
 0xa07   : > { %v1617_v28 = vadd.f32 %v1611_v15, %v2720_v48 }
 0xa08   : > { %v1978_v29 = vpop.f32.mrf.mxu0 }
 0xa09   : > { %v1625_v30 = vadd.f32 %v1838_v27, %v1617_v28 }
 0xa0a   : > { %v1614_v31 = vpop.f32.mrf.mxu0 }
 0xa0b   : > { %1626 = vst.msk [vmem:[%s610_s23] sm:$0xff] %vm630_vm0, %v1625_v30 }
 0xa0c   : > { %v1979_v32 = vpop.f32.mrf.mxu0 }
 0xa0d   : > { %2292 = shalt.err (!%p2289_p11)
}
 0xa0e   : > { %s2293_s28 = scalar_lea.hbm %s2783_s25, 128  ;;  %s2297_s23 = scalar_lea.hbm %s2880_s18, 256 }
 0xa0f   : > { %p2294_p6 = scmp.ne.s32.totalorder %s2783_s25, %s2293_s28  ;;  %p2298_p12 = scmp.lt.s32.totalorder %s2783_s25, %s2880_s18 }
 0xa10   : > { %p2299_p1 = scmp.lt.s32.totalorder %s2297_s23, %s2293_s28 }
 0xa11   : > { %p2295_p7 = pnand %p2294_p6, %p2881_p2 }
 0xa12   : > { %p2300_p13 = por %p2299_p1, %p2298_p12 }
 0xa13   : > { %p2296_p9 = pneg %p2295_p7 }
 0xa15   : > { %p2301_p0 = pnand %p2300_p13, %p2296_p9 }
 0xa17   : > { %2304 = shalt.err (!%p2301_p0)
}
 0xa18   : > { %2000 = dma.vmem_to_hbm [thread:$0]  (%p2881_p2), %s2785_s17, 128, %s2783_s25, %s1628_s24  }
 0xa19 PF: > { %s2882_s26 = sld [smem:[#allocation22_spill]] }
 0xa1a   : > { %s2883_s19 = sld [smem:[#allocation19_spill]] }
 0xa1b   : > { %s2884_s3 = sld [smem:[#allocation24_spill]] }
 0xa1f   : > { %p2032_p8 = scmp.ge.s32.totalorder %s2882_s26, 2 }
 0xa20   : > { %s1654_s30 = sand.u32 1, %s2883_s19  }
 0xa21   : > { %p2885_p3 = scmp.ne.s32.totalorder %s2884_s3, 0  ;;  %s1655_s27 = scalar_lea.sflag [#allocation7], %s1654_s30 }
 0xa23   : > { %p2019_p5 = pnand %p2032_p8, %p2885_p3 }
 0xa25   : > { %p2020_p4 = pneg %p2019_p5 }
 0xa27   : > { %2342 = dma.done.wait (%p2020_p4), %s1655_s27, 128  }
 0xa28   : > { %2344 = vsyncadd (%p2020_p4), %s1655_s27, 4294967168  ;;  %s32_s26 = sadd.s32 1, %s2882_s26   ;;  %s2886_s0 = sld [smem:[#allocation20_spill]] }
 0xa29   : > { %p29_p10 = scmp.ge.s32.totalorder %s32_s26, 4   ;;  %s2887_s23 = sld [smem:[#allocation25_spill]] }
 0xa2a   : > { %s2888_s24 = sld [smem:[#allocation21_spill]]  ;;  %s2890_s21 = smov %s2351_s22 }
 0xa2b   : > { %s2889_s25 = sld [smem:[#allocation23_spill]]  ;;  %31 = sbr.rel (!%p29_p10) target bundleno = 11 (0xb), region = 147 }
 0xa2e   : > { %s2891_s22 = smov %s2886_s0 }
 0xa30   :  { %1660 = vsyncpa [#allocation6], 1 }
 0xa31   :  { %1662 = vsyncpa [#allocation6 + $0x1], 1 }
 0xa32   :  { %1663 = vsyncpa [#allocation9], 1 }
 0xa33   :  { %1664 = vsyncpa [#allocation12], 1 }
 0xa34   :  { %1665 = vsyncpa [#allocation7], 1 }
 0xa35   :  { %1667 = vsyncpa [#allocation7 + $0x1], 1 }

// kernel: tpu_custom_call.1
= control target key start
LH: loop header
LB: loop body
LE: loop exit
PB: predicated region body
PF: predicated region fallthrough
CT: control target
= control target key end

     0   :  { %s2830_s0 = inlined_call_operand.vmem [shape: f32[2,8,32], index: 0, kind: input, shape index: {}]   ;;  %s2831_s1 = inlined_call_operand.vmem [shape: f32[2,8,32], index: 1, kind: input, shape index: {}]   ;;  %s2832_s2 = inlined_call_operand.hbm [shape: f32[1,32], index: 2, kind: input, shape index: {}]   ;;  %s2833_s3 = inlined_call_operand.hbm [shape: f32[1,32], index: 3, kind: input, shape index: {}]   ;;  %s2834_s4 = inlined_call_operand.vmem [shape: bf16[32,32], index: 4, kind: input, shape index: {}]   ;;  %s2835_s5 = inlined_call_operand.hbm [shape: f32[1,32], index: 5, kind: input, shape index: {}]   ;;  %s2836_s6 = inlined_call_operand.vmem [shape: bf16[32,64], index: 6, kind: input, shape index: {}]   ;;  %s2837_s7 = inlined_call_operand.hbm [shape: f32[1,64], index: 7, kind: input, shape index: {}]   ;;  %s2838_s8 = inlined_call_operand.vmem [shape: bf16[32,32], index: 8, kind: input, shape index: {}]   ;;  %s2839_s9 = inlined_call_operand.hbm [shape: f32[1,32], index: 9, kind: input, shape index: {}]   ;;  %s2840_s10 = inlined_call_operand.vmem [shape: f32[1,32], index: 10, kind: input, shape index: {}]   ;;  %s2841_s11 = inlined_call_operand.vmem [shape: f32[1,32], index: 11, kind: input, shape index: {}]   ;;  %s2842_s12 = inlined_call_operand.vmem [shape: bf16[32,128], index: 12, kind: input, shape index: {}]   ;;  %s2843_s13 = inlined_call_operand.vmem [shape: f32[1,128], index: 13, kind: input, shape index: {}]   ;;  %s2844_s14 = inlined_call_operand.vmem [shape: bf16[128,32], index: 14, kind: input, shape index: {}]   ;;  %s2845_s15 = inlined_call_operand.vmem [shape: f32[1,32], index: 15, kind: input, shape index: {}]   ;;  %s2846_s16 = inlined_call_operand.hbm [shape: f32[2,8,32], index: 16, kind: output, shape index: {}]  }
   0x1   :  { %2859 = sst [smem:[#allocation26_spill]] %s2830_s0 }
   0x2   :  { %2860 = sst [smem:[#allocation27_spill]] %s2833_s3 }
   0x3   :  { %2861 = sst [smem:[#allocation28_spill]] %s2846_s16 }
   0x4   :  { %21 = vsyncpa [#allocation6], 0 }
   0x5   :  { %22 = vsyncpa [#allocation9], 0 }
   0x6   :  { %23 = vsyncpa [#allocation12], 0 }
   0x7   :  { %24 = vsyncpa [#allocation7], 0 }
   0x8   :  { %26 = vsyncpa [#allocation7 + $0x1], 0  ;;  %s2472_s21 = smov 0   ;;  %s2474_s22 = smov 0  }
   0x9   :  { %s2476_s23 = smov 0   ;;  %s2478_s24 = smov 0  }
   0xa   :  { %s2480_s25 = smov 0   ;;  %s2482_s26 = smov 0  }
   0xb LB: > { %2862 = sst [smem:[#allocation19_spill]] %s2347_s21  ;;  %s1775_s27 = sadd.s32 4294967295, %s2367_s26   ;;  %s2367_s26 = sphi %s2482_s26, %s32_s26   ;;  %s2363_s25 = sphi %s2480_s25, %s2889_s25   ;;  %s2359_s24 = sphi %s2478_s24, %s2888_s24   ;;  %s2355_s23 = sphi %s2476_s23, %s2887_s23   ;;  %s2351_s22 = sphi %s2474_s22, %s2891_s22   ;;  %s2347_s21 = sphi %s2472_s21, %s2890_s21  }
   0xc   : > { %2863 = sst [smem:[#allocation20_spill]] %s2355_s23  ;;  %s1776_s28 = sadd.s32 4294967294, %s2367_s26  }
   0xd   : > { %2864 = sst [smem:[#allocation21_spill]] %s2363_s25  ;;  %s44_s29 = sadd.s32 1, %s2363_s25 }
   0xe   : > { %2865 = sst [smem:[#allocation22_spill]] %s2367_s26  ;;  %s401_s30 = sadd.s32 1, %s2355_s23 }
   0xf   : > { %p46_p0 = scmp.ge.s32.totalorder %s44_s29, 2  ;;  %p411_p1 = scmp.ne.s32.totalorder %s2355_s23, %s2351_s22 }
  0x10   : > { %p412_p2 = scmp.eq.s32.totalorder %s1775_s27, 1  ;;  %p417_p3 = scmp.ne.s32.totalorder %s2351_s22, %s2347_s21 }
  0x11   : > { %s2893_s29 = smov (%p46_p0, %s44_s29), 0  ;;  %p418_p5 = scmp.eq.s32.totalorder %s1776_s28, 1 }
  0x12   : > { %2866 = sst [smem:[#allocation23_spill]] %s2893_s29  ;;  %p2512_p4 = por %p412_p2, %p411_p1 }
  0x13   : > { %s396_s17 = ssub.s32 %s2363_s25, %s2893_s29  ;;  %p1777_p6 = scmp.ge.s32.totalorder %s2367_s26, 1 }
  0x14   : > { %s2867_s0 = scalar_select %p2512_p4, 1, 0 }
  0x15   : > { %p399_p7 = scmp.eq.s32.totalorder %s396_s17, 0  ;;  %p2519_p8 = por %p418_p5, %p417_p3 }
  0x16   : > { %p425_p9 = scmp.lt.s32.totalorder %s2367_s26, 3  ;;  %p2531_p11 = scmp.eq.s32.totalorder %s1775_s27, 0 }
  0x17   : > { %s2868_s18 = scalar_select %p2519_p8, 1, 0 }
  0x18   : > { %s2525_s19 = scalar_select %p399_p7, %s2355_s23, %s401_s30  }
  0x19   : > { %2869 = sst [smem:[#allocation24_spill]] %s2868_s18  ;;  %p2527_p10 = pnand %p1777_p6, %p425_p9 }
  0x1a   : > { %2870 = sst [smem:[#allocation25_spill]] %s2525_s19  ;;  %s2369_s28 = smov [#allocation8]  }
  0x1b   : > { %s2871_s20 = scalar_select %p2527_p10, 1, 0 }
  0x1c   : > { %s2872_s21 = scalar_select %p2531_p11, 1, 0 }
  0x1d   : > { %p2002_p12 = pneg %p2527_p10  ;;  %s449_s17 = sshll.u32 %s2369_s28, 4  ;;  %s450_s17 = int_to_ptr.vmem [resolvable:$true] %s449_s17 }
  0x1e   : > { %s2370_s29 = smov [#allocation11]   ;;  %s2160_s19 = scalar_lea.vmem %s450_s17, 16 }
  0x1f   : > { %s477_s25 = sshll.u32 %s2370_s29, 4  ;;  %p2539_p13 = pnand %p2531_p11, %p2002_p12  ;;  %s478_s25 = int_to_ptr.vmem [resolvable:$true] %s477_s25 }
  0x20   : > { %p2161_p1 = scmp.ne.s32.totalorder %s450_s17, %s2160_s19  ;;  %s2167_s28 = scalar_lea.vmem %s450_s17, 32 }
  0x21   : > { %p2545_p0 = pneg %p2539_p13  ;;  %p2168_p5 = scmp.lt.s32.totalorder %s450_s17, %s450_s17 }
  0x22   : > { %p2169_p6 = scmp.lt.s32.totalorder %s2167_s28, %s2160_s19 }
  0x23   : > { %p2163_p2 = pnand %p2161_p1, %p2545_p0 }
  0x24   : > { %p2170_p7 = por %p2169_p6, %p2168_p5 }
  0x25   : > { %p2164_p3 = pneg %p2163_p2 }
  0x27   : > { %p2171_p9 = pnand %p2170_p7, %p2164_p3 }
  0x29   : > { %2174 = shalt.err (!%p2171_p9)
}
  0x2a   : > { %s2875_s3 = sld [smem:[#allocation27_spill]]  ;;  %s2186_s18 = scalar_lea.vmem %s478_s25, 16 }
  0x2b   : > { %p2187_p12 = scmp.ne.s32.totalorder %s478_s25, %s2186_s18  ;;  %s2193_s26 = scalar_lea.vmem %s478_s25, 32 }
  0x2c   : > { %p2194_p1 = scmp.lt.s32.totalorder %s478_s25, %s478_s25  ;;  %p2195_p2 = scmp.lt.s32.totalorder %s2193_s26, %s2186_s18 }
  0x2d   : > { %p2189_p8 = pnand %p2187_p12, %p2545_p0 }
  0x2e   : > { %p2196_p11 = por %p2195_p2, %p2194_p1 }
  0x2f   : > { %p2190_p4 = pneg %p2189_p8 }
  0x30   : > { %2008 = dma.hbm_to_vmem [thread:$0]  (!%p2539_p13), %s2875_s3, 16, %s450_s17, [#allocation9]  }
  0x31   : > { %p2197_p10 = pnand %p2196_p11, %p2190_p4 }
  0x33   : > { %2200 = shalt.err (!%p2197_p10)
}
  0x34   : > { %2014 = dma.hbm_to_vmem [thread:$0]  (!%p2539_p13), %s2837_s7, 16, %s478_s25, [#allocation12]  }
  0x35   : > { %s2371_s23 = smov [#allocation5]   ;;  %s2372_s29 = smov [#allocation10]  }
  0x36   : > { %s438_s17 = sshll.u32 %s2371_s23, 4  ;;  %s463_s3 = sshll.u32 %s2372_s29, 4  ;;  %s439_s17 = int_to_ptr.vmem [resolvable:$true] %s438_s17  ;;  %s464_s3 = int_to_ptr.vmem [resolvable:$true] %s463_s3 }
  0x37   : > { %s2212_s16 = scalar_lea.vmem %s439_s17, 16  ;;  %s2219_s26 = scalar_lea.vmem %s439_s17, 32 }
  0x38   : > { %p2213_p8 = scmp.ne.s32.totalorder %s439_s17, %s2212_s16  ;;  %p2220_p4 = scmp.lt.s32.totalorder %s439_s17, %s439_s17 }
  0x39   : > { %p2221_p10 = scmp.lt.s32.totalorder %s2219_s26, %s2212_s16 }
  0x3a   : > { %p2215_p3 = pnand %p2213_p8, %p2545_p0 }
  0x3b   : > { %p2222_p11 = por %p2221_p10, %p2220_p4 }
  0x3c   : > { %p2216_p5 = pneg %p2215_p3 }
  0x3e   : > { %p2223_p6 = pnand %p2222_p11, %p2216_p5 }
  0x40   : > { %2226 = shalt.err (!%p2223_p6)
}
  0x41   : > { %2005 = dma.hbm_to_vmem [thread:$0]  (!%p2539_p13), %s2832_s2, 16, %s439_s17, [#allocation6]  }
  0x42   : > { %s2238_s19 = scalar_lea.vmem %s464_s3, 16  ;;  %s2245_s28 = scalar_lea.vmem %s464_s3, 32 }
  0x43   : > { %p2239_p7 = scmp.ne.s32.totalorder %s464_s3, %s2238_s19  ;;  %p2246_p1 = scmp.lt.s32.totalorder %s464_s3, %s464_s3 }
  0x44   : > { %p2247_p2 = scmp.lt.s32.totalorder %s2245_s28, %s2238_s19 }
  0x45   : > { %p2241_p9 = pnand %p2239_p7, %p2545_p0 }
  0x46   : > { %p2248_p8 = por %p2247_p2, %p2246_p1 }
  0x47   : > { %p2242_p12 = pneg %p2241_p9 }
  0x49   : > { %p2249_p3 = pnand %p2248_p8, %p2242_p12 }
  0x4b   : > { %2252 = shalt.err (!%p2249_p3)
}
  0x4c   : > { %2011 = dma.hbm_to_vmem [thread:$0]  (!%p2539_p13), %s2835_s5, 16, %s464_s3, [#allocation9]  }
  0x4d   : > { %s2373_s17 = smov [#allocation13]  }
  0x4e   : > { %s491_s29 = sshll.u32 %s2373_s17, 4  ;;  %s492_s29 = int_to_ptr.vmem [resolvable:$true] %s491_s29 }
  0x4f   : > { %s2264_s26 = scalar_lea.vmem %s492_s29, 16  ;;  %s2271_s18 = scalar_lea.vmem %s492_s29, 32 }
  0x50   : > { %p2265_p5 = scmp.ne.s32.totalorder %s492_s29, %s2264_s26  ;;  %p2272_p11 = scmp.lt.s32.totalorder %s492_s29, %s492_s29 }
  0x51   : > { %p2273_p6 = scmp.lt.s32.totalorder %s2271_s18, %s2264_s26 }
  0x52   : > { %p2267_p4 = pnand %p2265_p5, %p2545_p0 }
  0x53   : > { %p2274_p7 = por %p2273_p6, %p2272_p11 }
  0x54   : > { %p2268_p10 = pneg %p2267_p4 }
  0x56   : > { %p2275_p9 = pnand %p2274_p7, %p2268_p10 }
  0x58   : > { %2278 = shalt.err (!%p2275_p9)
}
  0x59   : > { %2017 = dma.hbm_to_vmem [thread:$0]  (!%p2539_p13), %s2839_s9, 16, %s492_s29, [#allocation12]  }
  0x5a   : > { %p2876_p12 = scmp.ne.s32.totalorder %s2871_s20, 0 }
  0x5b   : > { %p2877_p1 = scmp.ne.s32.totalorder (!%p2876_p12), %s2872_s21, 0 }
  0x5c   : > { %539 = sbr.rel (%p2876_p12) target bundleno = 2585 (0xa19), region = 84 }
  0x61   : > { %2330 = dma.done.wait (%p2877_p1), [#allocation6], 16  }
  0x62   : > { %2332 = vsyncadd (%p2877_p1), [#allocation6], 4294967280 }
  0x63   : > { %2334 = dma.done.wait (%p2877_p1), [#allocation9], 32  }
  0x64   : > { %2336 = vsyncadd (%p2877_p1), [#allocation9], 4294967264 }
  0x65   : > { %2338 = dma.done.wait (%p2877_p1), [#allocation12], 32  }
  0x66   : > { %2340 = vsyncadd (%p2877_p1), [#allocation12], 4294967264  ;;  %p611_p13 = scmp.lt.s32.totalorder %s2359_s24, 1  ;;  %vm630_vm0 = vcmask 261120   ;;  %s2878_s17 = sld [smem:[#allocation26_spill]]  ;;  %v2098_v14 = vld [vmem:[%s2836_s6 + $0x8] sm:$0xff]  }
  0x67   : > { %v2374_v15 = vmov 0.0   ;;  %vm2375_vm1 = vmmov 0   ;;  %v2099_v16 = vld [vmem:[%s2836_s6] sm:$0xff]   ;;  %v1793_v34 = vld [vmem:[#allocation5] ss:$0 sm:$0xff]  ;;  %v2100_v41 = vld [vmem:[%s2834_s4 + $0x8] sm:$0xff]  }
  0x68   : > { %s612_s3 = scalar_select %p611_p13, %s2359_s24, 1  ;;  %1880 = vmatprep.subr.bf16.mxu1 %v2374_v15  ;;  %1884 = vmatprep.mubr.msk.bf16.mxu1 %vm2375_vm1, %v2374_v15  ;;  %v1794_v36 = vld [vmem:[#allocation8] ss:$0 sm:$0xff]  ;;  %v2101_v44 = vld [vmem:[%s2834_s4] sm:$0xff]   ;;  %v1795_v47 = vld [vmem:[#allocation11] ss:$0 sm:$0xff] }
  0x69   : > { %1881 = vmatpush3.bf16.msra.mxu1 %v2098_v14  ;;  %1908 = vmatprep.subr.bf16.mxu0 %v2374_v15  ;;  %vm735_vm6 = vcmask 519168   ;;  %v1801_v54 = vld [vmem:[#allocation10] ss:$0 sm:$0xff]  ;;  %vm850_vm7 = vcmask 64512   ;;  %vm846_vm8 = vcmask 257024   ;;  %s2376_s27 = smov 120  }
  0x6a   : > { %s1791_s20 = sshll.u32 %s612_s3, 3  ;;  %1882 = vmatprep.subr.bf16.mxu1 %v2374_v15  ;;  %1910 = vmatprep.mubr.msk.bf16.mxu0 %vm2375_vm1, %v2374_v15  ;;  %s2378_s16 = smov 112   ;;  %vm918_vm9 = vcmask 1043456   ;;  %vm1086_vm10 = vcmask 130112   ;;  %vm1211_vm11 = vcmask 195712   ;;  %vm1336_vm12 = vcmask 261312  }
  0x6b   : > { %s621_s28 = scalar_lea.vmem %s2831_s1, %s1791_s20  ;;  %s2379_s23 = smov 88  }
  0x6c   : > { %s617_s29 = scalar_lea.vmem %s2878_s17, %s1791_s20  ;;  %v627_v0 = vld [vmem:[%s621_s28] sm:$0xff]  ;;  %s2377_s28 = smov 104  }
  0x6d   : > { %v2606_v1 = vld [vmem:[%s617_s29] sm:$0xff]  ;;  %v631_v2 = vsel %vm630_vm0, %v627_v0, 0.0  ;;  %1883 = vmatpush3.bf16.msra.mxu1 %v2099_v16  ;;  %s2380_s17 = smov 80   ;;  %s2381_s29 = smov 96  }
  0x6e   : > { %v741_v3 = vsel %vm630_vm0, %v2606_v1, 0.0  ;;  %632 = vadd.xlane.f32.xlu0 %v631_v2  ;;  %1888 = vmatprep.subr.bf16.mxu1 %v2374_v15  ;;  %s2382_s21 = smov 72   ;;  %s2383_s26 = smov 8  }
  0x6f   : > { %s2384_s18 = smov 16   ;;  %s2385_s30 = smov 24  }
  0x70   : > { %s608_s20 = sand.u32 1, %s2351_s22   ;;  %p2881_p2 = scmp.ne.s32.totalorder %s2867_s0, 0 }
  0x71   : > { %s2386_s3 = smov [#allocation14]  }
  0x72   : > { %742 = vadd.xlane.f32.xlu0 %v741_v3 }
  0xf7   : > { %v633_v4 = vpop.xlane.xlu0 %632 }
  0xf8   : > { %v635_v5 = vmul.f32 0.03125, %v633_v4 }
  0xfa   : > { %v636_v6 = vsub.f32 %v627_v0, %v635_v5 }
  0xfb   : > { %v743_v7 = vpop.xlane.xlu0 %742 }
  0xfc   : > { %v745_v8 = vmul.f32 0.03125, %v743_v7  ;;  %v637_v9 = vmul.f32 %v636_v6, %v636_v6 }
  0xfe   : > { %v746_v10 = vsub.f32 %v2606_v1, %v745_v8  ;;  %v638_v11 = vsel %vm630_vm0, %v637_v9, 0.0 }
  0xff   : > { %639 = vadd.xlane.f32.xlu1 %v638_v11 }
 0x100   : > { %v747_v12 = vmul.f32 %v746_v10, %v746_v10 }
 0x102   : > { %v748_v13 = vsel %vm630_vm0, %v747_v12, 0.0 }
 0x103   : > { %749 = vadd.xlane.f32.xlu1 %v748_v13 }
 0x188   : > { %v640_v17 = vpop.xlane.xlu1 %639 }
 0x189   : > { %v641_v18 = vmul.f32 0.032258064, %v640_v17 }
 0x18b   : > { %2121 = vrsqrt.f32 %v641_v18  ;;  %vm644_vm2 = vcmp.eq.f32.partialorder %v641_v18, inf  ;;  %v647_v23 = vand.u32 2147483648, %v641_v18  ;;  %vm646_vm3 = vcmp.eq.f32.partialorder %v641_v18, 0.0 }
 0x18c   : > { %v750_v19 = vpop.xlane.xlu1 %749 }
 0x18d   : > { %v751_v20 = vmul.f32 0.032258064, %v750_v19 }
 0x18f   : > { %2123 = vrsqrt.f32 %v751_v20  ;;  %vm754_vm4 = vcmp.eq.f32.partialorder %v751_v20, inf  ;;  %v757_v29 = vand.u32 2147483648, %v751_v20  ;;  %vm756_vm5 = vcmp.eq.f32.partialorder %v751_v20, 0.0 }
 0x198   : > { %v2122_v21 = vpop.eup %2121 }
 0x199   : > { %v643_v22 = vmul.f32 %v2122_v21, %v641_v18 }
 0x19b   : > { %v645_v24 = vsel %vm644_vm2, %v641_v18, %v643_v22 }
 0x19c   : > { %v2124_v25 = vpop.eup %2123  ;;  %v648_v26 = vsel %vm646_vm3, %v647_v23, %v645_v24 }
 0x19d   : > { %v649_v27 = vadd.f32 1e-06, %v648_v26  ;;  %v753_v28 = vmul.f32 %v2124_v25, %v751_v20 }
 0x19f   : > { %2125 = vrcp.f32 %v649_v27  ;;  %v755_v30 = vsel %vm754_vm4, %v751_v20, %v753_v28 }
 0x1a0   : > { %v758_v31 = vsel %vm756_vm5, %v757_v29, %v755_v30 }
 0x1a1   : > { %v759_v32 = vadd.f32 1e-06, %v758_v31 }
 0x1a3   : > { %2127 = vrcp.f32 %v759_v32 }
 0x1ac   : > { %v2126_v33 = vpop.eup %2125 }
 0x1ad   : > { %v652_v35 = vmul.f32 %v2126_v33, %v636_v6 }
 0x1af   : > { %v659_v37 = vmul.f32 %v1793_v34, %v652_v35 }
 0x1b0   : > { %v2128_v38 = vpop.eup %2127 }
 0x1b1   : > { %v666_v39 = vadd.f32 %v1794_v36, %v659_v37  ;;  %v762_v40 = vmul.f32 %v2128_v38, %v746_v10 }
 0x1b3   : > { %v667_v42 = vpack.c.bf16 %v666_v39, %v666_v39  ;;  %v769_v43 = vmul.f32 %v1793_v34, %v762_v40 }
 0x1b5   : > { %1885 = vmatmul.mubr.msk.bf16.vlgmr.msra.gmra.mxu1 %vm630_vm0, %v667_v42  ;;  %v776_v45 = vadd.f32 %v1794_v36, %v769_v43 }
 0x1b6   : > { %1889 = vmatpush3.bf16.msra.mxu1 %v2100_v41  ;;  %1892 = vmatprep.mubr.msk.bf16.mxu1 %vm2375_vm1, %v2374_v15 }
 0x1b7   : > { %1890 = vmatprep.subr.bf16.mxu1 %v2374_v15  ;;  %v777_v46 = vpack.c.bf16 %v776_v45, %v776_v45 }
 0x1ba   : > { %1891 = vmatpush3.bf16.msra.mxu1 %v2101_v44 }
 0x1bb   : > { %1896 = vmatprep.subr.bf16.mxu1 %v2374_v15 }
 0x1bd   : > { %1893 = vmatmul.mubr.msk.bf16.vlgmr.msra.gmra.mxu1 %vm630_vm0, %v777_v46 }
 0x1be   : > { %1898 = vmatprep.mubr.msk.bf16.mxu1 %vm2375_vm1, %v2374_v15 }
 0x275   : > { %v728_v48 = vpop.f32.mrf.mxu1 }
 0x276   : > { %v729_v49 = vadd.f32 %v1795_v47, %v728_v48 }
 0x277   : > { %v1886_v50 = vpop.f32.mrf.mxu1 }
 0x278   : > { %v734_v51 = vpack.c.bf16 %v729_v49, %v729_v49 }
 0x279   : > { %v731_v52 = vpop.f32.mrf.mxu1 }
 0x27a   : > { %736 = vst.msk [vmem:[#allocation2] sm:$0xf] %vm735_vm6, %v734_v51 }
 0x27b   : > { %v1887_v53 = vpop.f32.mrf.mxu1 }
 0x27d   : > { %v838_v55 = vpop.f32.mrf.mxu1 }
 0x27e   : > { %v839_v56 = vadd.f32 %v1801_v54, %v838_v55 }
 0x27f   : > { %v1894_v57 = vpop.f32.mrf.mxu1 }
 0x280   : > { %v844_v58 = vmul.f32 0.35355338, %v839_v56 }
 0x281   : > { %v841_v59 = vpop.f32.mrf.mxu1  ;;  %v2642_v60 = vld [vmem:[#allocation2] sm:$0xf] }
 0x282   : > { %v2644_v61 = vld [vmem:[#allocation2] ss:$0 sps:$4 sm:$0xff]   ;;  %v845_v62 = vpack.c.bf16 %v844_v58, %v844_v58  ;;  %v855_v63 = vsel %vm850_vm7, %v2642_v60, 0  ;;  %v1806_v55 = vcombine.low %v2642_v60, %v2642_v60 }
 0x283   : > { %v1895_v0 = vpop.f32.mrf.mxu1  ;;  %1897 = vmatpush3.bf16.xpose.msra.mxu1 %v855_v63  ;;  %973 = vrot.lane.b32.xlu0 %v2644_v61, %s2376_s27  ;;  %v2650_v2 = vld [vmem:[#allocation2] ss:$0 sps:$4 sm:$0xff]  }
 0x284   : > { %847 = vst.msk [vmem:[#allocation3] sm:$0xf] %vm846_vm8, %v845_v62  ;;  %1902 = vmatprep.subr.bf16.mxu1 %v2374_v15  ;;  %v2656_v5 = vld [vmem:[#allocation2] ss:$0 sps:$4 sm:$0xff]  }
 0x287   : > { %1223 = vrot.lane.b32.xlu0 %v2650_v2, %s2377_s28 }
 0x28b   : > { %v848_v3 = vld [vmem:[#allocation3] sm:$0xf] }
 0x28c   : > { %v2104_v4 = vld [vmem:[#allocation3] ss:$0 sps:$4 sm:$0xff]   ;;  %1899 = vmatmul.mubr.msk.bf16.vlgmr.msra.gmra.mxu1 %vm850_vm7, %v848_v3 }
 0x28d   : > { %968 = vrot.lane.b32.xlu1 %v2104_v4, %s2376_s27  ;;  %1904 = vmatprep.mubr.msk.bf16.mxu1 %vm2375_vm1, %v2374_v15  ;;  %v2106_v6 = vld [vmem:[#allocation3] ss:$0 sps:$4 sm:$0xff]  }
 0x28e   : > { %v2107_v7 = vld [vmem:[#allocation3] ss:$0 sps:$4 sm:$0xff]  }
 0x291   : > { %1098 = vrot.lane.b32.xlu1 %v2656_v5, %s2378_s16 }
 0x295   : > { %1093 = vrot.lane.b32.xlu1 %v2106_v6, %s2378_s16  ;;  %s1840_s16 = sshll.u32 %s2359_s24, 7  ;;  %s1628_s24 = scalar_lea.sflag [#allocation7], %s608_s20 }
 0x299   : > { %1218 = vrot.lane.b32.xlu1 %v2107_v7, %s2377_s28 }
 0x2f5   : > { %v974_v8 = vpop.permute.xlu0 %973 }
 0x2f6   : > { %v979_v9 = vsel %vm850_vm7, %v974_v8, 0 }
 0x2f7   : > { %1909 = vmatpush3.bf16.xpose.msra.mxu0 %v979_v9 }
 0x2f8   : > { %1920 = vmatprep.subr.bf16.mxu0 %v2374_v15 }
 0x2f9   : > { %v1224_v13 = vpop.permute.xlu0 %1223 }
 0x2fa   : > { %v1229_v16 = vsel %vm850_vm7, %v1224_v13, 0 }
 0x2ff   : > { %v969_v10 = vpop.permute.xlu1 %968 }
 0x300   : > { %1911 = vmatmul.mubr.msk.bf16.vlgmr.msra.gmra.mxu0 %vm850_vm7, %v969_v10 }
 0x301   : > { %1922 = vmatprep.mubr.msk.bf16.mxu0 %vm2375_vm1, %v2374_v15 }
 0x303   : > { %v1099_v11 = vpop.permute.xlu1 %1098 }
 0x304   : > { %v1104_v12 = vsel %vm850_vm7, %v1099_v11, 0 }
 0x305   : > { %1921 = vmatpush3.bf16.xpose.msra.mxu0 %v1104_v12 }
 0x306   : > { %1932 = vmatprep.subr.bf16.mxu0 %v2374_v15 }
 0x307   : > { %v1094_v14 = vpop.permute.xlu1 %1093 }
 0x30b   : > { %v1219_v17 = vpop.permute.xlu1 %1218 }
 0x30c   : > { %1923 = vmatmul.mubr.msk.bf16.vlgmr.msra.gmra.mxu0 %vm850_vm7, %v1094_v14 }
 0x30d   : > { %1933 = vmatpush3.bf16.xpose.msra.mxu0 %v1229_v16  ;;  %1934 = vmatprep.mubr.msk.bf16.mxu0 %vm2375_vm1, %v2374_v15 }
 0x30e   : > { %1944 = vmatprep.subr.bf16.mxu0 %v2374_v15 }
 0x314   : > { %1935 = vmatmul.mubr.msk.bf16.vlgmr.msra.gmra.mxu0 %vm850_vm7, %v1219_v17 }
 0x315   : > { %1948 = vmatprep.mubr.msk.bf16.mxu0 %vm2375_vm1, %v2374_v15 }
 0x34c   : > { %v891_v18 = vpop.f32.mrf.mxu1 }
 0x34d   : > { %v897_v19 = vsel %vm850_vm7, %v891_v18, -inf }
 0x34e   : > { %898 = vmax.xlane.f32.xlu0 %v897_v19  ;;  %v1900_v20 = vpop.f32.mrf.mxu1 }
 0x350   : > { %v894_v21 = vpop.f32.mrf.mxu1 }
 0x352   : > { %v1901_v22 = vpop.f32.mrf.mxu1 }
 0x3c0   : > { %v1015_v23 = vpop.f32.mrf.mxu0 }
 0x3c1   : > { %v1021_v24 = vsel %vm850_vm7, %v1015_v23, -inf }
 0x3c2   : > { %1022 = vmax.xlane.f32.xlu1 %v1021_v24  ;;  %v1912_v25 = vpop.f32.mrf.mxu0 }
 0x3c4   : > { %v1018_v26 = vpop.f32.mrf.mxu0 }
 0x3c6   : > { %v1913_v27 = vpop.f32.mrf.mxu0 }
 0x3cc   : > { %v1140_v28 = vpop.f32.mrf.mxu0 }
 0x3cd   : > { %v1146_v29 = vsel %vm850_vm7, %v1140_v28, -inf }
 0x3ce   : > { %1147 = vmax.xlane.f32.xlu0 %v1146_v29  ;;  %v1924_v30 = vpop.f32.mrf.mxu0 }
 0x3d0   : > { %v1143_v31 = vpop.f32.mrf.mxu0 }
 0x3d2   : > { %v1925_v32 = vpop.f32.mrf.mxu0 }
 0x3d4   : > { %v1265_v33 = vpop.f32.mrf.mxu0 }
 0x3d5   : > { %v1271_v34 = vsel %vm850_vm7, %v1265_v33, -inf }
 0x3d6   : > { %1272 = vmax.xlane.f32.xlu0 %v1271_v34  ;;  %v1936_v35 = vpop.f32.mrf.mxu0  ;;  %v2110_v34 = vld [vmem:[%s2838_s8] sm:$0xff]  }
 0x3d7   : > { %v899_v36 = vpop.xlane.xlu0 %898 }
 0x3d8   : > { %v900_v37 = vsub.f32 %v891_v18, %v899_v36  ;;  %v1268_v38 = vpop.f32.mrf.mxu0 }
 0x3da   : > { %v901_v39 = vmul.f32 1.442695, %v900_v37  ;;  %v1937_v40 = vpop.f32.mrf.mxu0 }
 0x3dc   : > { %2129 = vpow2.f32 %v901_v39 }
 0x3e9   : > { %v2130_v41 = vpop.eup %2129 }
 0x3ea   : > { %v903_v42 = vsel %vm850_vm7, %v2130_v41, 0.0 }
 0x3eb   : > { %904 = vadd.xlane.f32.xlu0 %v903_v42 }
 0x44b   : > { %v1023_v43 = vpop.xlane.xlu1 %1022 }
 0x44c   : > { %v1024_v44 = vsub.f32 %v1015_v23, %v1023_v43 }
 0x44e   : > { %v1025_v45 = vmul.f32 1.442695, %v1024_v44  ;;  %v1820_v44 = vld [vmem:[#allocation13] ss:$0 sm:$0xff] }
 0x450   : > { %2131 = vpow2.f32 %v1025_v45 }
 0x457   : > { %v1148_v46 = vpop.xlane.xlu0 %1147 }
 0x458   : > { %v1149_v47 = vsub.f32 %v1140_v28, %v1148_v46 }
 0x45a   : > { %v1150_v48 = vmul.f32 1.442695, %v1149_v47 }
 0x45c   : > { %2133 = vpow2.f32 %v1150_v48 }
 0x45d   : > { %v2132_v49 = vpop.eup %2131 }
 0x45e   : > { %v1027_v50 = vsel %vm850_vm7, %v2132_v49, 0.0 }
 0x45f   : > { %1028 = vadd.xlane.f32.xlu1 %v1027_v50  ;;  %v1273_v53 = vpop.xlane.xlu0 %1272 }
 0x460   : > { %v1274_v54 = vsub.f32 %v1265_v33, %v1273_v53  ;;  %v2109_v33 = vld [vmem:[%s2838_s8 + $0x8] sm:$0xff]  }
 0x461   : > { %1945 = vmatpush3.bf16.msra.mxu0 %v2109_v33 }
 0x462   : > { %v1275_v56 = vmul.f32 1.442695, %v1274_v54  ;;  %1946 = vmatprep.subr.bf16.mxu0 %v2374_v15 }
 0x464   : > { %2135 = vpow2.f32 %v1275_v56 }
 0x465   : > { %1947 = vmatpush3.bf16.msra.mxu0 %v2110_v34 }
 0x466   : > { %1960 = vmatprep.subr.bf16.mxu0 %v2374_v15 }
 0x469   : > { %v2134_v51 = vpop.eup %2133 }
 0x46a   : > { %v1152_v52 = vsel %vm850_vm7, %v2134_v51, 0.0 }
 0x46b   : > { %1153 = vadd.xlane.f32.xlu0 %v1152_v52 }
 0x470   : > { %1034 = vrot.lane.b32.xlu1 %v2644_v61, %s2379_s23 }
 0x471   : > { %v2136_v57 = vpop.eup %2135 }
 0x472   : > { %v1277_v58 = vsel %vm850_vm7, %v2136_v57, 0.0 }
 0x474   : > { %1159 = vrot.lane.b32.xlu1 %v2656_v5, %s2380_s17  ;;  %v905_v59 = vpop.xlane.xlu0 %904 }
 0x475   : > { %2137 = vrcp.f32 %v905_v59  ;;  %v2114_v59 = vld [vmem:[%s2844_s14 + $0x30] sm:$0xff]  }
 0x481   : > { %913 = vrot.lane.b32.xlu0 %v1806_v55, %s2381_s29 }
 0x482   : > { %v2138_v62 = vpop.eup %2137 }
 0x483   : > { %v908_v0 = vmul.f32 %v2138_v62, %v2130_v41  ;;  %v2116_v62 = vld [vmem:[%s2844_s14 + $0x20] sm:$0xff]  }
 0x485   : > { %v909_v5 = vpack.c.bf16 %v908_v0, %v908_v0  ;;  %v2118_v0 = vld [vmem:[%s2844_s14 + $0x10] sm:$0xff]  }
 0x498   : > { %1278 = vadd.xlane.f32.xlu1 %v1277_v58  ;;  %v2113_v58 = vld [vmem:[%s2844_s14 + $0x38] sm:$0xff]  }
 0x4a9   : > { %1284 = vrot.lane.b32.xlu1 %v2650_v2, %s2382_s21 }
 0x4e8   : > { %v1029_v61 = vpop.xlane.xlu1 %1028 }
 0x4e9   : > { %2139 = vrcp.f32 %v1029_v61  ;;  %v2115_v61 = vld [vmem:[%s2844_s14 + $0x28] sm:$0xff]  }
 0x4ec   : > { %v1035_v4 = vpop.permute.xlu1 %1034 }
 0x4ed   : > { %v1040_v2 = vsel %vm918_vm9, %v1035_v4, 0 }
 0x4f0   : > { %v1160_v8 = vpop.permute.xlu1 %1159 }
 0x4f1   : > { %v1165_v11 = vsel %vm918_vm9, %v1160_v8, 0 }
 0x4f4   : > { %v1154_v63 = vpop.xlane.xlu0 %1153 }
 0x4f5   : > { %2141 = vrcp.f32 %v1154_v63  ;;  %v2117_v63 = vld [vmem:[%s2844_s14 + $0x18] sm:$0xff]  }
 0x4f6   : > { %v2140_v6 = vpop.eup %2139 }
 0x4f7   : > { %v1032_v7 = vmul.f32 %v2140_v6, %v2132_v49 }
 0x4f8   : > { %v914_v60 = vpop.permute.xlu0 %913 }
 0x4f9   : > { %v920_v3 = vsel %vm918_vm9, %v914_v60, 0  ;;  %v1033_v9 = vpack.c.bf16 %v1032_v7, %v1032_v7 }
 0x4fa   : > { %1903 = vmatpush3.bf16.msra.mxu1 %v920_v3 }
 0x4fb   : > { %1914 = vmatprep.subr.bf16.mxu1 %v2374_v15 }
 0x4fd   : > { %1905 = vmatmul.mubr.msk.bf16.vlgmr.msra.gmra.mxu1 %vm850_vm7, %v909_v5 }
 0x4fe   : > { %1915 = vmatpush3.bf16.msra.mxu1 %v1040_v2  ;;  %1916 = vmatprep.mubr.msk.bf16.mxu1 %vm2375_vm1, %v2374_v15 }
 0x4ff   : > { %1926 = vmatprep.subr.bf16.mxu1 %v2374_v15 }
 0x502   : > { %v2142_v10 = vpop.eup %2141 }
 0x503   : > { %v1157_v12 = vmul.f32 %v2142_v10, %v2134_v51  ;;  %v1824_v10 = vld [vmem:[%s2840_s10] ss:$0 sm:$0xff] }
 0x505   : > { %1917 = vmatmul.mubr.msk.bf16.vlgmr.msra.gmra.mxu1 %vm850_vm7, %v1033_v9  ;;  %v1158_v13 = vpack.c.bf16 %v1157_v12, %v1157_v12  ;;  %v1825_v12 = vld [vmem:[%s2841_s11] ss:$0 sm:$0xff] }
 0x506   : > { %1927 = vmatpush3.bf16.msra.mxu1 %v1165_v11  ;;  %1928 = vmatprep.mubr.msk.bf16.mxu1 %vm2375_vm1, %v2374_v15 }
 0x507   : > { %1938 = vmatprep.subr.bf16.mxu1 %v2374_v15 }
 0x50d   : > { %1929 = vmatmul.mubr.msk.bf16.vlgmr.msra.gmra.mxu1 %vm850_vm7, %v1158_v13 }
 0x50e   : > { %1940 = vmatprep.mubr.msk.bf16.mxu1 %vm2375_vm1, %v2374_v15 }
 0x521   : > { %v1279_v14 = vpop.xlane.xlu1 %1278 }
 0x522   : > { %2143 = vrcp.f32 %v1279_v14 }
 0x525   : > { %v1285_v16 = vpop.permute.xlu1 %1284 }
 0x526   : > { %v1290_v17 = vsel %vm918_vm9, %v1285_v16, 0 }
 0x527   : > { %1939 = vmatpush3.bf16.msra.mxu1 %v1290_v17  ;;  %v2119_v17 = vld [vmem:[%s2844_s14 + $0x8] sm:$0xff]  }
 0x528   : > { %1952 = vmatprep.subr.bf16.mxu1 %v2374_v15 }
 0x52f   : > { %v2144_v18 = vpop.eup %2143 }
 0x530   : > { %v1282_v19 = vmul.f32 %v2144_v18, %v2136_v57  ;;  %v2111_v57 = vld [vmem:[%s2842_s12 + $0x8] sm:$0xff]   ;;  %v2120_v18 = vld [vmem:[%s2844_s14] sm:$0xff]  }
 0x532   : > { %v1283_v20 = vpack.c.bf16 %v1282_v19, %v1282_v19  ;;  %v1826_v19 = vld [vmem:[%s2843_s13] ss:$0 sm:$0xff] }
 0x534   : > { %1941 = vmatmul.mubr.msk.bf16.vlgmr.msra.gmra.mxu1 %vm850_vm7, %v1283_v20 }
 0x535   : > { %1956 = vmatprep.mubr.msk.bf16.mxu1 %vm2375_vm1, %v2374_v15  ;;  %1953 = vmatpush3.bf16.msra.mxu1 %v2111_v57 }
 0x536   : > { %1954 = vmatprep.subr.bf16.mxu1 %v2374_v15 }
 0x5bd   : > { %v956_v21 = vpop.f32.mrf.mxu1 }
 0x5be   : > { %962 = vst.msk [vmem:[#allocation4] sm:$0xff] %vm850_vm7, %v956_v21 }
 0x5bf   : > { %v1906_v22 = vpop.f32.mrf.mxu1 }
 0x5c1   : > { %v959_v23 = vpop.f32.mrf.mxu1 }
 0x5c3   : > { %v1907_v24 = vpop.f32.mrf.mxu1 }
 0x5c5   : > { %v1076_v25 = vpop.f32.mrf.mxu1 }
 0x5c6   : > { %1083 = vrot.lane.b32.xlu0 %v1076_v25, %s2383_s26  ;;  %s2879_s26 = sld [smem:[#allocation28_spill]] }
 0x5c7   : > { %v1918_v26 = vpop.f32.mrf.mxu1 }
 0x5c9   : > { %v1079_v27 = vpop.f32.mrf.mxu1 }
 0x5ca   : > { %v1838_v27 = vld [vmem:[%s2845_s15] ss:$0 sm:$0xff] }
 0x5cb   : > { %v1919_v28 = vpop.f32.mrf.mxu1 }
 0x5cc   : > { %s2783_s25 = scalar_lea.hbm %s2879_s26, %s1840_s16 }
 0x5cd   : > { %v1201_v29 = vpop.f32.mrf.mxu1 }
 0x5ce   : > { %1208 = vrot.lane.b32.xlu1 %v1201_v29, %s2384_s18  ;;  %s2880_s18 = smov %s2879_s26 }
 0x5cf   : > { %v1930_v30 = vpop.f32.mrf.mxu1 }
 0x5d1   : > { %v1204_v31 = vpop.f32.mrf.mxu1 }
 0x5d3   : > { %v1931_v32 = vpop.f32.mrf.mxu1 }
 0x5f4   : > { %v1326_v35 = vpop.f32.mrf.mxu1 }
 0x5f5   : > { %1333 = vrot.lane.b32.xlu0 %v1326_v35, %s2385_s30  ;;  %s1790_s30 = sshll.u32 %s608_s20, 3 }
 0x5f6   : > { %v1942_v36 = vpop.f32.mrf.mxu1  ;;  %s610_s23 = scalar_lea.vmem [#allocation14], %s1790_s30  ;;  %s2283_s30 = sshll.u32 %s2386_s3, 4  ;;  %s2284_s30 = int_to_ptr.vmem [resolvable:$false] %s2283_s30 }
 0x5f7   : > { %s1642_s17 = sshll.u32 %s610_s23, 4  ;;  %s2285_s27 = scalar_lea.vmem %s2284_s30, 256  ;;  %s2785_s17 = int_to_ptr.vmem [resolvable:$true] %s1642_s17 }
 0x5f8   : > { %v1329_v37 = vpop.f32.mrf.mxu1  ;;  %s2279_s19 = scalar_lea.vmem %s2785_s17, 128  ;;  %p2286_p5 = scmp.lt.s32.totalorder %s2785_s17, %s2284_s30 }
 0x5f9   : > { %p2280_p0 = scmp.ne.s32.totalorder %s2785_s17, %s2279_s19  ;;  %p2287_p4 = scmp.lt.s32.totalorder %s2285_s27, %s2279_s19 }
 0x5fa   : > { %v1943_v38 = vpop.f32.mrf.mxu1 }
 0x5fb   : > { %p2281_p8 = pnand %p2280_p0, %p2881_p2  ;;  %p2288_p10 = por %p2287_p4, %p2286_p5 }
 0x5fd   : > { %p2282_p3 = pneg %p2281_p8 }
 0x5ff   : > { %p2289_p11 = pnand %p2288_p10, %p2282_p3 }
 0x638   : > { %v1084_v39 = vpop.permute.xlu0 %1083 }
 0x639   : > { %1087 = vst.msk [vmem:[#allocation4] sm:$0xff] %vm1086_vm10, %v1084_v39 }
 0x640   : > { %v1209_v40 = vpop.permute.xlu1 %1208 }
 0x641   : > { %1212 = vst.msk [vmem:[#allocation4] sm:$0xff] %vm1211_vm11, %v1209_v40 }
 0x667   : > { %v1334_v41 = vpop.permute.xlu0 %1333 }
 0x668   : > { %1337 = vst.msk [vmem:[#allocation4] sm:$0xff] %vm1336_vm12, %v1334_v41 }
 0x66f   : > { %v1338_v42 = vld [vmem:[#allocation4] sm:$0xff] }
 0x670   : > { %v1339_v43 = vpack.c.bf16 %v1338_v42, %v1338_v42 }
 0x672   : > { %1949 = vmatmul.mubr.msk.bf16.vlgmr.msra.gmra.mxu0 %vm630_vm0, %v1339_v43 }
 0x673   : > { %1976 = vmatprep.mubr.msk.bf16.mxu0 %vm2375_vm1, %v2374_v15  ;;  %1961 = vmatpush3.bf16.msra.mxu0 %v2113_v58 }
 0x674   : > { %1962 = vmatprep.subr.bf16.mxu0 %v2374_v15 }
 0x677   : > { %1963 = vmatpush3.bf16.msra.mxu0 %v2114_v59 }
 0x678   : > { %1964 = vmatprep.subr.bf16.mxu0 %v2374_v15 }
 0x67b   : > { %1965 = vmatpush3.bf16.msra.mxu0 %v2115_v61 }
 0x67c   : > { %1966 = vmatprep.subr.bf16.mxu0 %v2374_v15 }
 0x67f   : > { %1967 = vmatpush3.bf16.msra.mxu0 %v2116_v62 }
 0x680   : > { %1968 = vmatprep.subr.bf16.mxu0 %v2374_v15 }
 0x683   : > { %1969 = vmatpush3.bf16.msra.mxu0 %v2117_v63 }
 0x684   : > { %1970 = vmatprep.subr.bf16.mxu0 %v2374_v15 }
 0x687   : > { %1971 = vmatpush3.bf16.msra.mxu0 %v2118_v0 }
 0x688   : > { %1972 = vmatprep.subr.bf16.mxu0 %v2374_v15 }
 0x68b   : > { %1973 = vmatpush3.bf16.msra.mxu0 %v2119_v17 }
 0x68c   : > { %1974 = vmatprep.subr.bf16.mxu0 %v2374_v15 }
 0x68f   : > { %1975 = vmatpush3.bf16.msra.mxu0 %v2120_v18 }
 0x732   : > { %v1400_v45 = vpop.f32.mrf.mxu0 }
 0x733   : > { %v1401_v46 = vadd.f32 %v1820_v44, %v1400_v45 }
 0x734   : > { %v1950_v47 = vpop.f32.mrf.mxu0 }
 0x735   : > { %v2720_v48 = vadd.f32 %v1401_v46, %v2606_v1  ;;  %v2112_v1 = vld [vmem:[%s2842_s12] sm:$0xff]  }
 0x736   : > { %v1403_v49 = vpop.f32.mrf.mxu0  ;;  %1955 = vmatpush3.bf16.msra.mxu1 %v2112_v1 }
 0x737   : > { %v1409_v50 = vsel %vm630_vm0, %v2720_v48, 0.0 }
 0x738   : > { %1410 = vadd.xlane.f32.xlu1 %v1409_v50  ;;  %v1951_v51 = vpop.f32.mrf.mxu0 }
 0x7c1   : > { %v1411_v52 = vpop.xlane.xlu1 %1410 }
 0x7c2   : > { %v1412_v53 = vmul.f32 0.03125, %v1411_v52 }
 0x7c4   : > { %v1413_v54 = vsub.f32 %v2720_v48, %v1412_v53 }
 0x7c6   : > { %v1414_v55 = vmul.f32 %v1413_v54, %v1413_v54 }
 0x7c8   : > { %v1415_v56 = vsel %vm630_vm0, %v1414_v55, 0.0 }
 0x7c9   : > { %1416 = vadd.xlane.f32.xlu0 %v1415_v56 }
 0x852   : > { %v1417_v60 = vpop.xlane.xlu0 %1416 }
 0x853   : > { %v1418_v3 = vmul.f32 0.032258064, %v1417_v60 }
 0x855   : > { %2145 = vrsqrt.f32 %v1418_v3  ;;  %vm1421_vm13 = vcmp.eq.f32.partialorder %v1418_v3, inf  ;;  %v1424_v6 = vand.u32 2147483648, %v1418_v3  ;;  %vm1423_vm14 = vcmp.eq.f32.partialorder %v1418_v3, 0.0 }
 0x862   : > { %v2146_v4 = vpop.eup %2145 }
 0x863   : > { %v1420_v5 = vmul.f32 %v2146_v4, %v1418_v3 }
 0x865   : > { %v1422_v2 = vsel %vm1421_vm13, %v1418_v3, %v1420_v5 }
 0x866   : > { %v1425_v7 = vsel %vm1423_vm14, %v1424_v6, %v1422_v2 }
 0x867   : > { %v1426_v8 = vadd.f32 1e-06, %v1425_v7 }
 0x869   : > { %2147 = vrcp.f32 %v1426_v8 }
 0x876   : > { %v2148_v9 = vpop.eup %2147 }
 0x877   : > { %v1429_v11 = vmul.f32 %v2148_v9, %v1413_v54 }
 0x879   : > { %v1436_v13 = vmul.f32 %v1824_v10, %v1429_v11 }
 0x87b   : > { %v1443_v14 = vadd.f32 %v1825_v12, %v1436_v13 }
 0x87d   : > { %v1444_v16 = vpack.c.bf16 %v1443_v14, %v1443_v14 }
 0x87f   : > { %1957 = vmatmul.mubr.msk.bf16.vlgmr.msra.gmra.mxu1 %vm630_vm0, %v1444_v16 }
 0x93f   : > { %v1505_v20 = vpop.f32.mrf.mxu1 }
 0x940   : > { %v1506_v21 = vadd.f32 %v1826_v19, %v1505_v20 }
 0x941   : > { %v1958_v22 = vpop.f32.mrf.mxu1 }
 0x942   : > { %v1511_v23 = vmax.f32 %v1506_v21, 0.0 }
 0x943   : > { %v1508_v24 = vpop.f32.mrf.mxu1 }
 0x944   : > { %v1512_v25 = vpack.c.bf16 %v1511_v23, %v1511_v23 }
 0x945   : > { %v1959_v26 = vpop.f32.mrf.mxu1 }
 0x946   : > { %1977 = vmatmul.mubr.bf16.vlgmr.msra.gmra.mxu0 %v1512_v25 }
 0xa06   : > { %v1611_v15 = vpop.f32.mrf.mxu0 }
 0xa07   : > { %v1617_v28 = vadd.f32 %v1611_v15, %v2720_v48 }
 0xa08   : > { %v1978_v29 = vpop.f32.mrf.mxu0 }
 0xa09   : > { %v1625_v30 = vadd.f32 %v1838_v27, %v1617_v28 }
 0xa0a   : > { %v1614_v31 = vpop.f32.mrf.mxu0 }
 0xa0b   : > { %1626 = vst.msk [vmem:[%s610_s23] sm:$0xff] %vm630_vm0, %v1625_v30 }
 0xa0c   : > { %v1979_v32 = vpop.f32.mrf.mxu0 }
 0xa0d   : > { %2292 = shalt.err (!%p2289_p11)
}
 0xa0e   : > { %s2293_s28 = scalar_lea.hbm %s2783_s25, 128  ;;  %s2297_s23 = scalar_lea.hbm %s2880_s18, 256 }
 0xa0f   : > { %p2294_p6 = scmp.ne.s32.totalorder %s2783_s25, %s2293_s28  ;;  %p2298_p12 = scmp.lt.s32.totalorder %s2783_s25, %s2880_s18 }
 0xa10   : > { %p2299_p1 = scmp.lt.s32.totalorder %s2297_s23, %s2293_s28 }
 0xa11   : > { %p2295_p7 = pnand %p2294_p6, %p2881_p2 }
 0xa12   : > { %p2300_p13 = por %p2299_p1, %p2298_p12 }
 0xa13   : > { %p2296_p9 = pneg %p2295_p7 }
 0xa15   : > { %p2301_p0 = pnand %p2300_p13, %p2296_p9 }
 0xa17   : > { %2304 = shalt.err (!%p2301_p0)
}
 0xa18   : > { %2000 = dma.vmem_to_hbm [thread:$0]  (%p2881_p2), %s2785_s17, 128, %s2783_s25, %s1628_s24  }
 0xa19 PF: > { %s2882_s26 = sld [smem:[#allocation22_spill]] }
 0xa1a   : > { %s2883_s19 = sld [smem:[#allocation19_spill]] }
 0xa1b   : > { %s2884_s3 = sld [smem:[#allocation24_spill]] }
 0xa1f   : > { %p2032_p8 = scmp.ge.s32.totalorder %s2882_s26, 2 }
 0xa20   : > { %s1654_s30 = sand.u32 1, %s2883_s19  }
 0xa21   : > { %p2885_p3 = scmp.ne.s32.totalorder %s2884_s3, 0  ;;  %s1655_s27 = scalar_lea.sflag [#allocation7], %s1654_s30 }
 0xa23   : > { %p2019_p5 = pnand %p2032_p8, %p2885_p3 }
 0xa25   : > { %p2020_p4 = pneg %p2019_p5 }
 0xa27   : > { %2342 = dma.done.wait (%p2020_p4), %s1655_s27, 128  }
 0xa28   : > { %2344 = vsyncadd (%p2020_p4), %s1655_s27, 4294967168  ;;  %s32_s26 = sadd.s32 1, %s2882_s26   ;;  %s2886_s0 = sld [smem:[#allocation20_spill]] }
 0xa29   : > { %p29_p10 = scmp.ge.s32.totalorder %s32_s26, 4   ;;  %s2887_s23 = sld [smem:[#allocation25_spill]] }
 0xa2a   : > { %s2888_s24 = sld [smem:[#allocation21_spill]]  ;;  %s2890_s21 = smov %s2351_s22 }
 0xa2b   : > { %s2889_s25 = sld [smem:[#allocation23_spill]]  ;;  %31 = sbr.rel (!%p29_p10) target bundleno = 11 (0xb), region = 147 }
 0xa2e   : > { %s2891_s22 = smov %s2886_s0 }
 0xa30   :  { %1660 = vsyncpa [#allocation6], 1 }
 0xa31   :  { %1662 = vsyncpa [#allocation6 + $0x1], 1 }
 0xa32   :  { %1663 = vsyncpa [#allocation9], 1 }
 0xa33   :  { %1664 = vsyncpa [#allocation12], 1 }
 0xa34   :  { %1665 = vsyncpa [#allocation7], 1 }
 0xa35   :  { %1667 = vsyncpa [#allocation7 + $0x1], 1 }

</bundles_post_ra>
